<compile_context>
chip_gen: v7x
topology: tpu7x:2x2x1
jax: 0.10.0
libtpu: 0.0.40
codegen_flags: <defaults>
</compile_context>

<pallas_src>
import functools

import jax
import jax.numpy as jnp
from jax import lax
from jax.experimental import pallas as pl
from jax.experimental.pallas import tpu as pltpu

DH = 32            # hidden-state size "dh" of the module
ALPHA = 0.1        # damping coefficient "alpha"

NET4_OUT = 128     # width of the net head's layer-4 output (fixed by the architecture)
SMALL_B = 32       # below this batch size, plain XLA beats a Pallas launch
MAX_TILE_B = 512   # batch-tile cap (per-step overhead amortization; VMEM is not a constraint)


def _round_up(n, m):
    return ((n + m - 1) // m) * m


def _feat_layout(dh):
    """Column layout of the packed lane-dense feature vector."""
    e1_off = dh + 1                                   # E1 right after [h, ornt]
    e2_off = _round_up(dh + 10, 8)                    # E2 at a sublane-aligned offset
    in_lanes = _round_up(max(e2_off + 9, 128), 128)   # lane-dense input width (128 for dh=32)
    return e1_off, e2_off, in_lanes


# -----------------------------------------------------------------------------
# External functions used by the original forward.
# -----------------------------------------------------------------------------
def Efunc(t):
    # TODO(synk): Efunc is not defined in the original source file; deterministic stand-in.
    i = jnp.arange(9, dtype=jnp.float32)
    return jnp.cos(t + 0.3 * i)


def Qfunc(t):
    # TODO(synk): Qfunc is not defined in the original source file; deterministic stand-in.
    i = jnp.arange(9, dtype=jnp.float32)
    return jnp.sin(0.5 * t + 0.2 * i + 0.1)


# -----------------------------------------------------------------------------
# Geometry glue (per state) -- plain JAX, vmapped over the batch inside jit.
# -----------------------------------------------------------------------------
def _geometry(t, y, dh):
    E = Efunc(t)                          # (9,)
    Q = Qfunc(t)                          # (9,)
    ornt = y[dh]
    thetaQ = jnp.arctan2(Q[1], Q[0])
    phaseQ = -ornt / 2.0 + thetaQ
    c, s = jnp.cos(phaseQ), jnp.sin(phaseQ)
    zero = jnp.zeros((), jnp.float32)
    RQ = jnp.stack([jnp.stack([c, -s, zero]),
                    jnp.stack([s, c, zero]),
                    jnp.stack([zero, zero, zero])])   # (3, 3)
    E3 = E.reshape(3, 3)
    Q3 = Q.reshape(3, 3)
    E1 = (RQ.T @ E3 @ RQ).reshape(9)
    E2 = (Q3 @ E3 @ Q3.T).reshape(9)
    return E1, E2


def _pack_features(t, y, dh):
    """Pack y, E1 and E2 into one lane-dense feature row."""
    e1_off, e2_off, in_lanes = _feat_layout(dh)
    E1, E2 = _geometry(t, y, dh)
    x = jnp.zeros((in_lanes,), jnp.float32)
    x = x.at[0:dh + 1].set(y.astype(jnp.float32))
    x = x.at[e1_off:e1_off + 9].set(E1)
    x = x.at[e2_off:e2_off + 9].set(E2)
    return x


# -----------------------------------------------------------------------------
# Parameters: per-head raw weights (PyTorch init) + block-diagonal merge.
# Weights are stored (in, out) so the kernel computes x @ W + b.
# -----------------------------------------------------------------------------
def init_raw_params(key, dh):
    """Per-head (in, out) f32 weights matching the PyTorch init: W ~ N(0, 0.1), b = 0."""
    k_in = dh + 10

    def make(key, dims):
        layers = []
        for din, dout in zip(dims[:-1], dims[1:]):
            key, k = jax.random.split(key)
            w = 0.1 * jax.random.normal(k, (din, dout), jnp.float32)
            layers.append((w, jnp.zeros((dout,), jnp.float32)))
        return key, layers

    key, net = make(key, [k_in, 128, 256, 256, 128, dh])
    key, ornt = make(key, [k_in, 32, 64, 32, 1])
    return {"net": net, "ornt": ornt}


def combine_params(raw, dh):
    """Merge both heads into 5 block-diagonal (in, out) f32 weights and (1, out) biases."""
    e1_off, e2_off, in_lanes = _feat_layout(dh)
    k_in = dh + 10
    (nW1, nb1), (nW2, nb2), (nW3, nb3), (nW4, nb4), (nW5, nb5) = raw["net"]
    (oW1, ob1), (oW2, ob2), (oW3, ob3), (oW4, ob4) = raw["ornt"]

    def blkdiag(a, b):
        out = jnp.zeros((a.shape[0] + b.shape[0], a.shape[1] + b.shape[1]), jnp.float32)
        out = out.at[:a.shape[0], :a.shape[1]].set(a)
        out = out.at[a.shape[0]:, a.shape[1]:].set(b)
        return out

    # Layer 1: shared packed input -> [net 128 | ornt 32].
    n1, o1 = nW1.shape[1], oW1.shape[1]
    w1 = jnp.zeros((in_lanes, n1 + o1), jnp.float32)
    w1 = w1.at[0:dh + 1, 0:n1].set(nW1[0:dh + 1])               # y   -> net
    w1 = w1.at[e1_off:e1_off + 9, 0:n1].set(nW1[dh + 1:k_in])   # E1  -> net
    w1 = w1.at[0:dh + 1, n1:].set(oW1[0:dh + 1])                # y   -> netornt
    w1 = w1.at[e2_off:e2_off + 9, n1:].set(oW1[dh + 1:k_in])    # E2  -> netornt
    b1 = jnp.concatenate([nb1, ob1])[None, :]

    # Layers 2-3: straight block-diagonal merges (ReLU on both heads).
    w2 = blkdiag(nW2, oW2)
    b2 = jnp.concatenate([nb2, ob2])[None, :]
    w3 = blkdiag(nW3, oW3)
    b3 = jnp.concatenate([nb3, ob3])[None, :]

    # Layer 4: net 256->128 (ReLU'd later) | ornt 32->1 rides in column NET4_OUT (no ReLU).
    l4_out = _round_up(NET4_OUT + 1, 8)                         # 136
    w4 = jnp.zeros((nW4.shape[0] + oW4.shape[0], l4_out), jnp.float32)
    w4 = w4.at[:nW4.shape[0], :NET4_OUT].set(nW4)
    w4 = w4.at[nW4.shape[0]:, NET4_OUT:NET4_OUT + 1].set(oW4)
    b4 = jnp.zeros((1, l4_out), jnp.float32)
    b4 = b4.at[0, :NET4_OUT].set(nb4)
    b4 = b4.at[0, NET4_OUT].set(ob4[0])

    # Layer 5: net 128->dh into cols [0:dh]; identity row routes theta to col dh.
    out_lanes = in_lanes                                        # lane-dense output (128)
    w5 = jnp.zeros((l4_out, out_lanes), jnp.float32)
    w5 = w5.at[:NET4_OUT, :dh].set(nW5)
    w5 = w5.at[NET4_OUT, dh].set(1.0)
    b5 = jnp.zeros((1, out_lanes), jnp.float32)
    b5 = b5.at[0, :dh].set(nb5)

    return [w1, b1, w2, b2, w3, b3, w4, b4, w5, b5]


# -----------------------------------------------------------------------------
# Merged MLP math (shared by the Pallas kernel and the small-batch XLA path).
# -----------------------------------------------------------------------------
def _mlp_math(x, params, alpha, dh):
    w1, b1, w2, b2, w3, b3, w4, b4, w5, b5 = params

    def dense(a, w, b, relu):
        y = jnp.dot(a, w, preferred_element_type=jnp.float32) + b
        return jnp.maximum(y, 0.0) if relu else y

    z = dense(x, w1, b1, True)
    z = dense(z, w2, b2, True)
    z = dense(z, w3, b3, True)
    z = dense(z, w4, b4, False)
    # ReLU only on the net columns; theta (col NET4_OUT) passes through un-activated.
    lane = lax.broadcasted_iota(jnp.int32, z.shape, 1)
    z = jnp.where(lane < NET4_OUT, jnp.maximum(z, 0.0), z)
    out = dense(z, w5, b5, False)                  # (TB, 128): cols 0:dh = net, col dh = theta
    # Subtract alpha * [h, ornt] (the first dh+1 columns of the packed input); rest stays 0.
    lane = lax.broadcasted_iota(jnp.int32, out.shape, 1)
    state = jnp.where(lane < dh + 1, x, 0.0)
    return out - alpha * state


def _ode3_kernel(alpha, dh, x_ref,
                 w1, b1, w2, b2, w3, b3, w4, b4, w5, b5,
                 out_ref):
    params = (w1[...], b1[...], w2[...], b2[...], w3[...], b3[...],
              w4[...], b4[...], w5[...], b5[...])
    out_ref[...] = _mlp_math(x_ref[...], params, alpha, dh)


# -----------------------------------------------------------------------------
# pallas_call wrapper.
# -----------------------------------------------------------------------------
def _choose_tiling(batch):
    if batch <= 128:
        t = max(8, _round_up(batch, 8))
        return t, t
    # Guarantee >= 2 grid steps (v7x megacore sharding), cap tile at MAX_TILE_B.
    tile_b = min(MAX_TILE_B, _round_up((batch + 1) // 2, 8))
    return tile_b, _round_up(batch, tile_b)


def _run_mlp_kernel(alpha, dh, x_packed, params):
    batch, in_lanes = x_packed.shape
    tile_b, b_pad = _choose_tiling(batch)
    if b_pad != batch:
        x_packed = jnp.pad(x_packed, ((0, b_pad - batch), (0, 0)))
    grid = (b_pad // tile_b,)
    out_lanes = params[-1].shape[-1]

    # Weights/biases: full-shape blocks with constant index maps -> DMA'd once per call,
    # VMEM-resident across grid steps.
    param_specs = [pl.BlockSpec(p.shape, lambda i: (0, 0)) for p in params]

    out = pl.pallas_call(
        functools.partial(_ode3_kernel, alpha, dh),
        out_shape=jax.ShapeDtypeStruct((b_pad, out_lanes), jnp.float32),
        grid=grid,
        in_specs=[pl.BlockSpec((tile_b, in_lanes), lambda i: (i, 0))] + param_specs,
        out_specs=pl.BlockSpec((tile_b, out_lanes), lambda i: (i, 0)),
        compiler_params=pltpu.CompilerParams(
            dimension_semantics=("parallel",)),
    )(x_packed, *params)

    return out[:batch, :dh + 1]


# -----------------------------------------------------------------------------
# Forward passes.
# -----------------------------------------------------------------------------
@functools.partial(jax.jit, static_argnums=(1,))
def scipy_ode3_forward_batched(params, alpha, ts, ys):
    """Batched RHS: ts (B,), ys (B, dh+1) -> (B, dh+1)."""
    batch, d = ys.shape
    dh = d - 1
    x = jax.vmap(lambda t, y: _pack_features(t, y, dh))(ts, ys)   # (B, 128)
    if batch < SMALL_B:
        # Tiny batches: a Pallas launch + weight DMA dominates -> identical math in XLA.
        return _mlp_math(x, params, alpha, dh)[:, :dh + 1]
    return _run_mlp_kernel(alpha, dh, x, params)


def scipy_ode3_forward(params, alpha, t, y):
    """Single-state RHS matching the PyTorch forward(t, y) semantics."""
    rhs = scipy_ode3_forward_batched(
        params, alpha,
        jnp.reshape(jnp.asarray(t, jnp.float32), (1,)),
        jnp.asarray(y, jnp.float32)[None, :])
    return rhs[0]


# -----------------------------------------------------------------------------
# Pure-JAX, unmerged two-head reference (mirrors the PyTorch module exactly).
# -----------------------------------------------------------------------------
def _reference_rhs_single(raw, alpha, dh, t, y):
    E1, E2 = _geometry(t, y, dh)
    yf = y.astype(jnp.float32)
    yE1 = jnp.concatenate([yf, E1])
    yE2 = jnp.concatenate([yf, E2])

    x = yE1
    for i, (w, b) in enumerate(raw["net"]):
        x = x @ w + b
        if i < len(raw["net"]) - 1:
            x = jax.nn.relu(x)
    hrhs = x - alpha * yf[:dh]

    z = yE2
    for i, (w, b) in enumerate(raw["ornt"]):
        z = z @ w + b
        if i < len(raw["ornt"]) - 1:
            z = jax.nn.relu(z)
    theta = z - alpha * yf[dh]
    return jnp.concatenate([hrhs, theta])


if __name__ == "__main__":
    key = jax.random.PRNGKey(0)
    kp, ky, kt = jax.random.split(key, 3)

    raw = init_raw_params(kp, DH)
    params = combine_params(raw, DH)

    B = 256                                                  # -> 2 batch tiles of 128
    ys = jax.random.normal(ky, (B, DH + 1), jnp.float32)     # states: h (DH) + ornt (1)
    ts = jax.random.uniform(kt, (B,), jnp.float32)           # per-state times

    rhs = scipy_ode3_forward_batched(params, ALPHA, ts, ys)
    rhs = jax.block_until_ready(rhs)
    assert rhs.shape == (B, DH + 1)
    assert rhs.dtype == jnp.float32
    assert bool(jnp.all(jnp.isfinite(rhs)))

    # Validate the block-diagonal merge + fused kernel against the unmerged reference.
    ref = jax.vmap(lambda t, y: _reference_rhs_single(raw, ALPHA, DH, t, y))(ts, ys)
    ref = jax.block_until_ready(ref)
    assert bool(jnp.allclose(rhs, ref, atol=2e-2, rtol=2e-2)), \
        float(jnp.max(jnp.abs(rhs - ref)))

    # Single-state path (exact module semantics, small-B XLA bypass) agrees with the kernel.
    rhs1 = scipy_ode3_forward(params, ALPHA, ts[0], ys[0])
    rhs1 = jax.block_until_ready(rhs1)
    assert rhs1.shape == (DH + 1,)
    assert bool(jnp.allclose(rhs1, rhs[0], atol=2e-2, rtol=2e-2))

    print("KERNEL_OK")
</pallas_src>

<mosaic_0001>
module attributes {stable_mosaic.version = 11 : i64} {
  func.func @_ode3_kernel(%arg0: i32, %arg1: memref<128x128xf32, #tpu.memory_space<vmem>>, %arg2: memref<128x160xf32, #tpu.memory_space<vmem>>, %arg3: memref<1x160xf32, #tpu.memory_space<vmem>>, %arg4: memref<160x320xf32, #tpu.memory_space<vmem>>, %arg5: memref<1x320xf32, #tpu.memory_space<vmem>>, %arg6: memref<320x288xf32, #tpu.memory_space<vmem>>, %arg7: memref<1x288xf32, #tpu.memory_space<vmem>>, %arg8: memref<288x136xf32, #tpu.memory_space<vmem>>, %arg9: memref<1x136xf32, #tpu.memory_space<vmem>>, %arg10: memref<136x128xf32, #tpu.memory_space<vmem>>, %arg11: memref<1x128xf32, #tpu.memory_space<vmem>>, %arg12: memref<128x128xf32, #tpu.memory_space<vmem>>) attributes {dimension_semantics = [#tpu.dimension_semantics<parallel>], iteration_bounds = array<i64: 2>, scalar_prefetch = 0 : i64, scratch_operands = 0 : i64, tpu.core_type = #tpu.core_type<tc>, window_params = [{transform_indices = @transform_0, window_bounds = array<i64: 128, 128>}, {pipeline_mode = #tpu.pipeline_mode<synchronous>, transform_indices = @transform_1, window_bounds = array<i64: 128, 160>}, {pipeline_mode = #tpu.pipeline_mode<synchronous>, transform_indices = @transform_2, window_bounds = array<i64: 1, 160>}, {pipeline_mode = #tpu.pipeline_mode<synchronous>, transform_indices = @transform_3, window_bounds = array<i64: 160, 320>}, {pipeline_mode = #tpu.pipeline_mode<synchronous>, transform_indices = @transform_4, window_bounds = array<i64: 1, 320>}, {pipeline_mode = #tpu.pipeline_mode<synchronous>, transform_indices = @transform_5, window_bounds = array<i64: 320, 288>}, {pipeline_mode = #tpu.pipeline_mode<synchronous>, transform_indices = @transform_6, window_bounds = array<i64: 1, 288>}, {pipeline_mode = #tpu.pipeline_mode<synchronous>, transform_indices = @transform_7, window_bounds = array<i64: 288, 136>}, {pipeline_mode = #tpu.pipeline_mode<synchronous>, transform_indices = @transform_8, window_bounds = array<i64: 1, 136>}, {pipeline_mode = #tpu.pipeline_mode<synchronous>, transform_indices = @transform_9, window_bounds = array<i64: 136, 128>}, {pipeline_mode = #tpu.pipeline_mode<synchronous>, transform_indices = @transform_10, window_bounds = array<i64: 1, 128>}, {transform_indices = @transform_11, window_bounds = array<i64: 128, 128>}]} {
    %c0 = arith.constant 0 : index
    %c0_0 = arith.constant 0 : index
    %0 = vector.load %arg2[%c0, %c0_0] : memref<128x160xf32, #tpu.memory_space<vmem>>, vector<128x160xf32>
    %c0_1 = arith.constant 0 : index
    %c0_2 = arith.constant 0 : index
    %1 = vector.load %arg3[%c0_1, %c0_2] : memref<1x160xf32, #tpu.memory_space<vmem>>, vector<1x160xf32>
    %c0_3 = arith.constant 0 : index
    %c0_4 = arith.constant 0 : index
    %2 = vector.load %arg4[%c0_3, %c0_4] : memref<160x320xf32, #tpu.memory_space<vmem>>, vector<160x320xf32>
    %c0_5 = arith.constant 0 : index
    %c0_6 = arith.constant 0 : index
    %3 = vector.load %arg5[%c0_5, %c0_6] : memref<1x320xf32, #tpu.memory_space<vmem>>, vector<1x320xf32>
    %c0_7 = arith.constant 0 : index
    %c0_8 = arith.constant 0 : index
    %4 = vector.load %arg6[%c0_7, %c0_8] : memref<320x288xf32, #tpu.memory_space<vmem>>, vector<320x288xf32>
    %c0_9 = arith.constant 0 : index
    %c0_10 = arith.constant 0 : index
    %5 = vector.load %arg7[%c0_9, %c0_10] : memref<1x288xf32, #tpu.memory_space<vmem>>, vector<1x288xf32>
    %c0_11 = arith.constant 0 : index
    %c0_12 = arith.constant 0 : index
    %6 = vector.load %arg8[%c0_11, %c0_12] : memref<288x136xf32, #tpu.memory_space<vmem>>, vector<288x136xf32>
    %c0_13 = arith.constant 0 : index
    %c0_14 = arith.constant 0 : index
    %7 = vector.load %arg9[%c0_13, %c0_14] : memref<1x136xf32, #tpu.memory_space<vmem>>, vector<1x136xf32>
    %c0_15 = arith.constant 0 : index
    %c0_16 = arith.constant 0 : index
    %8 = vector.load %arg10[%c0_15, %c0_16] : memref<136x128xf32, #tpu.memory_space<vmem>>, vector<136x128xf32>
    %c0_17 = arith.constant 0 : index
    %c0_18 = arith.constant 0 : index
    %9 = vector.load %arg11[%c0_17, %c0_18] : memref<1x128xf32, #tpu.memory_space<vmem>>, vector<1x128xf32>
    %c0_19 = arith.constant 0 : index
    %c0_20 = arith.constant 0 : index
    %10 = vector.load %arg1[%c0_19, %c0_20] : memref<128x128xf32, #tpu.memory_space<vmem>>, vector<128x128xf32>
    %cst = arith.constant dense<0.000000e+00> : vector<128x160xf32>
    %11 = tpu.matmul %10, %0, %cst {dimension_numbers = #tpu.dot_dimension_numbers<[1], [0], [0], [1], [0, 0, 1, 1], [], []>} : vector<128x128xf32>, vector<128x160xf32>, vector<128x160xf32> -> vector<128x160xf32>
    %12 = vector.broadcast %1 : vector<1x160xf32> to vector<128x160xf32>
    %13 = arith.addf %11, %12 : vector<128x160xf32>
    %cst_21 = arith.constant 0.000000e+00 : f32
    %14 = vector.broadcast %cst_21 : f32 to vector<128x160xf32>
    %15 = arith.maximumf %13, %14 : vector<128x160xf32>
    %cst_22 = arith.constant dense<0.000000e+00> : vector<128x320xf32>
    %16 = tpu.matmul %15, %2, %cst_22 {dimension_numbers = #tpu.dot_dimension_numbers<[1], [0], [0], [1], [0, 0, 1, 1], [], []>} : vector<128x160xf32>, vector<160x320xf32>, vector<128x320xf32> -> vector<128x320xf32>
    %17 = vector.broadcast %3 : vector<1x320xf32> to vector<128x320xf32>
    %18 = arith.addf %16, %17 : vector<128x320xf32>
    %cst_23 = arith.constant 0.000000e+00 : f32
    %19 = vector.broadcast %cst_23 : f32 to vector<128x320xf32>
    %20 = arith.maximumf %18, %19 : vector<128x320xf32>
    %cst_24 = arith.constant dense<0.000000e+00> : vector<128x288xf32>
    %21 = tpu.matmul %20, %4, %cst_24 {dimension_numbers = #tpu.dot_dimension_numbers<[1], [0], [0], [1], [0, 0, 1, 1], [], []>} : vector<128x320xf32>, vector<320x288xf32>, vector<128x288xf32> -> vector<128x288xf32>
    %22 = vector.broadcast %5 : vector<1x288xf32> to vector<128x288xf32>
    %23 = arith.addf %21, %22 : vector<128x288xf32>
    %cst_25 = arith.constant 0.000000e+00 : f32
    %24 = vector.broadcast %cst_25 : f32 to vector<128x288xf32>
    %25 = arith.maximumf %23, %24 : vector<128x288xf32>
    %cst_26 = arith.constant dense<0.000000e+00> : vector<128x136xf32>
    %26 = tpu.matmul %25, %6, %cst_26 {dimension_numbers = #tpu.dot_dimension_numbers<[1], [0], [0], [1], [0, 0, 1, 1], [], []>} : vector<128x288xf32>, vector<288x136xf32>, vector<128x136xf32> -> vector<128x136xf32>
    %27 = vector.broadcast %7 : vector<1x136xf32> to vector<128x136xf32>
    %28 = arith.addf %26, %27 : vector<128x136xf32>
    %29 = tpu.iota {dimensions = array<i32: 1>} : vector<128x136xi32>
    %c128_i32 = arith.constant 128 : i32
    %30 = vector.broadcast %c128_i32 : i32 to vector<128x136xi32>
    %31 = arith.cmpi slt, %29, %30 : vector<128x136xi32>
    %cst_27 = arith.constant 0.000000e+00 : f32
    %32 = vector.broadcast %cst_27 : f32 to vector<128x136xf32>
    %33 = arith.maximumf %28, %32 : vector<128x136xf32>
    %34 = arith.select %31, %33, %28 : vector<128x136xi1>, vector<128x136xf32>
    %cst_28 = arith.constant dense<0.000000e+00> : vector<128x128xf32>
    %35 = tpu.matmul %34, %8, %cst_28 {dimension_numbers = #tpu.dot_dimension_numbers<[1], [0], [0], [1], [0, 0, 1, 1], [], []>} : vector<128x136xf32>, vector<136x128xf32>, vector<128x128xf32> -> vector<128x128xf32>
    %36 = vector.broadcast %9 : vector<1x128xf32> to vector<128x128xf32>
    %37 = arith.addf %35, %36 : vector<128x128xf32>
    %38 = tpu.iota {dimensions = array<i32: 1>} : vector<128x128xi32>
    %c33_i32 = arith.constant 33 : i32
    %39 = vector.broadcast %c33_i32 : i32 to vector<128x128xi32>
    %40 = arith.cmpi slt, %38, %39 : vector<128x128xi32>
    %cst_29 = arith.constant 0.000000e+00 : f32
    %41 = vector.broadcast %cst_29 : f32 to vector<128x128xf32>
    %42 = arith.select %40, %10, %41 : vector<128x128xi1>, vector<128x128xf32>
    %cst_30 = arith.constant 1.000000e-01 : f32
    %43 = vector.broadcast %cst_30 : f32 to vector<128x128xf32>
    %44 = arith.mulf %43, %42 : vector<128x128xf32>
    %45 = arith.subf %37, %44 : vector<128x128xf32>
    %c0_31 = arith.constant 0 : index
    %c0_32 = arith.constant 0 : index
    %46 = vector.load %arg12[%c0_31, %c0_32] : memref<128x128xf32, #tpu.memory_space<vmem>>, vector<128x128xf32>
    tpu.vector_store %arg12[%c0_31, %c0_32], %45 {strides = array<i32>} : memref<128x128xf32, #tpu.memory_space<vmem>>, vector<128x128xf32>,
    return
  }
  func.func @transform_0(%arg0: i32) -> (i32, i32) {
    %c0_i32 = arith.constant 0 : i32
    %c0_i32_0 = arith.constant 0 : i32
    return %arg0, %c0_i32 : i32, i32
  }
  func.func @transform_1(%arg0: i32) -> (i32, i32) {
    %c0_i32 = arith.constant 0 : i32
    %c0_i32_0 = arith.constant 0 : i32
    %c0_i32_1 = arith.constant 0 : i32
    return %c0_i32, %c0_i32_0 : i32, i32
  }
  func.func @transform_2(%arg0: i32) -> (i32, i32) {
    %c0_i32 = arith.constant 0 : i32
    %c0_i32_0 = arith.constant 0 : i32
    %c0_i32_1 = arith.constant 0 : i32
    return %c0_i32, %c0_i32_0 : i32, i32
  }
  func.func @transform_3(%arg0: i32) -> (i32, i32) {
    %c0_i32 = arith.constant 0 : i32
    %c0_i32_0 = arith.constant 0 : i32
    %c0_i32_1 = arith.constant 0 : i32
    return %c0_i32, %c0_i32_0 : i32, i32
  }
  func.func @transform_4(%arg0: i32) -> (i32, i32) {
    %c0_i32 = arith.constant 0 : i32
    %c0_i32_0 = arith.constant 0 : i32
    %c0_i32_1 = arith.constant 0 : i32
    return %c0_i32, %c0_i32_0 : i32, i32
  }
  func.func @transform_5(%arg0: i32) -> (i32, i32) {
    %c0_i32 = arith.constant 0 : i32
    %c0_i32_0 = arith.constant 0 : i32
    %c0_i32_1 = arith.constant 0 : i32
    return %c0_i32, %c0_i32_0 : i32, i32
  }
  func.func @transform_6(%arg0: i32) -> (i32, i32) {
    %c0_i32 = arith.constant 0 : i32
    %c0_i32_0 = arith.constant 0 : i32
    %c0_i32_1 = arith.constant 0 : i32
    return %c0_i32, %c0_i32_0 : i32, i32
  }
  func.func @transform_7(%arg0: i32) -> (i32, i32) {
    %c0_i32 = arith.constant 0 : i32
    %c0_i32_0 = arith.constant 0 : i32
    %c0_i32_1 = arith.constant 0 : i32
    return %c0_i32, %c0_i32_0 : i32, i32
  }
  func.func @transform_8(%arg0: i32) -> (i32, i32) {
    %c0_i32 = arith.constant 0 : i32
    %c0_i32_0 = arith.constant 0 : i32
    %c0_i32_1 = arith.constant 0 : i32
    return %c0_i32, %c0_i32_0 : i32, i32
  }
  func.func @transform_9(%arg0: i32) -> (i32, i32) {
    %c0_i32 = arith.constant 0 : i32
    %c0_i32_0 = arith.constant 0 : i32
    %c0_i32_1 = arith.constant 0 : i32
    return %c0_i32, %c0_i32_0 : i32, i32
  }
  func.func @transform_10(%arg0: i32) -> (i32, i32) {
    %c0_i32 = arith.constant 0 : i32
    %c0_i32_0 = arith.constant 0 : i32
    %c0_i32_1 = arith.constant 0 : i32
    return %c0_i32, %c0_i32_0 : i32, i32
  }
  func.func @transform_11(%arg0: i32) -> (i32, i32) {
    %c0_i32 = arith.constant 0 : i32
    %c0_i32_0 = arith.constant 0 : i32
    return %arg0, %c0_i32 : i32, i32
  }
}

</mosaic_0001>

<bundles_post_ra>
// kernel: neg.4
= control target key start
LH: loop header
LB: loop body
LE: loop exit
PB: predicated region body
PF: predicated region fallthrough
CT: control target
= control target key end

     0   :  { %v21_v4 = vmov 0.0   ;;  %s44_s0 = inlined_call_operand.vmem [shape: f32[256,1], index: 0, kind: input, shape index: {}]   ;;  %s45_s1 = inlined_call_operand.vmem [shape: bf16[256,1], index: 1, kind: output, shape index: {}]  }
   0x1   :  { %v2_v0 = vld [vmem:[%s44_s0] sm:$0x1]  ;;  %v18_v1 = vld [vmem:[%s44_s0 + $0x1] sm:$0x1] }
   0x2   :  { %v5_v2 = vxor.u32 2147483648, %v2_v0  ;;  %v13_v3 = vxor.u32 2147483648, %v18_v1 }
   0x4   :  { %v7_v5 = vpack.c.bf16 %v21_v4, %v5_v2  ;;  %v16_v6 = vpack.c.bf16 %v21_v4, %v13_v3 }
   0x6   :  { %8 = vst [vmem:[%s45_s1] sm:$0x1] %v7_v5  ;;  %19 = vst [vmem:[%s45_s1 + $0x1] sm:$0x1] %v16_v6 }

// kernel: cos.0
= control target key start
LH: loop header
LB: loop body
LE: loop exit
PB: predicated region body
PF: predicated region fallthrough
CT: control target
= control target key end

     0   :  { %v249_v21 = vmov 683565275   ;;  %v250_v23 = vmov 2475754826   ;;  %v251_v25 = vmov 2131351028   ;;  %s362_s0 = inlined_call_operand.vmem [shape: f32[256,1], index: 0, kind: input, shape index: {}]   ;;  %s363_s1 = inlined_call_operand.vmem [shape: bf16[256,1], index: 1, kind: output, shape index: {}]  }
   0x1   :  { %v269_v0 = vld [vmem:[%s362_s0] sm:$0x1]  ;;  %v276_v3 = vld [vmem:[%s362_s0 + $0x1] sm:$0x1]  ;;  %v252_v27 = vmov 2102212464  }
   0x2   :  { %v3_v1 = vand.u32 2147483647, %v269_v0  ;;  %v6_v2 = vand.u32 2139095040, %v269_v0  ;;  %v110_v6 = vand.u32 2147483647, %v276_v3  ;;  %v113_v7 = vand.u32 2139095040, %v276_v3 }
   0x3   :  { %v253_v29 = vmov 920167782   ;;  %v254_v36 = vmov 1326507024   ;;  %vm5_vm14 = vcmp.lt.s32.totalorder %v269_v0, 0 }
   0x4   :  { %v7_v4 = vshrl.u32 %v6_v2, 23  ;;  %v10_v5 = vand.u32 8388607, %v3_v1  ;;  %v114_v9 = vshrl.u32 %v113_v7, 23  ;;  %v284_v13 = vand.u32 8388607, %v110_v6 }
   0x5   :  { %vm333_vm15 = vcmp.le.f32.partialorder %v3_v1, 0.7853982 }
   0x6   :  { %v216_v8 = vadd.s32 4294967169, %v7_v4  ;;  %v11_v11 = vor.u32 8388608, %v10_v5  ;;  %v221_v12 = vadd.s32 4294967169, %v114_v9  ;;  %v118_v19 = vor.u32 8388608, %v284_v13 }
   0x8   :  { %v13_v10 = vadd.s32 1, %v216_v8  ;;  %v120_v15 = vadd.s32 1, %v221_v12  ;;  %v286_v18 = vshll.u32 %v11_v11, 8  ;;  %v158_v13 = vshll.u32 %v118_v19, 8 }
   0xa   :  { %vm14_vm0 = vcmp.gt.s32.totalorder %v13_v10, 0  ;;  %vm121_vm1 = vcmp.gt.s32.totalorder %v120_v15, 0 }
   0xb   :  { %v15_v14 = vsel %vm14_vm0, %v13_v10, 0  ;;  %v122_v41 = vsel %vm121_vm1, %v120_v15, 0  ;;  %vm112_vm0 = vcmp.lt.s32.totalorder %v276_v3, 0  ;;  %vm345_vm1 = vcmp.le.f32.partialorder %v110_v6, 0.7853982 }
   0xc   :  { %v16_v16 = vshrl.u32 %v15_v14, 5  ;;  %v17_v17 = vand.u32 31, %v15_v14  ;;  %v123_v44 = vshrl.u32 %v122_v41, 5  ;;  %v124_v45 = vand.u32 31, %v122_v41 }
   0xe   :  { %v18_v20 = vsub.s32 32, %v17_v17  ;;  %v20_v22 = vshll.u32 %v249_v21, %v17_v17  ;;  %v23_v24 = vshll.u32 %v250_v23, %v17_v17  ;;  %v26_v26 = vshll.u32 %v251_v25, %v17_v17 }
   0xf   :  { %v29_v28 = vshll.u32 %v252_v27, %v17_v17  ;;  %v32_v30 = vshll.u32 %v253_v29, %v17_v17  ;;  %vm35_vm2 = vcmp.lt.s32.totalorder %v16_v16, 1  ;;  %vm36_vm3 = vcmp.lt.s32.totalorder %v16_v16, 2 }
  0x10   :  { %v19_v31 = vshrl.u32 %v249_v21, %v18_v20  ;;  %v21_v32 = vshrl.u32 %v250_v23, %v18_v20  ;;  %v24_v33 = vshrl.u32 %v251_v25, %v18_v20  ;;  %v27_v34 = vshrl.u32 %v252_v27, %v18_v20 }
  0x11   :  { %v30_v35 = vshrl.u32 %v253_v29, %v18_v20  ;;  %v33_v37 = vshrl.u32 %v254_v36, %v18_v20  ;;  %vm37_vm4 = vcmp.lt.s32.totalorder %v16_v16, 3  ;;  %vm38_vm5 = vcmp.lt.s32.totalorder %v16_v16, 4 }
  0x12   :  { %v22_v38 = vor.u32 %v21_v32, %v20_v22  ;;  %v25_v39 = vor.u32 %v24_v33, %v23_v24  ;;  %v28_v40 = vor.u32 %v27_v34, %v26_v26  ;;  %v125_v53 = vsub.s32 32, %v124_v45 }
  0x13   :  { %v31_v42 = vor.u32 %v30_v35, %v29_v28  ;;  %v34_v43 = vor.u32 %v33_v37, %v32_v30  ;;  %v127_v57 = vshll.u32 %v249_v21, %v124_v45  ;;  %v130_v7 = vshll.u32 %v250_v23, %v124_v45 }
  0x14   :  { %v39_v46 = vsel %vm35_vm2, %v19_v31, %v22_v38  ;;  %v40_v47 = vsel %vm38_vm5, %v28_v40, 2102212464  ;;  %v43_v48 = vsel %vm35_vm2, %v22_v38, %v25_v39  ;;  %v47_v49 = vsel %vm35_vm2, %v25_v39, %v28_v40 }
  0x15   :  { %v41_v50 = vsel %vm37_vm4, %v25_v39, %v40_v47  ;;  %v44_v51 = vsel %vm38_vm5, %v31_v42, 920167782  ;;  %v48_v52 = vsel %vm38_vm5, %v34_v43, 1326507024  ;;  %v126_v61 = vshrl.u32 %v249_v21, %v125_v53 }
  0x16   :  { %v42_v54 = vsel %vm36_vm3, %v39_v46, %v41_v50  ;;  %v45_v55 = vsel %vm37_vm4, %v28_v40, %v44_v51  ;;  %v49_v56 = vsel %vm37_vm4, %v31_v42, %v48_v52  ;;  %v128_v5 = vshrl.u32 %v250_v23, %v125_v53 }
  0x17   :  { %v46_v58 = vsel %vm36_vm3, %v43_v48, %v45_v55  ;;  %v50_v59 = vsel %vm36_vm3, %v47_v49, %v49_v56  ;;  %v58_v60 = vmul.u32 %v286_v18, %v42_v54  ;;  %v131_v8 = vshrl.u32 %v251_v25, %v125_v53 }
  0x18   :  { %v301_v62 = vmul.u32.u64.low %v286_v18, %v50_v59  ;;  %v302_v63 = vmul.u32.u64.high %v286_v18, %v50_v59, %v301_v62  ;;  %v305_v2 = vmul.u32.u64.low %v286_v18, %v46_v58  ;;  %v306_v4 = vmul.u32.u64.high %v286_v18, %v46_v58, %v305_v2 }
  0x19   :  { %v133_v9 = vshll.u32 %v251_v25, %v124_v45  ;;  %v134_v10 = vshrl.u32 %v252_v27, %v125_v53  ;;  %v136_v11 = vshll.u32 %v252_v27, %v124_v45  ;;  %v137_v12 = vshrl.u32 %v253_v29, %v125_v53 }
  0x1a   :  { %v139_v14 = vshll.u32 %v253_v29, %v124_v45  ;;  %v129_v15 = vor.u32 %v128_v5, %v127_v57  ;;  %v132_v16 = vor.u32 %v131_v8, %v130_v7  ;;  %v140_v17 = vshrl.u32 %v254_v36, %v125_v53 }
  0x1b   :  { %vm142_vm6 = vcmp.lt.s32.totalorder %v123_v44, 1  ;;  %vm60_vm7 = vc.u32 %v302_v63, %v305_v2  ;;  %v61_v18 = vadd.s32 1, %v306_v4  ;;  %v135_v20 = vor.u32 %v134_v10, %v133_v9 }
  0x1c   :  { %v138_v19 = vor.u32 %v137_v12, %v136_v11  ;;  %v141_v21 = vor.u32 %v140_v17, %v139_v14  ;;  %vm143_vm8 = vcmp.lt.s32.totalorder %v123_v44, 2  ;;  %vm144_vm9 = vcmp.lt.s32.totalorder %v123_v44, 3 }
  0x1d   :  { %v62_v22 = vsel %vm60_vm7, %v61_v18, %v306_v4  ;;  %vm145_vm10 = vcmp.lt.s32.totalorder %v123_v44, 4  ;;  %v146_v23 = vsel %vm142_vm6, %v126_v61, %v129_v15  ;;  %v150_v24 = vsel %vm142_vm6, %v129_v15, %v132_v16 }
  0x1e   :  { %v63_v25 = vadd.s32 %v62_v22, %v58_v60  ;;  %v147_v26 = vsel %vm145_vm10, %v135_v20, 2102212464  ;;  %v151_v27 = vsel %vm145_vm10, %v138_v19, 920167782  ;;  %v154_v28 = vsel %vm142_vm6, %v132_v16, %v135_v20 }
  0x1f   :  { %v148_v29 = vsel %vm144_vm9, %v132_v16, %v147_v26  ;;  %v152_v30 = vsel %vm144_vm9, %v135_v20, %v151_v27  ;;  %v155_v31 = vsel %vm145_vm10, %v141_v21, 1326507024  ;;  %v59_v55 = vadd.s32 %v305_v2, %v302_v63 }
  0x20   :  { %v64_v32 = vadd.s32 536870912, %v63_v25  ;;  %v153_v33 = vsel %vm143_vm8, %v150_v24, %v152_v30  ;;  %v156_v34 = vsel %vm144_vm9, %v138_v19, %v155_v31  ;;  %v149_v35 = vsel %vm143_vm8, %v146_v23, %v148_v29 }
  0x21   :  { %v157_v36 = vsel %vm143_vm8, %v154_v28, %v156_v34  ;;  %v319_v37 = vmul.u32.u64.low %v158_v13, %v153_v33  ;;  %v320_v38 = vmul.u32.u64.high %v158_v13, %v153_v33, %v319_v37  ;;  %v165_v43 = vmul.u32 %v158_v13, %v149_v35 }
  0x22   :  { %v65_v39 = vshrl.u32 %v64_v32, 30  ;;  %v322_v40 = vmul.u32.u64.low %v158_v13, %v157_v36  ;;  %v323_v41 = vmul.u32.u64.high %v158_v13, %v157_v36, %v322_v40  ;;  %vm95_vm5 = vweird.f32 %v269_v0 }
  0x23   :  { %v168_v44 = vadd.s32 1, %v320_v38  ;;  %vm202_vm9 = vweird.f32 %v276_v3 }
  0x24   :  { %v66_v42 = vshll.u32 %v65_v39, 30  ;;  %vm167_vm11 = vc.u32 %v323_v41, %v319_v37  ;;  %v166_v12 = vadd.s32 %v319_v37, %v323_v41  ;;  %v89_v13 = vsub.s32 4, %v65_v39 }
  0x25   :  { %v169_v46 = vsel %vm167_vm11, %v168_v44, %v320_v38 }
  0x26   :  { %v67_v45 = vsub.s32 %v63_v25, %v66_v42  ;;  %v170_v48 = vadd.s32 %v169_v46, %v165_v43  ;;  %v90_v26 = vsel %vm5_vm14, %v89_v13, %v65_v39  ;;  %v255_v46 = vmov 0.0  }
  0x27   :  { %v92_v29 = vsel %vm333_vm15, 0, %v90_v26 }
  0x28   :  { %v69_v47 = vsub.s32 0, %v67_v45  ;;  %v171_v50 = vadd.s32 536870912, %v170_v48  ;;  %v96_v32 = vand.u32 3, %v92_v29 }
  0x2a   :  { %v217_v49 = vmin.u32 %v69_v47, %v67_v45  ;;  %v172_v52 = vshrl.u32 %v171_v50, 30  ;;  %vm101_vm2 = vcmp.eq.s32.totalorder %v96_v32, 2  ;;  %vm98_vm3 = vcmp.eq.s32.totalorder %v96_v32, 0 }
  0x2b   :  { %vm97_vm4 = vcmp.lt.s32.totalorder %v96_v32, 2 }
  0x2c   :  { %v71_v51 = vclz %v217_v49  ;;  %v173_v54 = vshll.u32 %v172_v52, 30  ;;  %v196_v34 = vsub.s32 4, %v172_v52 }
  0x2e   :  { %v218_v53 = vadd.s32 4294967294, %v71_v51  ;;  %v174_v57 = vsub.s32 %v170_v48, %v173_v54  ;;  %v197_v40 = vsel %vm112_vm0, %v196_v34, %v172_v52 }
  0x2f   :  { %v199_v43 = vsel %vm345_vm1, 0, %v197_v40 }
  0x30   :  { %vm219_vm12 = vcmp.lt.s32.totalorder %v218_v53, 0  ;;  %v176_v61 = vsub.s32 0, %v174_v57  ;;  %v203_v48 = vand.u32 3, %v199_v43 }
  0x31   :  { %v74_v56 = vsel %vm219_vm12, 0, %v218_v53 }
  0x32   :  { %v75_v58 = vsub.s32 32, %v74_v56  ;;  %v76_v59 = vshll.u32 %v67_v45, %v74_v56  ;;  %v79_v60 = vsub.s32 4294967266, %v74_v56  ;;  %v222_v2 = vmin.u32 %v176_v61, %v174_v57 }
  0x33   :  { %vm208_vm6 = vcmp.eq.s32.totalorder %v203_v48, 2  ;;  %vm205_vm7 = vcmp.eq.s32.totalorder %v203_v48, 0  ;;  %vm204_vm8 = vcmp.lt.s32.totalorder %v203_v48, 2 }
  0x34   :  { %v77_v62 = vshrl.u32 %v59_v55, %v75_v58  ;;  %v80_v63 = vadd.s32 127, %v79_v60  ;;  %v178_v7 = vclz %v222_v2 }
  0x36   :  { %v78_v4 = vor.u32 %v77_v62, %v76_v59  ;;  %v81_v5 = vshll.u32 %v80_v63, 23  ;;  %v223_v10 = vadd.s32 4294967294, %v178_v7 }
  0x38   :  { %v82_v8 = vor.u32 4788187, %v81_v5  ;;  %v85_v9 = vcvt.s32.f32 %v78_v4  ;;  %vm224_vm13 = vcmp.lt.s32.totalorder %v223_v10, 0 }
  0x39   :  { %v181_v15 = vsel %vm224_vm13, 0, %v223_v10 }
  0x3a   :  { %v83_v11 = vand.u32 2147483647, %v82_v8  ;;  %v182_v16 = vsub.s32 32, %v181_v15  ;;  %v183_v17 = vshll.u32 %v174_v57, %v181_v15  ;;  %v186_v18 = vsub.s32 4294967266, %v181_v15 }
  0x3c   :  { %v86_v14 = vmul.f32 %v85_v9, %v83_v11  ;;  %v184_v19 = vshrl.u32 %v166_v12, %v182_v16  ;;  %v187_v21 = vadd.s32 127, %v186_v18 }
  0x3e   :  { %v87_v20 = vxor.u32 2147483648, %v86_v14  ;;  %v185_v24 = vor.u32 %v184_v19, %v183_v17  ;;  %v188_v25 = vshll.u32 %v187_v21, 23 }
  0x40   :  { %v88_v22 = vsel %vm5_vm14, %v87_v20, %v86_v14  ;;  %v189_v27 = vor.u32 4788187, %v188_v25  ;;  %v192_v28 = vcvt.s32.f32 %v185_v24 }
  0x41   :  { %v91_v23 = vsel %vm333_vm15, %v269_v0, %v88_v22 }
  0x42   :  { %241 = vcosq.f32 %v91_v23  ;;  %v190_v30 = vand.u32 2147483647, %v189_v27 }
  0x43   :  { %243 = vsinq.f32 %v91_v23 }
  0x44   :  { %v193_v31 = vmul.f32 %v192_v28, %v190_v30 }
  0x46   :  { %v194_v33 = vxor.u32 2147483648, %v193_v31 }
  0x48   :  { %v195_v35 = vsel %vm112_vm0, %v194_v33, %v193_v31 }
  0x49   :  { %v198_v37 = vsel %vm345_vm1, %v276_v3, %v195_v35 }
  0x4a   :  { %245 = vcosq.f32 %v198_v37 }
  0x4b   :  { %247 = vsinq.f32 %v198_v37 }
  0x4c   :  { %v242_v36 = vpop.eup %241 }
  0x4d   :  { %v244_v38 = vpop.eup %243  ;;  %v102_v39 = vxor.u32 2147483648, %v242_v36 }
  0x4e   :  { %v99_v41 = vxor.u32 2147483648, %v244_v38 }
  0x4f   :  { %v103_v0 = vsel %vm101_vm2, %v102_v39, %v244_v38 }
  0x50   :  { %v100_v42 = vsel %vm98_vm3, %v242_v36, %v99_v41 }
  0x51   :  { %v104_v44 = vsel %vm97_vm4, %v100_v42, %v103_v0 }
  0x52   :  { %v105_v45 = vsel %vm95_vm5, nan, %v104_v44 }
  0x53   :  { %v106_v47 = vpack.c.bf16 %v255_v46, %v105_v45 }
  0x54   :  { %v246_v49 = vpop.eup %245 }
  0x55   :  { %107 = vst [vmem:[%s363_s1] sm:$0x1] %v106_v47  ;;  %v248_v50 = vpop.eup %247  ;;  %v209_v51 = vxor.u32 2147483648, %v246_v49 }
  0x56   :  { %v206_v52 = vxor.u32 2147483648, %v248_v50 }
  0x57   :  { %v210_v3 = vsel %vm208_vm6, %v209_v51, %v248_v50 }
  0x58   :  { %v207_v53 = vsel %vm205_vm7, %v246_v49, %v206_v52 }
  0x59   :  { %v211_v54 = vsel %vm204_vm8, %v207_v53, %v210_v3 }
  0x5a   :  { %v212_v55 = vsel %vm202_vm9, nan, %v211_v54 }
  0x5b   :  { %v214_v56 = vpack.c.bf16 %v255_v46, %v212_v55 }
  0x5d   :  { %225 = vst [vmem:[%s363_s1 + $0x1] sm:$0x1] %v214_v56 }

// kernel: scipy_ode3_forward_batched.1
= control target key start
LH: loop header
LB: loop body
LE: loop exit
PB: predicated region body
PF: predicated region fallthrough
CT: control target
= control target key end

     0   :  { %s3620_s17 = smov 0   ;;  %s5296_s0 = inlined_call_operand.vmem [shape: f32[256,128], index: 0, kind: input, shape index: {}]   ;;  %s5297_s1 = inlined_call_operand.vmem [shape: f32[128,160], index: 1, kind: input, shape index: {}]   ;;  %s5298_s2 = inlined_call_operand.vmem [shape: f32[1,160], index: 2, kind: input, shape index: {}]   ;;  %s5299_s3 = inlined_call_operand.vmem [shape: f32[160,320], index: 3, kind: input, shape index: {}]   ;;  %s5300_s4 = inlined_call_operand.vmem [shape: f32[1,320], index: 4, kind: input, shape index: {}]   ;;  %s5301_s5 = inlined_call_operand.vmem [shape: f32[320,288], index: 5, kind: input, shape index: {}]   ;;  %s5302_s6 = inlined_call_operand.vmem [shape: f32[1,288], index: 6, kind: input, shape index: {}]   ;;  %s5303_s7 = inlined_call_operand.vmem [shape: f32[288,136], index: 7, kind: input, shape index: {}]   ;;  %s5304_s8 = inlined_call_operand.vmem [shape: f32[1,136], index: 8, kind: input, shape index: {}]   ;;  %s5305_s9 = inlined_call_operand.vmem [shape: f32[136,128], index: 9, kind: input, shape index: {}]   ;;  %s5306_s10 = inlined_call_operand.vmem [shape: f32[1,128], index: 10, kind: input, shape index: {}]   ;;  %s5307_s11 = inlined_call_operand.vmem [shape: f32[256,128], index: 11, kind: output, shape index: {}]  }
   0x1 LB: > { %s2831_s18 = sadd.s32 4294967295, %s3556_s17   ;;  %p2835_p0 = scmp.ge.s32.totalorder %s3556_s17, 1  ;;  %s3556_s17 = sphi %s3620_s17, %s21_s17  }
   0x2   : > { %p338_p1 = scmp.lt.s32.totalorder %s3556_s17, 3 }
   0x4   : > { %p339_p2 = pnand %p2835_p0, %p338_p1 }
   0x5   : > { %v391_v0 = vld [vmem:[%s5297_s1 + $0x8] sm:$0xff] (!%p339_p2)  ;;  %v393_v1 = vld [vmem:[%s5297_s1 + $0x18] sm:$0xff] (!%p339_p2)  ;;  %v390_v2 = vld [vmem:[%s5297_s1] sm:$0xff] (!%p339_p2)  ;;  %s2836_s25 = sshll.u32 (!%p339_p2), %s2831_s18, 4  ;;  %v3558_v7 = vmov (!%p339_p2), 0.0   ;;  %v713_v13 = vlaneseq (!%p339_p2)  ;;  %vm932_vm1 = vcmask (!%p339_p2), 261120  }
   0x6   : > { %342 = sbr.rel (%p339_p2) target bundleno = 1315 (0x523), region = 64  ;;  %v3083_v3 = vpack.c.bf16 (!%p339_p2), %v393_v1, %v391_v0  ;;  %v392_v4 = vld [vmem:[%s5297_s1 + $0x10] sm:$0xff] (!%p339_p2)  ;;  %v395_v5 = vld [vmem:[%s5297_s1 + $0x28] sm:$0xff] (!%p339_p2)  ;;  %v397_v6 = vld [vmem:[%s5297_s1 + $0x38] sm:$0xff] (!%p339_p2)  ;;  %787 = vmatprep.mubr.f32.mxu0 (!%p339_p2), %v3558_v7  ;;  %p379_p3 = scmp.lt.s32.totalorder (!%p339_p2), %s2836_s25, 31  ;;  %vm1351_vm2 = vcmask (!%p339_p2), 523264  }
   0x7   : > { %v3085_v8 = vpack.c.bf16 (!%p339_p2), %v392_v4, %v390_v2  ;;  %v3087_v9 = vpack.c.bf16 (!%p339_p2), %v397_v6, %v395_v5  ;;  %v394_v10 = vld [vmem:[%s5297_s1 + $0x20] sm:$0xff] (!%p339_p2)  ;;  %v396_v11 = vld [vmem:[%s5297_s1 + $0x30] sm:$0xff] (!%p339_p2)  ;;  %v399_v12 = vld [vmem:[%s5297_s1 + $0x48] sm:$0xff] (!%p339_p2)  ;;  %v3662_v16 = vand.u32 (!%p339_p2), 127, %v713_v13  ;;  %vm2516_vm3 = vcmask (!%p339_p2), 64512  }
   0x8   : > { %3084 = vmatprep.subr.bf16.mxu0 (!%p339_p2), %v3083_v3  ;;  %v401_v14 = vld [vmem:[%s5297_s1 + $0x58] sm:$0xff] (!%p339_p2)  ;;  %v3089_v15 = vpack.c.bf16 (!%p339_p2), %v396_v11, %v394_v10  ;;  %v398_v18 = vld [vmem:[%s5297_s1 + $0x40] sm:$0xff] (!%p339_p2)  ;;  %v400_v19 = vld [vmem:[%s5297_s1 + $0x50] sm:$0xff] (!%p339_p2) }
   0x9   : > { %3086 = vmatpush1.bf16.msra.mxu0 (!%p339_p2), %v3085_v8  ;;  %v3091_v17 = vpack.c.bf16 (!%p339_p2), %v401_v14, %v399_v12  ;;  %v403_v20 = vld [vmem:[%s5297_s1 + $0x68] sm:$0xff] (!%p339_p2)  ;;  %v405_v21 = vld [vmem:[%s5297_s1 + $0x78] sm:$0xff] (!%p339_p2)  ;;  %v3093_v22 = vpack.c.bf16 (!%p339_p2), %v400_v19, %v398_v18  ;;  %vm2710_vm0 = vcmp.lt.s32.totalorder (!%p339_p2), %v3662_v16, 33  ;;  %v402_v24 = vld [vmem:[%s5297_s1 + $0x60] sm:$0xff] (!%p339_p2) }
   0xa   : > { %3088 = vmatprep.subr.bf16.mxu0 (!%p339_p2), %v3087_v9  ;;  %v3095_v23 = vpack.c.bf16 (!%p339_p2), %v405_v21, %v403_v20  ;;  %v404_v25 = vld [vmem:[%s5297_s1 + $0x70] sm:$0xff] (!%p339_p2)  ;;  %v407_v26 = vld [vmem:[%s5297_s1 + $0x88] sm:$0xff] (!%p339_p2)  ;;  %v409_v27 = vld [vmem:[%s5297_s1 + $0x98] sm:$0xff] (!%p339_p2) }
   0xb   : > { %v3097_v33 = vpack.c.bf16 (!%p339_p2), %v404_v25, %v402_v24  ;;  %v406_v34 = vld [vmem:[%s5297_s1 + $0x80] sm:$0xff] (!%p339_p2)  ;;  %v408_v35 = vld [vmem:[%s5297_s1 + $0x90] sm:$0xff] (!%p339_p2)  ;;  %v3099_v39 = vpack.c.bf16 (!%p339_p2), %v409_v27, %v407_v26  ;;  %v411_v40 = vld [vmem:[%s5297_s1 + $0xa8] sm:$0xff] (!%p339_p2) }
   0xc   : > { %v413_v41 = vld [vmem:[%s5297_s1 + $0xb8] sm:$0xff] (!%p339_p2)  ;;  %v3101_v50 = vpack.c.bf16 (!%p339_p2), %v408_v35, %v406_v34  ;;  %v410_v51 = vld [vmem:[%s5297_s1 + $0xa0] sm:$0xff] (!%p339_p2)  ;;  %v412_v52 = vld [vmem:[%s5297_s1 + $0xb0] sm:$0xff] (!%p339_p2) }
   0xd   : > { %s5309_s25 = smov (!%p379_p3, %s2836_s25), 31  ;;  %3090 = vmatpush1.bf16.msra.mxu0 %v3089_v15  ;;  %v3103_v54 = vpack.c.bf16 %v413_v41, %v411_v40  ;;  %v415_v59 = vld [vmem:[%s5297_s1 + $0xc8] sm:$0xff]  ;;  %v417_v60 = vld [vmem:[%s5297_s1 + $0xd8] sm:$0xff]  ;;  %v3105_v1 = vpack.c.bf16 %v412_v52, %v410_v51  ;;  %v414_v4 = vld [vmem:[%s5297_s1 + $0xc0] sm:$0xff] }
   0xe   : > { %s2837_s27 = sshll.u32 %s5309_s25, 3  ;;  %3092 = vmatprep.subr.bf16.mxu0 %v3091_v17  ;;  %v3107_v3 = vpack.c.bf16 %v417_v60, %v415_v59  ;;  %v416_v5 = vld [vmem:[%s5297_s1 + $0xd0] sm:$0xff]  ;;  %v424_v6 = vld [vmem:[%s5299_s3 + $0x8] sm:$0xff]  ;;  %v421_v9 = vld [vmem:[%s5297_s1 + $0xf8] sm:$0xff] }
   0xf   : > { %s3682_s15 = scalar_lea.vmem %s5296_s0, %s2837_s27  ;;  %v419_v8 = vld [vmem:[%s5297_s1 + $0xe8] sm:$0xff]  ;;  %v427_v10 = vld [vmem:[%s5299_s3 + $0x20] sm:$0xff]  ;;  %v426_v12 = vld [vmem:[%s5299_s3 + $0x18] sm:$0xff]  ;;  %v3109_v14 = vpack.c.bf16 %v416_v5, %v414_v4  ;;  %s5239_s18 = scalar_lea.vmem %s5307_s11, %s2837_s27 }
  0x10   : > { %v3698_v28 = vld [vmem:[%s3682_s15] sm:$0xff]  ;;  %v3706_v30 = vld [vmem:[%s3682_s15 + $0x8] sm:$0xff]  ;;  %v3709_v31 = vld [vmem:[%s3682_s15 + $0x10] sm:$0xff]  ;;  %v3115_v18 = vpack.c.bf16 %v427_v10, %v424_v6  ;;  %v3111_v21 = vpack.c.bf16 %v421_v9, %v419_v8 }
  0x11   : > { %v3703_v29 = vsel %vm2710_vm0, %v3698_v28, 0.0  ;;  %v3712_v32 = vld [vmem:[%s3682_s15 + $0x18] sm:$0xff]  ;;  %3094 = vmatpush1.bf16.msra.mxu0 %v3093_v22  ;;  %v3723_v36 = vsel %vm2710_vm0, %v3706_v30, 0.0  ;;  %v3728_v37 = vsel %vm2710_vm0, %v3709_v31, 0.0  ;;  %v3742_v42 = vld [vmem:[%s3682_s15 + $0x20] sm:$0xff]  ;;  %v3750_v44 = vld [vmem:[%s3682_s15 + $0x28] sm:$0xff] }
  0x12   : > { %v3733_v38 = vsel %vm2710_vm0, %v3712_v32, 0.0  ;;  %3096 = vmatprep.subr.bf16.mxu0 %v3095_v23  ;;  %v3747_v43 = vsel %vm2710_vm0, %v3742_v42, 0.0  ;;  %v3753_v45 = vld [vmem:[%s3682_s15 + $0x30] sm:$0xff]  ;;  %v3756_v46 = vld [vmem:[%s3682_s15 + $0x38] sm:$0xff]  ;;  %v3761_v47 = vsel %vm2710_vm0, %v3750_v44, 0.0  ;;  %v3780_v53 = vld [vmem:[%s3682_s15 + $0x40] sm:$0xff]  ;;  %3116 = vmatprep.subr.bf16.mxu1 %v3115_v18 }
  0x13   : > { %v3766_v48 = vsel %vm2710_vm0, %v3753_v45, 0.0  ;;  %v3771_v49 = vsel %vm2710_vm0, %v3756_v46, 0.0  ;;  %v3785_v55 = vsel %vm2710_vm0, %v3780_v53, 0.0  ;;  %v3788_v56 = vld [vmem:[%s3682_s15 + $0x48] sm:$0xff]  ;;  %v3791_v57 = vld [vmem:[%s3682_s15 + $0x50] sm:$0xff]  ;;  %v3794_v58 = vld [vmem:[%s3682_s15 + $0x58] sm:$0xff] }
  0x14   : > { %v3805_v61 = vsel %vm2710_vm0, %v3788_v56, 0.0  ;;  %v3810_v62 = vsel %vm2710_vm0, %v3791_v57, 0.0  ;;  %v3815_v63 = vsel %vm2710_vm0, %v3794_v58, 0.0  ;;  %v3818_v0 = vld [vmem:[%s3682_s15 + $0x60] sm:$0xff]  ;;  %v420_v17 = vld [vmem:[%s5297_s1 + $0xf0] sm:$0xff]  ;;  %v430_v20 = vld [vmem:[%s5299_s3 + $0x38] sm:$0xff] }
  0x15   : > { %3098 = vmatpush1.bf16.msra.mxu0 %v3097_v33  ;;  %v3823_v2 = vsel %vm2710_vm0, %v3818_v0, 0.0  ;;  %v423_v11 = vld [vmem:[%s5299_s3] sm:$0xff]  ;;  %v433_v22 = vld [vmem:[%s5299_s3 + $0x50] sm:$0xff]  ;;  %v432_v24 = vld [vmem:[%s5299_s3 + $0x48] sm:$0xff] }
  0x16   : > { %3100 = vmatprep.subr.bf16.mxu0 %v3099_v39  ;;  %v418_v15 = vld [vmem:[%s5297_s1 + $0xe0] sm:$0xff]  ;;  %v3117_v19 = vpack.c.bf16 %v426_v12, %v423_v11  ;;  %v429_v23 = vld [vmem:[%s5299_s3 + $0x30] sm:$0xff]  ;;  %v3119_v25 = vpack.c.bf16 %v433_v22, %v430_v20  ;;  %v436_v26 = vld [vmem:[%s5299_s3 + $0x68] sm:$0xff] }
  0x17   : > { %v3121_v27 = vpack.c.bf16 %v432_v24, %v429_v23  ;;  %v439_v33 = vld [vmem:[%s5299_s3 + $0x80] sm:$0xff]  ;;  %v3113_v34 = vpack.c.bf16 %v420_v17, %v418_v15  ;;  %v438_v40 = vld [vmem:[%s5299_s3 + $0x78] sm:$0xff]  ;;  %v425_v41 = vld [vmem:[%s5299_s3 + $0x10] sm:$0xff] }
  0x18   : > { %3118 = vmatpush1.bf16.msra.mxu1 %v3117_v19  ;;  %v3123_v35 = vpack.c.bf16 %v439_v33, %v436_v26  ;;  %v435_v39 = vld [vmem:[%s5299_s3 + $0x60] sm:$0xff]  ;;  %v442_v51 = vld [vmem:[%s5299_s3 + $0x98] sm:$0xff]  ;;  %v445_v52 = vld [vmem:[%s5299_s3 + $0xb0] sm:$0xff] }
  0x19   : > { %3102 = vmatpush1.bf16.msra.mxu0 %v3101_v50  ;;  %3120 = vmatprep.subr.bf16.mxu1 %v3119_v25  ;;  %v428_v50 = vld [vmem:[%s5299_s3 + $0x28] sm:$0xff]  ;;  %v441_v60 = vld [vmem:[%s5299_s3 + $0x90] sm:$0xff]  ;;  %v431_v4 = vld [vmem:[%s5299_s3 + $0x40] sm:$0xff]  ;;  %v3127_v6 = vpack.c.bf16 %v445_v52, %v442_v51 }
  0x1a   : > { %3104 = vmatprep.subr.bf16.mxu0 %v3103_v54  ;;  %v3125_v54 = vpack.c.bf16 %v438_v40, %v435_v39  ;;  %v3156_v59 = vpack.c.bf16 %v428_v50, %v425_v41  ;;  %v434_v5 = vld [vmem:[%s5299_s3 + $0x58] sm:$0xff]  ;;  %v448_v8 = vld [vmem:[%s5299_s3 + $0xc8] sm:$0xff]  ;;  %v451_v9 = vld [vmem:[%s5299_s3 + $0xe0] sm:$0xff] }
  0x1b   : > { %v3159_v11 = vpack.c.bf16 %v434_v5, %v431_v4  ;;  %v447_v12 = vld [vmem:[%s5299_s3 + $0xc0] sm:$0xff]  ;;  %v440_v15 = vld [vmem:[%s5299_s3 + $0x88] sm:$0xff]  ;;  %v3131_v17 = vpack.c.bf16 %v451_v9, %v448_v8  ;;  %v454_v18 = vld [vmem:[%s5299_s3 + $0xf8] sm:$0xff] }
  0x1c   : > { %3122 = vmatpush1.bf16.msra.mxu1 %v3121_v27  ;;  %v457_v19 = vld [vmem:[%s5299_s3 + $0x110] sm:$0xff]  ;;  %v456_v23 = vld [vmem:[%s5299_s3 + $0x108] sm:$0xff]  ;;  %v446_v24 = vld [vmem:[%s5299_s3 + $0xb8] sm:$0xff] }
  0x1d   : > { %3106 = vmatpush1.bf16.msra.mxu0 %v3105_v1  ;;  %3124 = vmatprep.subr.bf16.mxu1 %v3123_v35  ;;  %v444_v1 = vld [vmem:[%s5299_s3 + $0xa8] sm:$0xff]  ;;  %v453_v22 = vld [vmem:[%s5299_s3 + $0xf0] sm:$0xff]  ;;  %v3135_v25 = vpack.c.bf16 %v457_v19, %v454_v18  ;;  %v463_v27 = vld [vmem:[%s5299_s3 + $0x140] sm:$0xff] }
  0x1e   : > { %3108 = vmatprep.subr.bf16.mxu0 %v3107_v3  ;;  %v3559_v3 = vmov 0.0|0.0   ;;  %v3129_v10 = vpack.c.bf16 %v444_v1, %v441_v60  ;;  %v460_v26 = vld [vmem:[%s5299_s3 + $0x128] sm:$0xff]  ;;  %v3137_v33 = vpack.c.bf16 %v456_v23, %v453_v22  ;;  %v459_v35 = vld [vmem:[%s5299_s3 + $0x120] sm:$0xff]  ;;  %v462_v39 = vld [vmem:[%s5299_s3 + $0x138] sm:$0xff] }
  0x1f   : > { %v452_v40 = vld [vmem:[%s5299_s3 + $0xe8] sm:$0xff]  ;;  %v3139_v41 = vpack.c.bf16 %v463_v27, %v460_v26  ;;  %v466_v50 = vld [vmem:[%s5299_s3 + $0x158] sm:$0xff]  ;;  %v469_v51 = vld [vmem:[%s5299_s3 + $0x170] sm:$0xff]  ;;  %v3141_v52 = vpack.c.bf16 %v462_v39, %v459_v35 }
  0x20   : > { %3126 = vmatpush1.bf16.msra.mxu1 %v3125_v54  ;;  %v468_v60 = vld [vmem:[%s5299_s3 + $0x168] sm:$0xff]  ;;  %v458_v1 = vld [vmem:[%s5299_s3 + $0x118] sm:$0xff]  ;;  %v3143_v4 = vpack.c.bf16 %v469_v51, %v466_v50  ;;  %v481_v19 = vld [vmem:[%s5299_s3 + $0x1d0] sm:$0xff] }
  0x21   : > { %3110 = vmatpush1.bf16.msra.mxu0 %v3109_v14  ;;  %v450_v14 = vld [vmem:[%s5299_s3 + $0xd8] sm:$0xff]  ;;  %3128 = vmatprep.subr.bf16.mxu1 %v3127_v6  ;;  %v472_v5 = vld [vmem:[%s5299_s3 + $0x188] sm:$0xff]  ;;  %v475_v6 = vld [vmem:[%s5299_s3 + $0x1a0] sm:$0xff] }
  0x22   : > { %3112 = vmatprep.subr.bf16.mxu0 %v3111_v21  ;;  %v3133_v20 = vpack.c.bf16 %v450_v14, %v447_v12  ;;  %v3147_v12 = vpack.c.bf16 %v475_v6, %v472_v5  ;;  %v467_v14 = vld [vmem:[%s5299_s3 + $0x160] sm:$0xff]  ;;  %v478_v18 = vld [vmem:[%s5299_s3 + $0x1b8] sm:$0xff]  ;;  %v480_v22 = vld [vmem:[%s5299_s3 + $0x1c8] sm:$0xff] }
  0x23   : > { %v479_v23 = vld [vmem:[%s5299_s3 + $0x1c0] sm:$0xff]  ;;  %v485_v26 = vld [vmem:[%s5301_s5 + $0x8] sm:$0xff] }
  0x24   : > { %3130 = vmatpush1.bf16.msra.mxu1 %v3129_v10  ;;  %v461_v10 = vld [vmem:[%s5299_s3 + $0x130] sm:$0xff]  ;;  %v488_v27 = vld [vmem:[%s5301_s5 + $0x20] sm:$0xff]  ;;  %v537_v35 = vld [vmem:[%s5301_s5 + $0x1a8] sm:$0xff] }
  0x25   : > { %3114 = vmatpush1.bf16.msra.mxu0 %v3113_v34  ;;  %3132 = vmatprep.subr.bf16.mxu1 %v3131_v17  ;;  %v489_v5 = vld [vmem:[%s5301_s5 + $0x28] sm:$0xff] }
  0x26   : > { %3155 = vmatprep.subr.bf16.mxu0 %v3559_v3 }
  0x28   : > { %788 = vmatmul.mubr.f32.vlgmr.msra.gmra.mrb[0].mxu0 %v3698_v28  ;;  %v437_v28 = vld [vmem:[%s5299_s3 + $0x70] sm:$0xff]  ;;  %3134 = vmatpush1.bf16.msra.mxu1 %v3133_v20  ;;  %v3151_v20 = vpack.c.bf16 %v481_v19, %v478_v18  ;;  %v500_v18 = vld [vmem:[%s5301_s5 + $0x80] sm:$0xff] }
  0x29   : > { %793 = vmatprep.mubr.f32.mxu0 %v3558_v7  ;;  %3157 = vmatpush1.bf16.msra.mxu0 %v3156_v59  ;;  %v3162_v21 = vpack.c.bf16 %v440_v15, %v437_v28  ;;  %v465_v59 = vld [vmem:[%s5299_s3 + $0x150] sm:$0xff]  ;;  %v470_v28 = vld [vmem:[%s5299_s3 + $0x178] sm:$0xff]  ;;  %v476_v15 = vld [vmem:[%s5299_s3 + $0x1a8] sm:$0xff] }
  0x2a   : > { %3158 = vmatprep.subr.bf16.mxu0 %v3559_v3  ;;  %3136 = vmatprep.subr.bf16.mxu1 %v3135_v25  ;;  %v3145_v8 = vpack.c.bf16 %v468_v60, %v465_v59  ;;  %v487_v59 = vld [vmem:[%s5301_s5 + $0x18] sm:$0xff]  ;;  %v546_v19 = vld [vmem:[%s5301_s5 + $0x1f0] sm:$0xff] }
  0x2c   : > { %794 = vmatmul.mubr.f32.gmra.mrb[2].mxu0 %v3706_v30  ;;  %v443_v30 = vld [vmem:[%s5299_s3 + $0xa0] sm:$0xff]  ;;  %3138 = vmatpush1.bf16.msra.mxu1 %v3137_v33  ;;  %v3185_v33 = vpack.c.bf16 %v488_v27, %v485_v26 }
  0x2d   : > { %799 = vmatprep.mubr.f32.mxu0 %v3558_v7  ;;  %3160 = vmatpush1.bf16.msra.mxu0 %v3159_v11  ;;  %v3165_v34 = vpack.c.bf16 %v446_v24, %v443_v30  ;;  %v464_v11 = vld [vmem:[%s5299_s3 + $0x148] sm:$0xff]  ;;  %v482_v24 = vld [vmem:[%s5299_s3 + $0x1d8] sm:$0xff] }
  0x2e   : > { %3161 = vmatprep.subr.bf16.mxu0 %v3559_v3  ;;  %3140 = vmatprep.subr.bf16.mxu1 %v3139_v41  ;;  %v3183_v25 = vpack.c.bf16 %v482_v24, %v479_v23  ;;  %v422_v41 = vld [vmem:[%s5298_s2] sm:$0x3]  ;;  %v499_v24 = vld [vmem:[%s5301_s5 + $0x78] sm:$0xff] }
  0x30   : > { %800 = vmatmul.mubr.f32.gmra.mrb[4].mxu0 %v3709_v31  ;;  %v449_v31 = vld [vmem:[%s5299_s3 + $0xd0] sm:$0xff]  ;;  %3142 = vmatpush1.bf16.msra.mxu1 %v3141_v52 }
  0x31   : > { %805 = vmatprep.mubr.f32.mxu0 %v3558_v7  ;;  %3163 = vmatpush1.bf16.msra.mxu0 %v3162_v21  ;;  %v3168_v54 = vpack.c.bf16 %v452_v40, %v449_v31  ;;  %v477_v21 = vld [vmem:[%s5299_s3 + $0x1b0] sm:$0xff]  ;;  %v4077_v31 = vshrl.u32 %v713_v13, 7  ;;  %v484_v13 = vld [vmem:[%s5301_s5] sm:$0xff] }
  0x32   : > { %3164 = vmatprep.subr.bf16.mxu0 %v3559_v3  ;;  %3144 = vmatprep.subr.bf16.mxu1 %v3143_v4  ;;  %v3153_v30 = vpack.c.bf16 %v480_v22, %v477_v21  ;;  %v486_v4 = vld [vmem:[%s5301_s5 + $0x10] sm:$0xff] }
  0x33   : > { %v4080_v40 = vsub.s32 0, %v4077_v31  ;;  %v4086_v50 = vsub.s32 1, %v4077_v31 }
  0x34   : > { %806 = vmatmul.mubr.f32.gmra.mrb[6].mxu0 %v3712_v32  ;;  %v455_v32 = vld [vmem:[%s5299_s3 + $0x100] sm:$0xff]  ;;  %3146 = vmatpush1.bf16.msra.mxu1 %v3145_v8  ;;  %v494_v8 = vld [vmem:[%s5301_s5 + $0x50] sm:$0xff] }
  0x35   : > { %811 = vmatprep.mubr.f32.mxu0 %v3558_v7  ;;  %3166 = vmatpush1.bf16.msra.mxu0 %v3165_v34  ;;  %v3171_v9 = vpack.c.bf16 %v458_v1, %v455_v32  ;;  %v534_v34 = vld [vmem:[%s5301_s5 + $0x190] sm:$0xff]  ;;  %v4089_v51 = vrot.slane %v422_v41, %v4080_v40  ;;  %v4092_v52 = vrot.slane %v422_v41, %v4086_v50  ;;  %v491_v1 = vld [vmem:[%s5301_s5 + $0x38] sm:$0xff] }
  0x36   : > { %3167 = vmatprep.subr.bf16.mxu0 %v3559_v3  ;;  %3148 = vmatprep.subr.bf16.mxu1 %v3147_v12  ;;  %v3265_v39 = vpack.c.bf16 %v537_v35, %v534_v34  ;;  %v503_v35 = vld [vmem:[%s5301_s5 + $0x98] sm:$0xff]  ;;  %v498_v41 = vld [vmem:[%s5301_s5 + $0x70] sm:$0xff] }
  0x38   : > { %812 = vmatmul.mubr.f32.gmra.mrb[8].mxu0 %v3742_v42  ;;  %v3174_v42 = vpack.c.bf16 %v464_v11, %v461_v10  ;;  %v543_v10 = vld [vmem:[%s5301_s5 + $0x1d8] sm:$0xff] }
  0x39   : > { %817 = vmatprep.mubr.f32.mxu0 %v3558_v7  ;;  %3169 = vmatpush1.bf16.msra.mxu0 %v3168_v54 }
  0x3a   : > { %3170 = vmatprep.subr.bf16.mxu0 %v3559_v3 }
  0x3c   : > { %818 = vmatmul.mubr.f32.gmra.mrb[10].mxu0 %v3750_v44  ;;  %v3177_v44 = vpack.c.bf16 %v470_v28, %v467_v14  ;;  %v490_v14 = vld [vmem:[%s5301_s5 + $0x30] sm:$0xff]  ;;  %v493_v28 = vld [vmem:[%s5301_s5 + $0x48] sm:$0xff] }
  0x3d   : > { %823 = vmatprep.mubr.f32.mxu0 %v3558_v7  ;;  %3172 = vmatpush1.bf16.msra.mxu0 %v3171_v9  ;;  %v540_v9 = vld [vmem:[%s5301_s5 + $0x1c0] sm:$0xff]  ;;  %v3191_v23 = vpack.c.bf16 %v493_v28, %v490_v14  ;;  %v509_v14 = vld [vmem:[%s5301_s5 + $0xc8] sm:$0xff] }
  0x3e   : > { %3173 = vmatprep.subr.bf16.mxu0 %v3559_v3 }
  0x40   : > { %824 = vmatmul.mubr.f32.gmra.mrb[12].mxu0 %v3753_v45  ;;  %v709_v45 = vld [vmem:[%s3682_s15 + $0x68] sm:$0xff] }
  0x41   : > { %829 = vmatprep.mubr.f32.mxu0 %v3558_v7  ;;  %3175 = vmatpush1.bf16.msra.mxu0 %v3174_v42  ;;  %v3187_v42 = vpack.c.bf16 %v487_v59, %v484_v13  ;;  %v506_v59 = vld [vmem:[%s5301_s5 + $0xb0] sm:$0xff] }
  0x42   : > { %3176 = vmatprep.subr.bf16.mxu0 %v3559_v3 }
  0x44   : > { %830 = vmatmul.mubr.f32.gmra.mrb[14].mxu0 %v3756_v46  ;;  %v710_v46 = vld [vmem:[%s3682_s15 + $0x70] sm:$0xff] }
  0x45   : > { %835 = vmatprep.mubr.f32.mxu0 %v3558_v7  ;;  %3178 = vmatpush1.bf16.msra.mxu0 %v3177_v44  ;;  %v3267_v44 = vpack.c.bf16 %v489_v5, %v486_v4 }
  0x46   : > { %3179 = vmatprep.subr.bf16.mxu0 %v3559_v3 }
  0x48   : > { %836 = vmatmul.mubr.f32.gmra.mrb[16].mxu0 %v3780_v53  ;;  %v711_v53 = vld [vmem:[%s3682_s15 + $0x78] sm:$0xff] }
  0x49   : > { %841 = vmatprep.mubr.f32.mxu0 %v3558_v7 }
  0x4c   : > { %842 = vmatmul.mubr.f32.gmra.mrb[18].mxu0 %v3788_v56  ;;  %v471_v56 = vld [vmem:[%s5299_s3 + $0x180] sm:$0xff] }
  0x4d   : > { %847 = vmatprep.mubr.f32.mxu0 %v3558_v7 }
  0x50   : > { %848 = vmatmul.mubr.f32.gmra.mrb[20].mxu0 %v3791_v57  ;;  %v474_v57 = vld [vmem:[%s5299_s3 + $0x198] sm:$0xff] }
  0x51   : > { %853 = vmatprep.mubr.f32.mxu0 %v3558_v7 }
  0x54   : > { %854 = vmatmul.mubr.f32.gmra.mrb[22].mxu0 %v3794_v58  ;;  %v473_v58 = vld [vmem:[%s5299_s3 + $0x190] sm:$0xff] }
  0x55   : > { %859 = vmatprep.mubr.f32.mxu0 %v3558_v7  ;;  %v3180_v17 = vpack.c.bf16 %v476_v15, %v473_v58  ;;  %v3269_v58 = vpack.c.bf16 %v543_v10, %v540_v9  ;;  %v495_v15 = vld [vmem:[%s5301_s5 + $0x58] sm:$0xff] }
  0x57   : > { %3181 = vmatpush1.bf16.msra.mxu0 %v3180_v17 }
  0x58   : > { %860 = vmatmul.mubr.f32.gmra.mrb[24].mxu0 %v3818_v0  ;;  %v3149_v0 = vpack.c.bf16 %v474_v57, %v471_v56  ;;  %3182 = vmatprep.subr.bf16.mxu0 %v3559_v3  ;;  %v3189_v56 = vpack.c.bf16 %v494_v8, %v491_v1  ;;  %v497_v57 = vld [vmem:[%s5301_s5 + $0x68] sm:$0xff] }
  0x59   : > { %865 = vmatprep.mubr.f32.mxu0 %v3558_v7  ;;  %v3193_v34 = vpack.c.bf16 %v500_v18, %v497_v57  ;;  %v505_v8 = vld [vmem:[%s5301_s5 + $0xa8] sm:$0xff]  ;;  %v511_v18 = vld [vmem:[%s5301_s5 + $0xd8] sm:$0xff] }
  0x5a   : > { %3150 = vmatpush1.bf16.msra.mxu1 %v3149_v0  ;;  %v492_v0 = vld [vmem:[%s5301_s5 + $0x40] sm:$0xff]  ;;  %v561_v57 = vld [vmem:[%s5301_s5 + $0x268] sm:$0xff] }
  0x5b   : > { %3152 = vmatprep.subr.bf16.mxu1 %v3151_v20  ;;  %3184 = vmatpush1.bf16.msra.mxu0 %v3183_v25  ;;  %v549_v20 = vld [vmem:[%s5301_s5 + $0x208] sm:$0xff]  ;;  %v3271_v25 = vpack.c.bf16 %v495_v15, %v492_v0 }
  0x5c   : > { %866 = vmatmul.mubr.f32.gmra.mrb[26].mxu0 %v709_v45  ;;  %3266 = vmatprep.subr.bf16.mxu0 %v3265_v39  ;;  %v3273_v39 = vpack.c.bf16 %v549_v20, %v546_v19 }
  0x5d   : > { %871 = vmatprep.mubr.f32.mxu0 %v3558_v7 }
  0x5e   : > { %3154 = vmatpush1.bf16.msra.mxu1 %v3153_v30  ;;  %v496_v30 = vld [vmem:[%s5301_s5 + $0x60] sm:$0xff] }
  0x5f   : > { %3186 = vmatprep.subr.bf16.mxu1 %v3185_v33  ;;  %v3195_v5 = vpack.c.bf16 %v499_v24, %v496_v30  ;;  %v515_v30 = vld [vmem:[%s5301_s5 + $0xf8] sm:$0xff] }
  0x60   : > { %872 = vmatmul.mubr.f32.gmra.mrb[28].mxu0 %v710_v46 }
  0x61   : > { %877 = vmatprep.mubr.f32.mxu0 %v3558_v7 }
  0x64   : > { %878 = vmatmul.mubr.f32.gmra.mrb[30].mxu0 %v711_v53 }
  0xfb   : > { %v789_v54 = vpop.f32.mrb[0].mxu0 }
  0xfc   : > { %v790_v60 = vadd.f32 %v789_v54, %v4089_v51  ;;  %v791_v32 = vpop.f32.mrb[1].mxu0  ;;  %v501_v54 = vld [vmem:[%s5301_s5 + $0x88] sm:$0xff] }
  0xfd   : > { %v792_v6 = vadd.f32 %v791_v32, %v4092_v52  ;;  %v555_v32 = vld [vmem:[%s5301_s5 + $0x238] sm:$0xff]  ;;  %v3275_v9 = vpack.c.bf16 %v501_v54, %v498_v41 }
  0xfe   : > { %v884_v45 = vmax.f32 %v790_v60, 0.0  ;;  %v552_v60 = vld [vmem:[%s5301_s5 + $0x220] sm:$0xff] }
  0xff   : > { %v885_v11 = vmax.f32 %v792_v6, 0.0  ;;  %v795_v12 = vpop.f32.mrb[2].mxu0  ;;  %v502_v6 = vld [vmem:[%s5301_s5 + $0x90] sm:$0xff]  ;;  %v3277_v28 = vpack.c.bf16 %v555_v32, %v552_v60 }
 0x100   : > { %v796_v46 = vadd.f32 %v795_v12, %v4089_v51  ;;  %v797_v53 = vpop.f32.mrb[3].mxu0  ;;  %v3199_v15 = vpack.c.bf16 %v505_v8, %v502_v6  ;;  %v521_v6 = vld [vmem:[%s5301_s5 + $0x128] sm:$0xff] }
 0x101   : > { %v798_v17 = vadd.f32 %v797_v53, %v4092_v52  ;;  %2840 = vmatprep.mubr.msk.f32.mxu1 %vm932_vm1, %v885_v11  ;;  %2856 = vmatprep.mubr.msk.f32.mxu0 %vm932_vm1, %v885_v11  ;;  %v512_v53 = vld [vmem:[%s5301_s5 + $0xe0] sm:$0xff] }
 0x102   : > { %1046 = vmatmul.mubr.f32.vlgmr.msra.gmra.mrb[0].mxu1 %v884_v45  ;;  %1207 = vmatmul.mubr.f32.vlgmr.msra.gmra.mrb[32].mxu0 %v884_v45  ;;  %v886_v26 = vmax.f32 %v796_v46, 0.0  ;;  %v507_v45 = vld [vmem:[%s5301_s5 + $0xb8] sm:$0xff] }
 0x103   : > { %v887_v21 = vmax.f32 %v798_v17, 0.0  ;;  %v801_v22 = vpop.f32.mrb[4].mxu0  ;;  %3188 = vmatpush1.bf16.msra.mxu1 %v3187_v42  ;;  %3268 = vmatpush3.bf16.msra.mxu0 %v3267_v44  ;;  %v3197_v42 = vpack.c.bf16 %v506_v59, %v503_v35  ;;  %v504_v44 = vld [vmem:[%s5301_s5 + $0xa0] sm:$0xff]  ;;  %v567_v35 = vld [vmem:[%s5301_s5 + $0x298] sm:$0xff]  ;;  %v517_v59 = vld [vmem:[%s5301_s5 + $0x108] sm:$0xff] }
 0x104   : > { %v802_v27 = vadd.f32 %v801_v22, %v4089_v51  ;;  %v803_v33 = vpop.f32.mrb[5].mxu0  ;;  %3190 = vmatprep.subr.bf16.mxu1 %v3189_v56  ;;  %3270 = vmatprep.subr.bf16.mxu0 %v3269_v58  ;;  %v558_v56 = vld [vmem:[%s5301_s5 + $0x250] sm:$0xff]  ;;  %v508_v17 = vld [vmem:[%s5301_s5 + $0xc0] sm:$0xff]  ;;  %v3279_v19 = vpack.c.bf16 %v507_v45, %v504_v44 }
 0x105   : > { %v804_v13 = vadd.f32 %v803_v33, %v4092_v52  ;;  %2841 = vmatprep.mubr.msk.f32.mxu1 %vm932_vm1, %v887_v21  ;;  %2857 = vmatprep.mubr.msk.f32.mxu0 %vm932_vm1, %v887_v21  ;;  %v3281_v24 = vpack.c.bf16 %v561_v57, %v558_v56  ;;  %v518_v33 = vld [vmem:[%s5301_s5 + $0x110] sm:$0xff]  ;;  %v3203_v54 = vpack.c.bf16 %v511_v18, %v508_v17 }
 0x106   : > { %1052 = vmatmul.mubr.f32.gmra.mrb[2].mxu1 %v886_v26  ;;  %1212 = vmatmul.mubr.f32.gmra.mrb[34].mxu0 %v886_v26  ;;  %v888_v10 = vmax.f32 %v802_v27, 0.0  ;;  %v513_v26 = vld [vmem:[%s5301_s5 + $0xe8] sm:$0xff] }
 0x107   : > { %v889_v1 = vmax.f32 %v804_v13, 0.0  ;;  %v807_v4 = vpop.f32.mrb[6].mxu0  ;;  %3192 = vmatpush1.bf16.msra.mxu1 %v3191_v23  ;;  %3272 = vmatpush3.bf16.msra.mxu0 %v3271_v25  ;;  %v3201_v23 = vpack.c.bf16 %v512_v53, %v509_v14  ;;  %v510_v25 = vld [vmem:[%s5301_s5 + $0xd0] sm:$0xff]  ;;  %v573_v14 = vld [vmem:[%s5301_s5 + $0x2c8] sm:$0xff] }
 0x108   : > { %v808_v11 = vadd.f32 %v807_v4, %v4089_v51  ;;  %v809_v12 = vpop.f32.mrb[7].mxu0  ;;  %3194 = vmatprep.subr.bf16.mxu1 %v3193_v34  ;;  %3274 = vmatprep.subr.bf16.mxu0 %v3273_v39  ;;  %v564_v34 = vld [vmem:[%s5301_s5 + $0x280] sm:$0xff]  ;;  %v514_v13 = vld [vmem:[%s5301_s5 + $0xf0] sm:$0xff]  ;;  %v3283_v60 = vpack.c.bf16 %v513_v26, %v510_v25 }
 0x109   : > { %v810_v46 = vadd.f32 %v809_v12, %v4092_v52  ;;  %2842 = vmatprep.mubr.msk.f32.mxu1 %vm932_vm1, %v889_v1  ;;  %2858 = vmatprep.mubr.msk.f32.mxu0 %vm932_vm1, %v889_v1  ;;  %v3285_v8 = vpack.c.bf16 %v567_v35, %v564_v34  ;;  %v524_v12 = vld [vmem:[%s5301_s5 + $0x140] sm:$0xff]  ;;  %v3207_v45 = vpack.c.bf16 %v517_v59, %v514_v13  ;;  %v533_v35 = vld [vmem:[%s5301_s5 + $0x188] sm:$0xff] }
 0x10a   : > { %1058 = vmatmul.mubr.f32.gmra.mrb[4].mxu1 %v888_v10  ;;  %1217 = vmatmul.mubr.f32.gmra.mrb[36].mxu0 %v888_v10  ;;  %v890_v20 = vmax.f32 %v808_v11, 0.0  ;;  %v519_v10 = vld [vmem:[%s5301_s5 + $0x118] sm:$0xff] }
 0x10b   : > { %v891_v58 = vmax.f32 %v810_v46, 0.0  ;;  %v813_v0 = vpop.f32.mrb[8].mxu0  ;;  %3196 = vmatpush1.bf16.msra.mxu1 %v3195_v5  ;;  %3276 = vmatpush3.bf16.msra.mxu0 %v3275_v9  ;;  %v3205_v5 = vpack.c.bf16 %v518_v33, %v515_v30  ;;  %v516_v9 = vld [vmem:[%s5301_s5 + $0x100] sm:$0xff]  ;;  %v529_v33 = vld [vmem:[%s5301_s5 + $0x168] sm:$0xff] }
 0x10c   : > { %v814_v21 = vadd.f32 %v813_v0, %v4089_v51  ;;  %v815_v22 = vpop.f32.mrb[9].mxu0  ;;  %3198 = vmatprep.subr.bf16.mxu1 %v3197_v42  ;;  %3278 = vmatprep.subr.bf16.mxu0 %v3277_v28  ;;  %v570_v42 = vld [vmem:[%s5301_s5 + $0x2b0] sm:$0xff]  ;;  %v3287_v46 = vpack.c.bf16 %v519_v10, %v516_v9  ;;  %v520_v0 = vld [vmem:[%s5301_s5 + $0x120] sm:$0xff] }
 0x10d   : > { %v816_v27 = vadd.f32 %v815_v22, %v4092_v52  ;;  %2843 = vmatprep.mubr.msk.f32.mxu1 %vm932_vm1, %v891_v58  ;;  %2859 = vmatprep.mubr.msk.f32.mxu0 %vm932_vm1, %v891_v58  ;;  %v3209_v58 = vpack.c.bf16 %v524_v12, %v521_v6  ;;  %v3289_v17 = vpack.c.bf16 %v573_v14, %v570_v42  ;;  %v542_v9 = vld [vmem:[%s5301_s5 + $0x1d0] sm:$0xff] }
 0x10e   : > { %1064 = vmatmul.mubr.f32.gmra.mrb[6].mxu1 %v890_v20  ;;  %1222 = vmatmul.mubr.f32.gmra.mrb[38].mxu0 %v890_v20  ;;  %v892_v32 = vmax.f32 %v814_v21, 0.0  ;;  %v530_v20 = vld [vmem:[%s5301_s5 + $0x170] sm:$0xff] }
 0x10f   : > { %v893_v39 = vmax.f32 %v816_v27, 0.0  ;;  %v819_v41 = vpop.f32.mrb[10].mxu0  ;;  %3200 = vmatpush1.bf16.msra.mxu1 %v3199_v15  ;;  %3280 = vmatpush3.bf16.msra.mxu0 %v3279_v19  ;;  %v523_v15 = vld [vmem:[%s5301_s5 + $0x138] sm:$0xff]  ;;  %v526_v27 = vld [vmem:[%s5301_s5 + $0x150] sm:$0xff] }
 0x110   : > { %v820_v1 = vadd.f32 %v819_v41, %v4089_v51  ;;  %v821_v4 = vpop.f32.mrb[11].mxu0  ;;  %3202 = vmatprep.subr.bf16.mxu1 %v3201_v23  ;;  %3282 = vmatprep.subr.bf16.mxu0 %v3281_v24  ;;  %v527_v19 = vld [vmem:[%s5301_s5 + $0x158] sm:$0xff]  ;;  %v3211_v23 = vpack.c.bf16 %v523_v15, %v520_v0  ;;  %v3215_v13 = vpack.c.bf16 %v529_v33, %v526_v27 }
 0x111   : > { %v822_v11 = vadd.f32 %v821_v4, %v4092_v52  ;;  %2844 = vmatprep.mubr.msk.f32.mxu1 %vm932_vm1, %v893_v39  ;;  %2860 = vmatprep.mubr.msk.f32.mxu0 %vm932_vm1, %v893_v39  ;;  %v3213_v26 = vpack.c.bf16 %v530_v20, %v527_v19  ;;  %v536_v39 = vld [vmem:[%s5301_s5 + $0x1a0] sm:$0xff] }
 0x112   : > { %1070 = vmatmul.mubr.f32.gmra.mrb[8].mxu1 %v892_v32  ;;  %1227 = vmatmul.mubr.f32.gmra.mrb[40].mxu0 %v892_v32  ;;  %v894_v53 = vmax.f32 %v820_v1, 0.0  ;;  %v3217_v1 = vpack.c.bf16 %v536_v39, %v533_v35  ;;  %v532_v4 = vld [vmem:[%s5301_s5 + $0x180] sm:$0xff] }
 0x113   : > { %v895_v28 = vmax.f32 %v822_v11, 0.0  ;;  %v825_v44 = vpop.f32.mrb[12].mxu0  ;;  %3204 = vmatpush1.bf16.msra.mxu1 %v3203_v54  ;;  %3284 = vmatpush3.bf16.msra.mxu0 %v3283_v60 }
 0x114   : > { %v826_v56 = vadd.f32 %v825_v44, %v4089_v51  ;;  %v827_v57 = vpop.f32.mrb[13].mxu0  ;;  %3206 = vmatprep.subr.bf16.mxu1 %v3205_v5  ;;  %3286 = vmatprep.subr.bf16.mxu0 %v3285_v8  ;;  %v535_v5 = vld [vmem:[%s5301_s5 + $0x198] sm:$0xff] }
 0x115   : > { %v828_v18 = vadd.f32 %v827_v57, %v4092_v52  ;;  %2845 = vmatprep.mubr.msk.f32.mxu1 %vm932_vm1, %v895_v28  ;;  %2861 = vmatprep.mubr.msk.f32.mxu0 %vm932_vm1, %v895_v28  ;;  %v539_v8 = vld [vmem:[%s5301_s5 + $0x1b8] sm:$0xff]  ;;  %v3219_v12 = vpack.c.bf16 %v535_v5, %v532_v4  ;;  %v548_v57 = vld [vmem:[%s5301_s5 + $0x200] sm:$0xff] }
 0x116   : > { %1076 = vmatmul.mubr.f32.gmra.mrb[10].mxu1 %v894_v53  ;;  %1232 = vmatmul.mubr.f32.gmra.mrb[42].mxu0 %v894_v53  ;;  %v896_v30 = vmax.f32 %v826_v56, 0.0  ;;  %v3221_v44 = vpack.c.bf16 %v542_v9, %v539_v8  ;;  %v545_v56 = vld [vmem:[%s5301_s5 + $0x1e8] sm:$0xff] }
 0x117   : > { %v897_v21 = vmax.f32 %v828_v18, 0.0  ;;  %v831_v22 = vpop.f32.mrb[14].mxu0  ;;  %3208 = vmatpush1.bf16.msra.mxu1 %v3207_v45  ;;  %3288 = vmatpush3.bf16.msra.mxu0 %v3287_v46  ;;  %v538_v45 = vld [vmem:[%s5301_s5 + $0x1b0] sm:$0xff]  ;;  %v541_v46 = vld [vmem:[%s5301_s5 + $0x1c8] sm:$0xff]  ;;  %v3225_v20 = vpack.c.bf16 %v548_v57, %v545_v56 }
 0x118   : > { %v832_v24 = vadd.f32 %v831_v22, %v4089_v51  ;;  %v833_v25 = vpop.f32.mrb[15].mxu0  ;;  %3210 = vmatprep.subr.bf16.mxu1 %v3209_v58  ;;  %3290 = vmatprep.subr.bf16.mxu0 %v3289_v17  ;;  %v3223_v15 = vpack.c.bf16 %v541_v46, %v538_v45  ;;  %v547_v22 = vld [vmem:[%s5301_s5 + $0x1f8] sm:$0xff] }
 0x119   : > { %v834_v34 = vadd.f32 %v833_v25, %v4092_v52  ;;  %2846 = vmatprep.mubr.msk.f32.mxu1 %vm932_vm1, %v897_v21  ;;  %2862 = vmatprep.mubr.msk.f32.mxu0 %vm932_vm1, %v897_v21  ;;  %v544_v21 = vld [vmem:[%s5301_s5 + $0x1e0] sm:$0xff] }
 0x11a   : > { %1082 = vmatmul.mubr.f32.gmra.mrb[12].mxu1 %v896_v30  ;;  %1237 = vmatmul.mubr.f32.gmra.mrb[44].mxu0 %v896_v30  ;;  %v898_v59 = vmax.f32 %v832_v24, 0.0  ;;  %v551_v30 = vld [vmem:[%s5301_s5 + $0x218] sm:$0xff]  ;;  %v554_v24 = vld [vmem:[%s5301_s5 + $0x230] sm:$0xff]  ;;  %v3227_v27 = vpack.c.bf16 %v547_v22, %v544_v21 }
 0x11b   : > { %v899_v41 = vmax.f32 %v834_v34, 0.0  ;;  %v837_v54 = vpop.f32.mrb[16].mxu0  ;;  %3212 = vmatpush1.bf16.msra.mxu1 %v3211_v23  ;;  %v3229_v39 = vpack.c.bf16 %v554_v24, %v551_v30 }
 0x11c   : > { %v838_v60 = vadd.f32 %v837_v54, %v4089_v51  ;;  %v839_v32 = vpop.f32.mrb[17].mxu0  ;;  %3214 = vmatprep.subr.bf16.mxu1 %v3213_v26  ;;  %v553_v54 = vld [vmem:[%s5301_s5 + $0x228] sm:$0xff] }
 0x11d   : > { %v840_v6 = vadd.f32 %v839_v32, %v4092_v52  ;;  %2847 = vmatprep.mubr.msk.f32.mxu1 %vm932_vm1, %v899_v41  ;;  %2863 = vmatprep.mubr.msk.f32.mxu0 %vm932_vm1, %v899_v41  ;;  %v550_v41 = vld [vmem:[%s5301_s5 + $0x210] sm:$0xff] }
 0x11e   : > { %1088 = vmatmul.mubr.f32.gmra.mrb[14].mxu1 %v898_v59  ;;  %1242 = vmatmul.mubr.f32.gmra.mrb[46].mxu0 %v898_v59  ;;  %v900_v42 = vmax.f32 %v838_v60, 0.0  ;;  %v557_v59 = vld [vmem:[%s5301_s5 + $0x248] sm:$0xff]  ;;  %v560_v60 = vld [vmem:[%s5301_s5 + $0x260] sm:$0xff]  ;;  %v3231_v4 = vpack.c.bf16 %v553_v54, %v550_v41 }
 0x11f   : > { %v901_v10 = vmax.f32 %v840_v6, 0.0  ;;  %v843_v11 = vpop.f32.mrb[18].mxu0  ;;  %3216 = vmatpush1.bf16.msra.mxu1 %v3215_v13  ;;  %v3233_v9 = vpack.c.bf16 %v560_v60, %v557_v59 }
 0x120   : > { %v844_v14 = vadd.f32 %v843_v11, %v4089_v51  ;;  %v845_v28 = vpop.f32.mrb[19].mxu0  ;;  %3218 = vmatprep.subr.bf16.mxu1 %v3217_v1  ;;  %v559_v11 = vld [vmem:[%s5301_s5 + $0x258] sm:$0xff] }
 0x121   : > { %v846_v53 = vadd.f32 %v845_v28, %v4092_v52  ;;  %2848 = vmatprep.mubr.msk.f32.mxu1 %vm932_vm1, %v901_v10  ;;  %2864 = vmatprep.mubr.msk.f32.mxu0 %vm932_vm1, %v901_v10  ;;  %v556_v10 = vld [vmem:[%s5301_s5 + $0x240] sm:$0xff] }
 0x122   : > { %1094 = vmatmul.mubr.f32.gmra.mrb[16].mxu1 %v900_v42  ;;  %1247 = vmatmul.mubr.f32.gmra.mrb[48].mxu0 %v900_v42  ;;  %v902_v17 = vmax.f32 %v844_v14, 0.0  ;;  %v563_v42 = vld [vmem:[%s5301_s5 + $0x278] sm:$0xff]  ;;  %v566_v14 = vld [vmem:[%s5301_s5 + $0x290] sm:$0xff]  ;;  %v3235_v45 = vpack.c.bf16 %v559_v11, %v556_v10 }
 0x123   : > { %v903_v58 = vmax.f32 %v846_v53, 0.0  ;;  %v849_v0 = vpop.f32.mrb[20].mxu0  ;;  %3220 = vmatpush1.bf16.msra.mxu1 %v3219_v12  ;;  %v3237_v57 = vpack.c.bf16 %v566_v14, %v563_v42  ;;  %v579_v10 = vld [vmem:[%s5301_s5 + $0x2f8] sm:$0xff]  ;;  %v528_v42 = vld [vmem:[%s5301_s5 + $0x160] sm:$0xff] }
 0x124   : > { %v850_v18 = vadd.f32 %v849_v0, %v4089_v51  ;;  %v851_v19 = vpop.f32.mrb[21].mxu0  ;;  %3222 = vmatprep.subr.bf16.mxu1 %v3221_v44  ;;  %v565_v0 = vld [vmem:[%s5301_s5 + $0x288] sm:$0xff]  ;;  %v531_v14 = vld [vmem:[%s5301_s5 + $0x178] sm:$0xff] }
 0x125   : > { %v852_v23 = vadd.f32 %v851_v19, %v4092_v52  ;;  %2849 = vmatprep.mubr.msk.f32.mxu1 %vm932_vm1, %v903_v58  ;;  %2865 = vmatprep.mubr.msk.f32.mxu0 %vm932_vm1, %v903_v58  ;;  %v562_v58 = vld [vmem:[%s5301_s5 + $0x270] sm:$0xff] }
 0x126   : > { %1100 = vmatmul.mubr.f32.gmra.mrb[18].mxu1 %v902_v17  ;;  %1252 = vmatmul.mubr.f32.gmra.mrb[50].mxu0 %v902_v17  ;;  %v904_v33 = vmax.f32 %v850_v18, 0.0  ;;  %v569_v17 = vld [vmem:[%s5301_s5 + $0x2a8] sm:$0xff]  ;;  %v572_v18 = vld [vmem:[%s5301_s5 + $0x2c0] sm:$0xff]  ;;  %v3239_v21 = vpack.c.bf16 %v565_v0, %v562_v58 }
 0x127   : > { %v905_v25 = vmax.f32 %v852_v23, 0.0  ;;  %v855_v26 = vpop.f32.mrb[22].mxu0  ;;  %3224 = vmatpush1.bf16.msra.mxu1 %v3223_v15  ;;  %v3241_v24 = vpack.c.bf16 %v572_v18, %v569_v17  ;;  %v4449_v58 = vld [vmem:[%s5300_s4] sm:$0x7] }
 0x128   : > { %v856_v34 = vadd.f32 %v855_v26, %v4089_v51  ;;  %v857_v35 = vpop.f32.mrb[23].mxu0  ;;  %3226 = vmatprep.subr.bf16.mxu1 %v3225_v20  ;;  %v571_v26 = vld [vmem:[%s5301_s5 + $0x2b8] sm:$0xff]  ;;  %v4453_v0 = vrot.slane %v4449_v58, %v4080_v40 }
 0x129   : > { %v858_v13 = vadd.f32 %v857_v35, %v4092_v52  ;;  %2850 = vmatprep.mubr.msk.f32.mxu1 %vm932_vm1, %v905_v25  ;;  %2866 = vmatprep.mubr.msk.f32.mxu0 %vm932_vm1, %v905_v25  ;;  %v568_v25 = vld [vmem:[%s5301_s5 + $0x2a0] sm:$0xff] }
 0x12a   : > { %1106 = vmatmul.mubr.f32.gmra.mrb[20].mxu1 %v904_v33  ;;  %1257 = vmatmul.mubr.f32.gmra.mrb[52].mxu0 %v904_v33  ;;  %v906_v5 = vmax.f32 %v856_v34, 0.0  ;;  %v3243_v35 = vpack.c.bf16 %v571_v26, %v568_v25  ;;  %v590_v25 = vld [vmem:[%s5301_s5 + $0x350] sm:$0xff]  ;;  %v588_v26 = vld [vmem:[%s5301_s5 + $0x340] sm:$0xff] }
 0x12b   : > { %v907_v32 = vmax.f32 %v858_v13, 0.0  ;;  %v861_v1 = vpop.f32.mrb[24].mxu0  ;;  %3228 = vmatpush1.bf16.msra.mxu1 %v3227_v27 }
 0x12c   : > { %v862_v6 = vadd.f32 %v861_v1, %v4089_v51  ;;  %v863_v8 = vpop.f32.mrb[25].mxu0  ;;  %3230 = vmatprep.subr.bf16.mxu1 %v3229_v39  ;;  %v575_v1 = vld [vmem:[%s5301_s5 + $0x2d8] sm:$0xff] }
 0x12d   : > { %v864_v12 = vadd.f32 %v863_v8, %v4092_v52  ;;  %2851 = vmatprep.mubr.msk.f32.mxu1 %vm932_vm1, %v907_v32  ;;  %2867 = vmatprep.mubr.msk.f32.mxu0 %vm932_vm1, %v907_v32  ;;  %v574_v8 = vld [vmem:[%s5301_s5 + $0x2d0] sm:$0xff] }
 0x12e   : > { %1112 = vmatmul.mubr.f32.gmra.mrb[22].mxu1 %v906_v5  ;;  %1262 = vmatmul.mubr.f32.gmra.mrb[54].mxu0 %v906_v5  ;;  %v908_v46 = vmax.f32 %v862_v6, 0.0  ;;  %v576_v5 = vld [vmem:[%s5301_s5 + $0x2e0] sm:$0xff] }
 0x12f   : > { %v909_v28 = vmax.f32 %v864_v12, 0.0  ;;  %v867_v44 = vpop.f32.mrb[26].mxu0  ;;  %3232 = vmatpush1.bf16.msra.mxu1 %v3231_v4  ;;  %v578_v4 = vld [vmem:[%s5301_s5 + $0x2f0] sm:$0xff]  ;;  %v3293_v12 = vpack.c.bf16 %v579_v10, %v576_v5  ;;  %v596_v5 = vld [vmem:[%s5301_s5 + $0x380] sm:$0xff] }
 0x130   : > { %v868_v53 = vadd.f32 %v867_v44, %v4089_v51  ;;  %v869_v56 = vpop.f32.mrb[27].mxu0  ;;  %3234 = vmatprep.subr.bf16.mxu1 %v3233_v9  ;;  %v3245_v6 = vpack.c.bf16 %v578_v4, %v575_v1  ;;  %v577_v9 = vld [vmem:[%s5301_s5 + $0x2e8] sm:$0xff] }
 0x131   : > { %v870_v15 = vadd.f32 %v869_v56, %v4092_v52  ;;  %2852 = vmatprep.mubr.msk.f32.mxu1 %vm932_vm1, %v909_v28  ;;  %2868 = vmatprep.mubr.msk.f32.mxu0 %vm932_vm1, %v909_v28  ;;  %v3247_v11 = vpack.c.bf16 %v577_v9, %v574_v8  ;;  %v3295_v28 = vpack.c.bf16 %v531_v14, %v528_v42  ;;  %v581_v44 = vld [vmem:[%s5301_s5 + $0x308] sm:$0xff] }
 0x132   : > { %1118 = vmatmul.mubr.f32.gmra.mrb[24].mxu1 %v908_v46  ;;  %1267 = vmatmul.mubr.f32.gmra.mrb[56].mxu0 %v908_v46  ;;  %v910_v22 = vmax.f32 %v868_v53, 0.0  ;;  %v582_v53 = vld [vmem:[%s5301_s5 + $0x310] sm:$0xff]  ;;  %v585_v56 = vld [vmem:[%s5301_s5 + $0x328] sm:$0xff] }
 0x133   : > { %v911_v19 = vmax.f32 %v870_v15, 0.0  ;;  %v873_v20 = vpop.f32.mrb[28].mxu0  ;;  %3236 = vmatpush1.bf16.msra.mxu1 %v3235_v45  ;;  %v584_v45 = vld [vmem:[%s5301_s5 + $0x320] sm:$0xff]  ;;  %v4457_v15 = vrot.slane %v4449_v58, %v4086_v50  ;;  %v597_v8 = vld [vmem:[%s5301_s5 + $0x388] sm:$0xff] }
 0x134   : > { %v874_v23 = vadd.f32 %v873_v20, %v4089_v51  ;;  %v875_v30 = vpop.f32.mrb[29].mxu0  ;;  %3238 = vmatprep.subr.bf16.mxu1 %v3237_v57  ;;  %v3249_v46 = vpack.c.bf16 %v584_v45, %v581_v44  ;;  %v3297_v57 = vpack.c.bf16 %v585_v56, %v582_v53  ;;  %v595_v53 = vld [vmem:[%s5301_s5 + $0x378] sm:$0xff] }
 0x135   : > { %v876_v27 = vadd.f32 %v875_v30, %v4092_v52  ;;  %2853 = vmatprep.mubr.msk.f32.mxu1 %vm932_vm1, %v911_v19  ;;  %2869 = vmatprep.mubr.msk.f32.mxu0 %vm932_vm1, %v911_v19  ;;  %v587_v30 = vld [vmem:[%s5301_s5 + $0x338] sm:$0xff] }
 0x136   : > { %1124 = vmatmul.mubr.f32.gmra.mrb[26].mxu1 %v910_v22  ;;  %1272 = vmatmul.mubr.f32.gmra.mrb[58].mxu0 %v910_v22  ;;  %v912_v39 = vmax.f32 %v874_v23, 0.0  ;;  %v580_v22 = vld [vmem:[%s5301_s5 + $0x300] sm:$0xff]  ;;  %v583_v23 = vld [vmem:[%s5301_s5 + $0x318] sm:$0xff] }
 0x137   : > { %v913_v33 = vmax.f32 %v876_v27, 0.0  ;;  %v879_v34 = vpop.f32.mrb[30].mxu0  ;;  %3240 = vmatpush1.bf16.msra.mxu1 %v3239_v21  ;;  %v591_v27 = vld [vmem:[%s5301_s5 + $0x358] sm:$0xff] }
 0x138   : > { %v880_v41 = vadd.f32 %v879_v34, %v4089_v51  ;;  %v881_v54 = vpop.f32.mrb[31].mxu0  ;;  %3242 = vmatprep.subr.bf16.mxu1 %v3241_v24  ;;  %v522_v51 = vld [vmem:[%s5301_s5 + $0x130] sm:$0xff]  ;;  %v3301_v1 = vpack.c.bf16 %v591_v27, %v588_v26  ;;  %v599_v56 = vld [vmem:[%s5301_s5 + $0x398] sm:$0xff] }
 0x139   : > { %v882_v13 = vadd.f32 %v881_v54, %v4092_v52  ;;  %2854 = vmatprep.mubr.msk.f32.mxu1 %vm932_vm1, %v913_v33  ;;  %2870 = vmatprep.mubr.msk.f32.mxu0 %vm932_vm1, %v913_v33  ;;  %v525_v52 = vld [vmem:[%s5301_s5 + $0x148] sm:$0xff] }
 0x13a   : > { %1130 = vmatmul.mubr.f32.gmra.mrb[28].mxu1 %v912_v39  ;;  %1277 = vmatmul.mubr.f32.gmra.mrb[60].mxu0 %v912_v39  ;;  %v914_v60 = vmax.f32 %v880_v41, 0.0  ;;  %v3291_v32 = vpack.c.bf16 %v525_v52, %v522_v51  ;;  %v3251_v39 = vpack.c.bf16 %v583_v23, %v580_v22  ;;  %v586_v51 = vld [vmem:[%s5301_s5 + $0x330] sm:$0xff]  ;;  %v589_v52 = vld [vmem:[%s5301_s5 + $0x348] sm:$0xff] }
 0x13b   : > { %v915_v59 = vmax.f32 %v882_v13, 0.0  ;;  %3244 = vmatpush1.bf16.msra.mxu1 %v3243_v35 }
 0x13c   : > { %3292 = vmatpush3.bf16.msra.mxu0 %v3291_v32  ;;  %3246 = vmatprep.subr.bf16.mxu1 %v3245_v6  ;;  %v593_v32 = vld [vmem:[%s5301_s5 + $0x368] sm:$0xff]  ;;  %v594_v6 = vld [vmem:[%s5301_s5 + $0x370] sm:$0xff] }
 0x13d   : > { %2855 = vmatprep.mubr.msk.f32.mxu1 %vm932_vm1, %v915_v59  ;;  %2871 = vmatprep.mubr.msk.f32.mxu0 %vm932_vm1, %v915_v59  ;;  %v3257_v45 = vpack.c.bf16 %v596_v5, %v593_v32 }
 0x13e   : > { %1136 = vmatmul.mubr.f32.gmra.mrb[30].mxu1 %v914_v60  ;;  %1282 = vmatmul.mubr.f32.gmra.mrb[62].mxu0 %v914_v60  ;;  %v3253_v60 = vpack.c.bf16 %v590_v25, %v587_v30 }
 0x13f   : > { %3248 = vmatpush1.bf16.msra.mxu1 %v3247_v11  ;;  %3294 = vmatprep.subr.bf16.mxu0 %v3293_v12  ;;  %v3255_v12 = vpack.c.bf16 %v589_v52, %v586_v51 }
 0x140   : > { %3296 = vmatpush3.bf16.msra.mxu0 %v3295_v28  ;;  %3250 = vmatprep.subr.bf16.mxu1 %v3249_v46  ;;  %v592_v46 = vld [vmem:[%s5301_s5 + $0x360] sm:$0xff] }
 0x141   : > { %3298 = vmatprep.subr.bf16.mxu0 %v3297_v57 }
 0x1d5   : > { %v1047_v17 = vpop.f32.mrb[0].mxu1  ;;  %v4459_v18 = vpop.f32.mrb[32].mxu0 }
 0x1d6   : > { %v1048_v19 = vadd.f32 %v1047_v17, %v4453_v0  ;;  %v1049_v20 = vpop.f32.mrb[1].mxu1  ;;  %v1210_v21 = vpop.f32.mrb[33].mxu0 }
 0x1d7   : > { %v1050_v24 = vadd.f32 %v1049_v20, %v4457_v15  ;;  %v600_v20 = vld [vmem:[%s5301_s5 + $0x3a0] sm:$0xff]  ;;  %v603_v21 = vld [vmem:[%s5301_s5 + $0x3b8] sm:$0xff] }
 0x1d8   : > { %v1287_v41 = vmax.f32 %v1048_v19, 0.0  ;;  %v602_v19 = vld [vmem:[%s5301_s5 + $0x3b0] sm:$0xff] }
 0x1d9   : > { %v1288_v33 = vmax.f32 %v1050_v24, 0.0  ;;  %v1053_v34 = vpop.f32.mrb[2].mxu1  ;;  %v4481_v35 = vpop.f32.mrb[34].mxu0  ;;  %v3259_v24 = vpack.c.bf16 %v595_v53, %v592_v46 }
 0x1da   : > { %v1054_v54 = vadd.f32 %v1053_v34, %v4453_v0  ;;  %v1055_v13 = vpop.f32.mrb[3].mxu1  ;;  %v1215_v59 = vpop.f32.mrb[35].mxu0  ;;  %v3261_v34 = vpack.c.bf16 %v602_v19, %v599_v56 }
 0x1db   : > { %v1056_v4 = vadd.f32 %v1055_v13, %v4457_v15  ;;  %1464 = vmatprep.mubr.f32.mxu1 %v1288_v33  ;;  %1786 = vmatprep.mubr.f32.mxu0 %v1288_v33 }
 0x1dc   : > { %1465 = vmatmul.mubr.f32.vlgmr.msra.gmra.mrb[32].mxu1 %v1287_v41  ;;  %1787 = vmatmul.mubr.f32.vlgmr.msra.gmra.mrb[64].mxu0 %v1287_v41  ;;  %v1290_v42 = vmax.f32 %v1054_v54, 0.0  ;;  %v601_v41 = vld [vmem:[%s5301_s5 + $0x3a8] sm:$0xff]  ;;  %v3309_v54 = vpack.c.bf16 %v603_v21, %v600_v20 }
 0x1dd   : > { %v1291_v9 = vmax.f32 %v1056_v4, 0.0  ;;  %3252 = vmatpush1.bf16.msra.mxu1 %v3251_v39  ;;  %v1059_v10 = vpop.f32.mrb[4].mxu1  ;;  %v4503_v11 = vpop.f32.mrb[36].mxu0  ;;  %3300 = vmatpush3.bf16.msra.mxu0 %v3297_v57  ;;  %v3305_v57 = vpack.c.bf16 %v597_v8, %v594_v6  ;;  %v598_v39 = vld [vmem:[%s5301_s5 + $0x390] sm:$0xff] }
 0x1de   : > { %v1060_v14 = vadd.f32 %v1059_v10, %v4453_v0  ;;  %v1061_v28 = vpop.f32.mrb[5].mxu1  ;;  %v1220_v44 = vpop.f32.mrb[37].mxu0  ;;  %3254 = vmatprep.subr.bf16.mxu1 %v3253_v60  ;;  %3302 = vmatprep.subr.bf16.mxu0 %v3301_v1  ;;  %v3263_v52 = vpack.c.bf16 %v601_v41, %v598_v39 }
 0x1df   : > { %v1062_v17 = vadd.f32 %v1061_v28, %v4457_v15  ;;  %1470 = vmatprep.mubr.f32.mxu1 %v1291_v9  ;;  %1791 = vmatprep.mubr.f32.mxu0 %v1291_v9 }
 0x1e0   : > { %1471 = vmatmul.mubr.f32.gmra.mrb[34].mxu1 %v1290_v42  ;;  %1792 = vmatmul.mubr.f32.gmra.mrb[66].mxu0 %v1290_v42  ;;  %v1293_v25 = vmax.f32 %v1060_v14, 0.0 }
 0x1e1   : > { %v1294_v22 = vmax.f32 %v1062_v17, 0.0  ;;  %v1065_v23 = vpop.f32.mrb[6].mxu1  ;;  %v4525_v30 = vpop.f32.mrb[38].mxu0  ;;  %3256 = vmatpush1.bf16.msra.mxu1 %v3255_v12  ;;  %3304 = vmatpush3.bf16.msra.mxu0 %v3301_v1 }
 0x1e2   : > { %v1066_v26 = vadd.f32 %v1065_v23, %v4453_v0  ;;  %v1067_v27 = vpop.f32.mrb[7].mxu1  ;;  %v1225_v33 = vpop.f32.mrb[39].mxu0  ;;  %3258 = vmatprep.subr.bf16.mxu1 %v3257_v45  ;;  %3306 = vmatprep.subr.bf16.mxu0 %v3305_v57 }
 0x1e3   : > { %v1068_v13 = vadd.f32 %v1067_v27, %v4457_v15  ;;  %1476 = vmatprep.mubr.f32.mxu1 %v1294_v22  ;;  %1796 = vmatprep.mubr.f32.mxu0 %v1294_v22 }
 0x1e4   : > { %1477 = vmatmul.mubr.f32.gmra.mrb[36].mxu1 %v1293_v25  ;;  %1797 = vmatmul.mubr.f32.gmra.mrb[68].mxu0 %v1293_v25  ;;  %v1296_v32 = vmax.f32 %v1066_v26, 0.0 }
 0x1e5   : > { %v1297_v59 = vmax.f32 %v1068_v13, 0.0  ;;  %v1071_v60 = vpop.f32.mrb[8].mxu1  ;;  %v4535_v51 = vpop.f32.mrb[40].mxu0  ;;  %3260 = vmatpush1.bf16.msra.mxu1 %v3259_v24  ;;  %3308 = vmatpush3.bf16.msra.mxu0 %v3305_v57 }
 0x1e6   : > { %v1072_v1 = vadd.f32 %v1071_v60, %v4453_v0  ;;  %v1073_v4 = vpop.f32.mrb[9].mxu1  ;;  %v1230_v5 = vpop.f32.mrb[41].mxu0  ;;  %3262 = vmatprep.subr.bf16.mxu1 %v3261_v34  ;;  %3310 = vmatprep.subr.bf16.mxu0 %v3309_v54 }
 0x1e7   : > { %v1074_v6 = vadd.f32 %v1073_v4, %v4457_v15  ;;  %1482 = vmatprep.mubr.f32.mxu1 %v1297_v59  ;;  %1801 = vmatprep.mubr.f32.mxu0 %v1297_v59 }
 0x1e8   : > { %1483 = vmatmul.mubr.f32.gmra.mrb[38].mxu1 %v1296_v32  ;;  %1802 = vmatmul.mubr.f32.gmra.mrb[70].mxu0 %v1296_v32  ;;  %v1299_v12 = vmax.f32 %v1072_v1, 0.0 }
 0x1e9   : > { %v1300_v8 = vmax.f32 %v1074_v6, 0.0  ;;  %v1077_v9 = vpop.f32.mrb[10].mxu1  ;;  %v4539_v10 = vpop.f32.mrb[42].mxu0  ;;  %3264 = vmatpush1.bf16.msra.mxu1 %v3263_v52  ;;  %3312 = vmatpush3.bf16.msra.mxu0 %v3309_v54 }
 0x1ea   : > { %v1078_v42 = vadd.f32 %v1077_v9, %v4453_v0  ;;  %v1079_v14 = vpop.f32.mrb[11].mxu1  ;;  %v1235_v28 = vpop.f32.mrb[43].mxu0  ;;  %3385 = vmatprep.subr.bf16.mxu0 %v3559_v3 }
 0x1eb   : > { %v1080_v44 = vadd.f32 %v1079_v14, %v4457_v15  ;;  %1488 = vmatprep.mubr.f32.mxu1 %v1300_v8  ;;  %1806 = vmatprep.mubr.f32.mxu0 %v1300_v8 }
 0x1ec   : > { %1489 = vmatmul.mubr.f32.gmra.mrb[40].mxu1 %v1299_v12  ;;  %1807 = vmatmul.mubr.f32.gmra.mrb[72].mxu0 %v1299_v12  ;;  %v1302_v56 = vmax.f32 %v1078_v42, 0.0 }
 0x1ed   : > { %v1303_v45 = vmax.f32 %v1080_v44, 0.0  ;;  %v1083_v46 = vpop.f32.mrb[12].mxu1  ;;  %v4544_v53 = vpop.f32.mrb[44].mxu0 }
 0x1ee   : > { %v1084_v57 = vadd.f32 %v1083_v46, %v4453_v0  ;;  %v1085_v17 = vpop.f32.mrb[13].mxu1  ;;  %v1240_v19 = vpop.f32.mrb[45].mxu0 }
 0x1ef   : > { %v1086_v20 = vadd.f32 %v1085_v17, %v4457_v15  ;;  %1494 = vmatprep.mubr.f32.mxu1 %v1303_v45  ;;  %1811 = vmatprep.mubr.f32.mxu0 %v1303_v45 }
 0x1f0   : > { %1495 = vmatmul.mubr.f32.gmra.mrb[42].mxu1 %v1302_v56  ;;  %1812 = vmatmul.mubr.f32.gmra.mrb[74].mxu0 %v1302_v56  ;;  %v1305_v24 = vmax.f32 %v1084_v57, 0.0 }
 0x1f1   : > { %v1306_v21 = vmax.f32 %v1086_v20, 0.0  ;;  %v1089_v22 = vpop.f32.mrb[14].mxu1  ;;  %v4548_v23 = vpop.f32.mrb[46].mxu0 }
 0x1f2   : > { %v1090_v25 = vadd.f32 %v1089_v22, %v4453_v0  ;;  %v1091_v26 = vpop.f32.mrb[15].mxu1  ;;  %v1245_v27 = vpop.f32.mrb[47].mxu0 }
 0x1f3   : > { %v1092_v33 = vadd.f32 %v1091_v26, %v4457_v15  ;;  %1500 = vmatprep.mubr.f32.mxu1 %v1306_v21  ;;  %1816 = vmatprep.mubr.f32.mxu0 %v1306_v21 }
 0x1f4   : > { %1501 = vmatmul.mubr.f32.gmra.mrb[44].mxu1 %v1305_v24  ;;  %1817 = vmatmul.mubr.f32.gmra.mrb[76].mxu0 %v1305_v24  ;;  %v1308_v54 = vmax.f32 %v1090_v25, 0.0 }
 0x1f5   : > { %v1309_v34 = vmax.f32 %v1092_v33, 0.0  ;;  %v1095_v39 = vpop.f32.mrb[16].mxu1  ;;  %v4552_v41 = vpop.f32.mrb[48].mxu0 }
 0x1f6   : > { %v1096_v13 = vadd.f32 %v1095_v39, %v4453_v0  ;;  %v1097_v59 = vpop.f32.mrb[17].mxu1  ;;  %v1250_v60 = vpop.f32.mrb[49].mxu0 }
 0x1f7   : > { %v1098_v52 = vadd.f32 %v1097_v59, %v4457_v15  ;;  %1506 = vmatprep.mubr.f32.mxu1 %v1309_v34  ;;  %1821 = vmatprep.mubr.f32.mxu0 %v1309_v34 }
 0x1f8   : > { %1507 = vmatmul.mubr.f32.gmra.mrb[46].mxu1 %v1308_v54  ;;  %1822 = vmatmul.mubr.f32.gmra.mrb[78].mxu0 %v1308_v54  ;;  %v1311_v5 = vmax.f32 %v1096_v13, 0.0 }
 0x1f9   : > { %v1312_v32 = vmax.f32 %v1098_v52, 0.0  ;;  %v1101_v1 = vpop.f32.mrb[18].mxu1  ;;  %v4556_v4 = vpop.f32.mrb[50].mxu0 }
 0x1fa   : > { %v1102_v6 = vadd.f32 %v1101_v1, %v4453_v0  ;;  %v1103_v8 = vpop.f32.mrb[19].mxu1  ;;  %v1255_v9 = vpop.f32.mrb[51].mxu0 }
 0x1fb   : > { %v1104_v12 = vadd.f32 %v1103_v8, %v4457_v15  ;;  %1512 = vmatprep.mubr.f32.mxu1 %v1312_v32  ;;  %1826 = vmatprep.mubr.f32.mxu0 %v1312_v32 }
 0x1fc   : > { %1513 = vmatmul.mubr.f32.gmra.mrb[48].mxu1 %v1311_v5  ;;  %1827 = vmatmul.mubr.f32.gmra.mrb[80].mxu0 %v1311_v5  ;;  %v1314_v44 = vmax.f32 %v1102_v6, 0.0 }
 0x1fd   : > { %v1315_v42 = vmax.f32 %v1104_v12, 0.0  ;;  %v1107_v14 = vpop.f32.mrb[20].mxu1  ;;  %v4560_v28 = vpop.f32.mrb[52].mxu0  ;;  %v927_v12 = vsub.s32 2, %v4077_v31 }
 0x1fe   : > { %v1108_v45 = vadd.f32 %v1107_v14, %v4453_v0  ;;  %v1109_v46 = vpop.f32.mrb[21].mxu1  ;;  %v1260_v56 = vpop.f32.mrb[53].mxu0 }
 0x1ff   : > { %v1110_v57 = vadd.f32 %v1109_v46, %v4457_v15  ;;  %1518 = vmatprep.mubr.f32.mxu1 %v1315_v42  ;;  %1831 = vmatprep.mubr.f32.mxu0 %v1315_v42 }
 0x200   : > { %1519 = vmatmul.mubr.f32.gmra.mrb[50].mxu1 %v1314_v44  ;;  %1832 = vmatmul.mubr.f32.gmra.mrb[82].mxu0 %v1314_v44  ;;  %v1317_v21 = vmax.f32 %v1108_v45, 0.0 }
 0x201   : > { %v1318_v17 = vmax.f32 %v1110_v57, 0.0  ;;  %v1113_v19 = vpop.f32.mrb[22].mxu1  ;;  %v4564_v20 = vpop.f32.mrb[54].mxu0 }
 0x202   : > { %v1114_v22 = vadd.f32 %v1113_v19, %v4453_v0  ;;  %v1115_v24 = vpop.f32.mrb[23].mxu1  ;;  %v1265_v25 = vpop.f32.mrb[55].mxu0  ;;  %v4583_v19 = vrot.slane %v4449_v58, %v927_v12 }
 0x203   : > { %v1116_v26 = vadd.f32 %v1115_v24, %v4457_v15  ;;  %1524 = vmatprep.mubr.f32.mxu1 %v1318_v17  ;;  %1836 = vmatprep.mubr.f32.mxu0 %v1318_v17 }
 0x204   : > { %1525 = vmatmul.mubr.f32.gmra.mrb[52].mxu1 %v1317_v21  ;;  %1837 = vmatmul.mubr.f32.gmra.mrb[84].mxu0 %v1317_v21  ;;  %v1320_v39 = vmax.f32 %v1114_v22, 0.0 }
 0x205   : > { %v1321_v27 = vmax.f32 %v1116_v26, 0.0  ;;  %v1119_v33 = vpop.f32.mrb[24].mxu1  ;;  %v4568_v34 = vpop.f32.mrb[56].mxu0 }
 0x206   : > { %v1120_v54 = vadd.f32 %v1119_v33, %v4453_v0  ;;  %v1121_v13 = vpop.f32.mrb[25].mxu1  ;;  %v1270_v59 = vpop.f32.mrb[57].mxu0 }
 0x207   : > { %v1122_v60 = vadd.f32 %v1121_v13, %v4457_v15  ;;  %1530 = vmatprep.mubr.f32.mxu1 %v1321_v27  ;;  %1841 = vmatprep.mubr.f32.mxu0 %v1321_v27  ;;  %v1214_v59 = vadd.f32 %v4481_v35, %v4583_v19  ;;  %v1229_v35 = vadd.f32 %v4535_v51, %v4583_v19 }
 0x208   : > { %1531 = vmatmul.mubr.f32.gmra.mrb[54].mxu1 %v1320_v39  ;;  %1842 = vmatmul.mubr.f32.gmra.mrb[86].mxu0 %v1320_v39  ;;  %v1323_v5 = vmax.f32 %v1120_v54, 0.0  ;;  %v1209_v54 = vadd.f32 %v4459_v18, %v4583_v19  ;;  %v1224_v18 = vadd.f32 %v4525_v30, %v4583_v19  ;;  %v1239_v30 = vadd.f32 %v4544_v53, %v4583_v19 }
 0x209   : > { %v1324_v52 = vmax.f32 %v1122_v60, 0.0  ;;  %v1125_v32 = vpop.f32.mrb[26].mxu1  ;;  %v4572_v1 = vpop.f32.mrb[58].mxu0 }
 0x20a   : > { %v1126_v6 = vadd.f32 %v1125_v32, %v4453_v0  ;;  %v1127_v8 = vpop.f32.mrb[27].mxu1  ;;  %v1275_v9 = vpop.f32.mrb[59].mxu0 }
 0x20b   : > { %v1128_v42 = vadd.f32 %v1127_v8, %v4457_v15  ;;  %1536 = vmatprep.mubr.f32.mxu1 %v1324_v52  ;;  %1846 = vmatprep.mubr.f32.mxu0 %v1324_v52  ;;  %v1289_v52 = vmax.f32 %v1209_v54, 0.0  ;;  %v1244_v8 = vadd.f32 %v4548_v23, %v4583_v19  ;;  %v1307_v9 = vmax.f32 %v1239_v30, 0.0  ;;  %v609_v54 = vld [vmem:[%s5303_s7 + $0x20] sm:$0xff] }
 0x20c   : > { %1537 = vmatmul.mubr.f32.gmra.mrb[56].mxu1 %v1323_v5  ;;  %1847 = vmatmul.mubr.f32.gmra.mrb[88].mxu0 %v1323_v5  ;;  %v1326_v46 = vmax.f32 %v1126_v6, 0.0  ;;  %v1234_v5 = vadd.f32 %v4539_v10, %v4583_v19  ;;  %v1301_v6 = vmax.f32 %v1229_v35, 0.0  ;;  %v1249_v10 = vadd.f32 %v4552_v41, %v4583_v19  ;;  %v620_v35 = vld [vmem:[%s5303_s7 + $0x78] sm:$0xff] }
 0x20d   : > { %v1327_v14 = vmax.f32 %v1128_v42, 0.0  ;;  %v1131_v44 = vpop.f32.mrb[28].mxu1  ;;  %v4577_v45 = vpop.f32.mrb[60].mxu0  ;;  %v1310_v53 = vmax.f32 %v1244_v8, 0.0  ;;  %v4624_v42 = vadd.f32 %v4556_v4, %v4583_v19  ;;  %v4628_v23 = vadd.f32 %v4560_v28, %v4583_v19  ;;  %v624_v8 = vld [vmem:[%s5303_s7 + $0x98] sm:$0xff] }
 0x20e   : > { %v1132_v56 = vadd.f32 %v1131_v44, %v4453_v0  ;;  %v1133_v57 = vpop.f32.mrb[29].mxu1  ;;  %v1280_v17 = vpop.f32.mrb[61].mxu0  ;;  %v1304_v51 = vmax.f32 %v1234_v5, 0.0  ;;  %v4637_v44 = vadd.f32 %v4564_v20, %v4583_v19  ;;  %v4642_v28 = vadd.f32 %v4568_v34, %v4583_v19  ;;  %v617_v5 = vld [vmem:[%s5303_s7 + $0x60] sm:$0xff] }
 0x20f   : > { %v1134_v21 = vadd.f32 %v1133_v57, %v4457_v15  ;;  %1542 = vmatprep.mubr.f32.mxu1 %v1327_v14  ;;  %1851 = vmatprep.mubr.f32.mxu0 %v1327_v14  ;;  %v1313_v14 = vmax.f32 %v1249_v10, 0.0  ;;  %v1316_v41 = vmax.f32 %v4624_v42, 0.0  ;;  %v1319_v4 = vmax.f32 %v4628_v23, 0.0  ;;  %v606_v17 = vld [vmem:[%s5303_s7 + $0x8] sm:$0xff]  ;;  %v621_v10 = vld [vmem:[%s5303_s7 + $0x80] sm:$0xff]  ;;  %v628_v23 = vld [vmem:[%s5303_s7 + $0xb8] sm:$0xff] }
 0x210   : > { %1543 = vmatmul.mubr.f32.gmra.mrb[58].mxu1 %v1326_v46  ;;  %1852 = vmatmul.mubr.f32.gmra.mrb[90].mxu0 %v1326_v46  ;;  %v1329_v26 = vmax.f32 %v1132_v56, 0.0  ;;  %v1322_v46 = vmax.f32 %v4637_v44, 0.0  ;;  %v4653_v20 = vadd.f32 %v4572_v1, %v4583_v19  ;;  %v1325_v56 = vmax.f32 %v4642_v28, 0.0  ;;  %v630_v44 = vld [vmem:[%s5303_s7 + $0xc8] sm:$0xff] }
 0x211   : > { %v1330_v22 = vmax.f32 %v1134_v21, 0.0  ;;  %v1137_v24 = vpop.f32.mrb[30].mxu1  ;;  %v4586_v25 = vpop.f32.mrb[62].mxu0  ;;  %v4658_v34 = vadd.f32 %v4577_v45, %v4583_v19  ;;  %v608_v21 = vld [vmem:[%s5303_s7 + $0x18] sm:$0xff]  ;;  %v634_v28 = vld [vmem:[%s5303_s7 + $0xe8] sm:$0xff] }
 0x212   : > { %v1138_v27 = vadd.f32 %v1137_v24, %v4453_v0  ;;  %v1139_v33 = vpop.f32.mrb[31].mxu1  ;;  %v1285_v39 = vpop.f32.mrb[63].mxu0  ;;  %v1219_v0 = vadd.f32 %v4503_v11, %v4583_v19  ;;  %v1298_v11 = vmax.f32 %v1224_v18, 0.0  ;;  %v1328_v1 = vmax.f32 %v4653_v20, 0.0  ;;  %v607_v24 = vld [vmem:[%s5303_s7 + $0x10] sm:$0xff]  ;;  %v638_v20 = vld [vmem:[%s5303_s7 + $0x108] sm:$0xff] }
 0x213   : > { %v1140_v58 = vadd.f32 %v1139_v33, %v4457_v15  ;;  %1548 = vmatprep.mubr.f32.mxu1 %v1330_v22  ;;  %1856 = vmatprep.mubr.f32.mxu0 %v1330_v22  ;;  %v1292_v15 = vmax.f32 %v1214_v59, 0.0  ;;  %v4671_v57 = vadd.f32 %v4586_v25, %v4583_v19  ;;  %v1331_v45 = vmax.f32 %v4658_v34, 0.0  ;;  %v605_v19 = vld [vmem:[%s5303_s7] sm:$0xff]  ;;  %v612_v33 = vld [vmem:[%s5303_s7 + $0x38] sm:$0xff]  ;;  %v614_v59 = vld [vmem:[%s5303_s7 + $0x48] sm:$0xff] }
 0x214   : > { %1549 = vmatmul.mubr.f32.gmra.mrb[60].mxu1 %v1329_v26  ;;  %1857 = vmatmul.mubr.f32.gmra.mrb[92].mxu0 %v1329_v26  ;;  %v1332_v60 = vmax.f32 %v1138_v27, 0.0  ;;  %v1295_v32 = vmax.f32 %v1219_v0, 0.0  ;;  %v3313_v22 = vpack.c.bf16 %v608_v21, %v606_v17  ;;  %v3315_v25 = vpack.c.bf16 %v607_v24, %v605_v19  ;;  %v610_v27 = vld [vmem:[%s5303_s7 + $0x28] sm:$0xff]  ;;  %v613_v0 = vld [vmem:[%s5303_s7 + $0x40] sm:$0xff]  ;;  %v627_v17 = vld [vmem:[%s5303_s7 + $0xb0] sm:$0xff] }
 0x215   : > { %v1333_v13 = vmax.f32 %v1140_v58, 0.0  ;;  %v1334_v26 = vmax.f32 %v4671_v57, 0.0  ;;  %v3317_v39 = vpack.c.bf16 %v612_v33, %v610_v27  ;;  %v611_v58 = vld [vmem:[%s5303_s7 + $0x30] sm:$0xff]  ;;  %v629_v19 = vld [vmem:[%s5303_s7 + $0xc0] sm:$0xff]  ;;  %v642_v34 = vld [vmem:[%s5303_s7 + $0x128] sm:$0xff] }
 0x216   : > { %3314 = vmatprep.subr.bf16.mxu1 %v3313_v22  ;;  %v631_v24 = vld [vmem:[%s5303_s7 + $0xd0] sm:$0xff]  ;;  %v633_v33 = vld [vmem:[%s5303_s7 + $0xe0] sm:$0xff]  ;;  %v648_v57 = vld [vmem:[%s5303_s7 + $0x158] sm:$0xff] }
 0x217   : > { %1554 = vmatprep.mubr.f32.mxu1 %v1333_v13  ;;  %1861 = vmatprep.mubr.f32.mxu0 %v1333_v13  ;;  %v3319_v13 = vpack.c.bf16 %v611_v58, %v609_v54 }
 0x218   : > { %1555 = vmatmul.mubr.f32.gmra.mrb[62].mxu1 %v1332_v60  ;;  %1862 = vmatmul.mubr.f32.gmra.mrb[94].mxu0 %v1332_v60  ;;  %v616_v60 = vld [vmem:[%s5303_s7 + $0x58] sm:$0xff] }
 0x219   : > { %3059 = vmatprep.mubr.msk.f32.mxu0 %vm1351_vm2, %v1289_v52  ;;  %1625 = vmatprep.mubr.f32.mxu1 %v3558_v7 }
 0x21c   : > { %2872 = vmatmul.mubr.msk.f32.vlgmr.msra.gmra.mrb[32].mxu1 %vm1351_vm2, %v1289_v52  ;;  %3060 = vmatmul.mubr.msk.f32.vlgmr.msra.gmra.mrb[96].mxu0 %vm1351_vm2, %v1292_v15  ;;  %v3321_v52 = vpack.c.bf16 %v616_v60, %v614_v59  ;;  %v639_v59 = vld [vmem:[%s5303_s7 + $0x110] sm:$0xff] }
 0x21d   : > { %3062 = vmatprep.mubr.msk.f32.mxu0 %vm1351_vm2, %v1295_v32  ;;  %1631 = vmatprep.mubr.f32.mxu1 %v3558_v7 }
 0x21e   : > { %3316 = vmatpush1.bf16.msra.mxu1 %v3315_v25  ;;  %v3339_v25 = vpack.c.bf16 %v631_v24, %v629_v19  ;;  %v662_v24 = vld [vmem:[%s5303_s7 + $0x1c8] sm:$0xff] }
 0x21f   : > { %3318 = vmatprep.subr.bf16.mxu1 %v3317_v39  ;;  %v635_v39 = vld [vmem:[%s5303_s7 + $0xf0] sm:$0xff] }
 0x220   : > { %2873 = vmatmul.mubr.msk.f32.gmra.mrb[34].mxu1 %vm1351_vm2, %v1292_v15  ;;  %3063 = vmatmul.mubr.msk.f32.gmra.mrb[98].mxu0 %vm1351_vm2, %v1298_v11  ;;  %v615_v15 = vld [vmem:[%s5303_s7 + $0x50] sm:$0xff]  ;;  %v3343_v54 = vpack.c.bf16 %v635_v39, %v633_v33  ;;  %v666_v39 = vld [vmem:[%s5303_s7 + $0x1e8] sm:$0xff] }
 0x221   : > { %3065 = vmatprep.mubr.msk.f32.mxu0 %vm1351_vm2, %v1301_v6  ;;  %1637 = vmatprep.mubr.f32.mxu1 %v3558_v7  ;;  %v3323_v18 = vpack.c.bf16 %v615_v15, %v613_v0  ;;  %v641_v0 = vld [vmem:[%s5303_s7 + $0x120] sm:$0xff]  ;;  %v643_v15 = vld [vmem:[%s5303_s7 + $0x130] sm:$0xff] }
 0x222   : > { %3320 = vmatpush1.bf16.msra.mxu1 %v3319_v13  ;;  %v637_v13 = vld [vmem:[%s5303_s7 + $0x100] sm:$0xff] }
 0x223   : > { %3322 = vmatprep.subr.bf16.mxu1 %v3321_v52  ;;  %v3347_v60 = vpack.c.bf16 %v639_v59, %v637_v13  ;;  %v670_v59 = vld [vmem:[%s5303_s7 + $0x208] sm:$0xff] }
 0x224   : > { %2874 = vmatmul.mubr.msk.f32.gmra.mrb[36].mxu1 %vm1351_vm2, %v1295_v32  ;;  %3066 = vmatmul.mubr.msk.f32.gmra.mrb[100].mxu0 %vm1351_vm2, %v1304_v51  ;;  %v618_v32 = vld [vmem:[%s5303_s7 + $0x68] sm:$0xff] }
 0x225   : > { %3068 = vmatprep.mubr.msk.f32.mxu0 %vm1351_vm2, %v1307_v9  ;;  %1643 = vmatprep.mubr.f32.mxu1 %v3558_v7 }
 0x226   : > { %3324 = vmatpush1.bf16.msra.mxu1 %v3323_v18  ;;  %v3351_v18 = vpack.c.bf16 %v643_v15, %v641_v0 }
 0x228   : > { %2875 = vmatmul.mubr.msk.f32.gmra.mrb[38].mxu1 %vm1351_vm2, %v1298_v11  ;;  %3069 = vmatmul.mubr.msk.f32.gmra.mrb[102].mxu0 %vm1351_vm2, %v1310_v53  ;;  %v3325_v11 = vpack.c.bf16 %v620_v35, %v618_v32  ;;  %v646_v32 = vld [vmem:[%s5303_s7 + $0x148] sm:$0xff]  ;;  %v645_v35 = vld [vmem:[%s5303_s7 + $0x140] sm:$0xff] }
 0x229   : > { %3071 = vmatprep.mubr.msk.f32.mxu0 %vm1351_vm2, %v1313_v14  ;;  %1649 = vmatprep.mubr.f32.mxu1 %v3558_v7 }
 0x22a   : > { %3326 = vmatprep.subr.bf16.mxu1 %v3325_v11  ;;  %v647_v11 = vld [vmem:[%s5303_s7 + $0x150] sm:$0xff] }
 0x22c   : > { %2876 = vmatmul.mubr.msk.f32.gmra.mrb[40].mxu1 %vm1351_vm2, %v1301_v6  ;;  %3072 = vmatmul.mubr.msk.f32.gmra.mrb[104].mxu0 %vm1351_vm2, %v1316_v41  ;;  %v619_v6 = vld [vmem:[%s5303_s7 + $0x70] sm:$0xff] }
 0x22d   : > { %3074 = vmatprep.mubr.msk.f32.mxu0 %vm1351_vm2, %v1319_v4  ;;  %1655 = vmatprep.mubr.f32.mxu1 %v3558_v7  ;;  %v3327_v30 = vpack.c.bf16 %v619_v6, %v617_v5  ;;  %v3355_v5 = vpack.c.bf16 %v647_v11, %v645_v35  ;;  %v650_v6 = vld [vmem:[%s5303_s7 + $0x168] sm:$0xff] }
 0x22f   : > { %3328 = vmatpush1.bf16.msra.mxu1 %v3327_v30  ;;  %v652_v30 = vld [vmem:[%s5303_s7 + $0x178] sm:$0xff] }
 0x230   : > { %2877 = vmatmul.mubr.msk.f32.gmra.mrb[42].mxu1 %vm1351_vm2, %v1304_v51  ;;  %3075 = vmatmul.mubr.msk.f32.gmra.mrb[106].mxu0 %vm1351_vm2, %v1322_v46  ;;  %v622_v51 = vld [vmem:[%s5303_s7 + $0x88] sm:$0xff] }
 0x231   : > { %3077 = vmatprep.mubr.msk.f32.mxu0 %vm1351_vm2, %v1325_v56  ;;  %1661 = vmatprep.mubr.f32.mxu1 %v3558_v7 }
 0x234   : > { %2878 = vmatmul.mubr.msk.f32.gmra.mrb[44].mxu1 %vm1351_vm2, %v1307_v9  ;;  %3078 = vmatmul.mubr.msk.f32.gmra.mrb[108].mxu0 %vm1351_vm2, %v1328_v1  ;;  %v3329_v9 = vpack.c.bf16 %v624_v8, %v622_v51  ;;  %v3357_v51 = vpack.c.bf16 %v652_v30, %v650_v6  ;;  %v649_v8 = vld [vmem:[%s5303_s7 + $0x160] sm:$0xff] }
 0x235   : > { %3080 = vmatprep.mubr.msk.f32.mxu0 %vm1351_vm2, %v1331_v45  ;;  %1667 = vmatprep.mubr.f32.mxu1 %v3558_v7 }
 0x236   : > { %3330 = vmatprep.subr.bf16.mxu1 %v3329_v9  ;;  %v651_v9 = vld [vmem:[%s5303_s7 + $0x170] sm:$0xff] }
 0x238   : > { %2879 = vmatmul.mubr.msk.f32.gmra.mrb[46].mxu1 %vm1351_vm2, %v1310_v53  ;;  %3081 = vmatmul.mubr.msk.f32.gmra.mrb[110].mxu0 %vm1351_vm2, %v1334_v26  ;;  %v623_v53 = vld [vmem:[%s5303_s7 + $0x90] sm:$0xff] }
 0x239   : > { %1673 = vmatprep.mubr.f32.mxu1 %v3558_v7  ;;  %v3331_v42 = vpack.c.bf16 %v623_v53, %v621_v10  ;;  %v3359_v10 = vpack.c.bf16 %v651_v9, %v649_v8  ;;  %v654_v53 = vld [vmem:[%s5303_s7 + $0x188] sm:$0xff] }
 0x23b   : > { %3332 = vmatpush1.bf16.msra.mxu1 %v3331_v42  ;;  %v656_v42 = vld [vmem:[%s5303_s7 + $0x198] sm:$0xff] }
 0x23c   : > { %2880 = vmatmul.mubr.msk.f32.gmra.mrb[48].mxu1 %vm1351_vm2, %v1313_v14  ;;  %v626_v14 = vld [vmem:[%s5303_s7 + $0xa8] sm:$0xff] }
 0x23d   : > { %1679 = vmatprep.mubr.f32.mxu1 %v3558_v7 }
 0x240   : > { %2881 = vmatmul.mubr.msk.f32.gmra.mrb[50].mxu1 %vm1351_vm2, %v1316_v41  ;;  %v3333_v41 = vpack.c.bf16 %v628_v23, %v626_v14  ;;  %v3361_v14 = vpack.c.bf16 %v656_v42, %v654_v53  ;;  %v653_v23 = vld [vmem:[%s5303_s7 + $0x180] sm:$0xff] }
 0x241   : > { %1685 = vmatprep.mubr.f32.mxu1 %v3558_v7 }
 0x242   : > { %3334 = vmatprep.subr.bf16.mxu1 %v3333_v41  ;;  %v655_v41 = vld [vmem:[%s5303_s7 + $0x190] sm:$0xff] }
 0x244   : > { %2882 = vmatmul.mubr.msk.f32.gmra.mrb[52].mxu1 %vm1351_vm2, %v1319_v4  ;;  %v625_v4 = vld [vmem:[%s5303_s7 + $0xa0] sm:$0xff] }
 0x245   : > { %1691 = vmatprep.mubr.f32.mxu1 %v3558_v7  ;;  %v3335_v21 = vpack.c.bf16 %v627_v17, %v625_v4  ;;  %v3363_v4 = vpack.c.bf16 %v655_v41, %v653_v23  ;;  %v658_v17 = vld [vmem:[%s5303_s7 + $0x1a8] sm:$0xff] }
 0x247   : > { %3336 = vmatpush1.bf16.msra.mxu1 %v3335_v21  ;;  %v660_v21 = vld [vmem:[%s5303_s7 + $0x1b8] sm:$0xff] }
 0x248   : > { %2883 = vmatmul.mubr.msk.f32.gmra.mrb[54].mxu1 %vm1351_vm2, %v1322_v46  ;;  %v632_v46 = vld [vmem:[%s5303_s7 + $0xd8] sm:$0xff] }
 0x249   : > { %1697 = vmatprep.mubr.f32.mxu1 %v3558_v7  ;;  %v3337_v22 = vpack.c.bf16 %v632_v46, %v630_v44  ;;  %v3365_v44 = vpack.c.bf16 %v660_v21, %v658_v17  ;;  %v657_v46 = vld [vmem:[%s5303_s7 + $0x1a0] sm:$0xff] }
 0x24b   : > { %3338 = vmatprep.subr.bf16.mxu1 %v3337_v22  ;;  %v659_v22 = vld [vmem:[%s5303_s7 + $0x1b0] sm:$0xff] }
 0x24c   : > { %2884 = vmatmul.mubr.msk.f32.gmra.mrb[56].mxu1 %vm1351_vm2, %v1325_v56  ;;  %v636_v56 = vld [vmem:[%s5303_s7 + $0xf8] sm:$0xff]  ;;  %v3367_v19 = vpack.c.bf16 %v659_v22, %v657_v46 }
 0x24d   : > { %1703 = vmatprep.mubr.f32.mxu1 %v3558_v7  ;;  %3340 = vmatpush1.bf16.msra.mxu1 %v3339_v25  ;;  %v3341_v27 = vpack.c.bf16 %v636_v56, %v634_v28  ;;  %v664_v25 = vld [vmem:[%s5303_s7 + $0x1d8] sm:$0xff]  ;;  %v661_v56 = vld [vmem:[%s5303_s7 + $0x1c0] sm:$0xff] }
 0x24e   : > { %v3369_v28 = vpack.c.bf16 %v664_v25, %v662_v24 }
 0x24f   : > { %3342 = vmatprep.subr.bf16.mxu1 %v3341_v27  ;;  %v663_v27 = vld [vmem:[%s5303_s7 + $0x1d0] sm:$0xff] }
 0x250   : > { %2885 = vmatmul.mubr.msk.f32.gmra.mrb[58].mxu1 %vm1351_vm2, %v1328_v1  ;;  %v640_v1 = vld [vmem:[%s5303_s7 + $0x118] sm:$0xff]  ;;  %v3371_v33 = vpack.c.bf16 %v663_v27, %v661_v56 }
 0x251   : > { %1709 = vmatprep.mubr.f32.mxu1 %v3558_v7  ;;  %3344 = vmatpush1.bf16.msra.mxu1 %v3343_v54  ;;  %v3345_v58 = vpack.c.bf16 %v640_v1, %v638_v20  ;;  %v668_v54 = vld [vmem:[%s5303_s7 + $0x1f8] sm:$0xff]  ;;  %v665_v1 = vld [vmem:[%s5303_s7 + $0x1e0] sm:$0xff] }
 0x252   : > { %v3373_v20 = vpack.c.bf16 %v668_v54, %v666_v39 }
 0x253   : > { %3346 = vmatprep.subr.bf16.mxu1 %v3345_v58  ;;  %v667_v58 = vld [vmem:[%s5303_s7 + $0x1f0] sm:$0xff] }
 0x254   : > { %2886 = vmatmul.mubr.msk.f32.gmra.mrb[60].mxu1 %vm1351_vm2, %v1331_v45  ;;  %v644_v45 = vld [vmem:[%s5303_s7 + $0x138] sm:$0xff]  ;;  %v3375_v13 = vpack.c.bf16 %v667_v58, %v665_v1 }
 0x255   : > { %1715 = vmatprep.mubr.f32.mxu1 %v3558_v7  ;;  %3348 = vmatpush1.bf16.msra.mxu1 %v3347_v60  ;;  %v3349_v52 = vpack.c.bf16 %v644_v45, %v642_v34  ;;  %v672_v60 = vld [vmem:[%s5303_s7 + $0x218] sm:$0xff] }
 0x256   : > { %v3377_v34 = vpack.c.bf16 %v672_v60, %v670_v59 }
 0x257   : > { %3350 = vmatprep.subr.bf16.mxu1 %v3349_v52 }
 0x258   : > { %2887 = vmatmul.mubr.msk.f32.gmra.mrb[62].mxu1 %vm1351_vm2, %v1334_v26  ;;  %v3353_v26 = vpack.c.bf16 %v648_v57, %v646_v32 }
 0x259   : > { %3352 = vmatpush1.bf16.msra.mxu1 %v3351_v18 }
 0x25a   : > { %3354 = vmatprep.subr.bf16.mxu1 %v3353_v26 }
 0x25d   : > { %3356 = vmatpush1.bf16.msra.mxu1 %v3355_v5 }
 0x25e   : > { %3358 = vmatprep.subr.bf16.mxu1 %v3357_v51 }
 0x261   : > { %3360 = vmatpush1.bf16.msra.mxu1 %v3359_v10 }
 0x262   : > { %3362 = vmatprep.subr.bf16.mxu1 %v3361_v14 }
 0x265   : > { %3364 = vmatpush1.bf16.msra.mxu1 %v3363_v4 }
 0x266   : > { %3366 = vmatprep.subr.bf16.mxu1 %v3365_v44 }
 0x269   : > { %3368 = vmatpush1.bf16.msra.mxu1 %v3367_v19 }
 0x26a   : > { %3370 = vmatprep.subr.bf16.mxu1 %v3369_v28 }
 0x26d   : > { %3372 = vmatpush1.bf16.msra.mxu1 %v3371_v33 }
 0x26e   : > { %3374 = vmatprep.subr.bf16.mxu1 %v3373_v20 }
 0x271   : > { %3376 = vmatpush1.bf16.msra.mxu1 %v3375_v13 }
 0x272   : > { %3378 = vmatprep.subr.bf16.mxu1 %v3377_v34 }
 0x2af   : > { %v2971_v45 = vpop.f32.mrb[64].mxu0 }
 0x2b0   : > { %v2972_v52 = vpop.f32.mrb[65].mxu0 }
 0x2b1   : > { %v2973_v0 = vadd.f32 %v2972_v52, %v2971_v45  ;;  %v604_v45 = vld [vmem:[%s5302_s6] sm:$0x7] }
 0x2b3   : > { %v2974_v15 = vpop.f32.mrb[66].mxu0 }
 0x2b4   : > { %v2975_v18 = vpop.f32.mrb[67].mxu0 }
 0x2b5   : > { %v2976_v32 = vadd.f32 %v2975_v18, %v2974_v15  ;;  %v4942_v18 = vrot.slane %v604_v45, %v927_v12 }
 0x2b7   : > { %v2977_v57 = vpop.f32.mrb[68].mxu0 }
 0x2b8   : > { %v2978_v26 = vpop.f32.mrb[69].mxu0 }
 0x2b9   : > { %v4913_v35 = vadd.f32 %v2978_v26, %v2977_v57  ;;  %v4945_v26 = vrot.slane %v604_v45, %v4080_v40 }
 0x2bb   : > { %v2980_v11 = vpop.f32.mrb[70].mxu0 }
 0x2bc   : > { %v2981_v5 = vpop.f32.mrb[71].mxu0 }
 0x2bd   : > { %v2982_v6 = vadd.f32 %v2981_v5, %v2980_v11  ;;  %v4950_v5 = vrot.slane %v604_v45, %v4086_v50 }
 0x2bf   : > { %v2983_v30 = vpop.f32.mrb[72].mxu0 }
 0x2c0   : > { %v2984_v51 = vpop.f32.mrb[73].mxu0 }
 0x2c1   : > { %v4915_v8 = vadd.f32 %v2984_v51, %v2983_v30  ;;  %v1794_v30 = vadd.f32 %v2976_v32, %v4942_v18 }
 0x2c3   : > { %v2986_v9 = vpop.f32.mrb[74].mxu0 }
 0x2c4   : > { %v2987_v10 = vpop.f32.mrb[75].mxu0 }
 0x2c5   : > { %v4917_v53 = vadd.f32 %v2987_v10, %v2986_v9  ;;  %v1789_v10 = vadd.f32 %v2973_v0, %v4942_v18  ;;  %v674_v0 = vld [vmem:[%s5303_s7 + $0x228] sm:$0xff] }
 0x2c7   : > { %v2989_v42 = vpop.f32.mrb[76].mxu0 }
 0x2c8   : > { %v2990_v14 = vpop.f32.mrb[77].mxu0 }
 0x2c9   : > { %v4919_v23 = vadd.f32 %v2990_v14, %v2989_v42 }
 0x2cb   : > { %v2992_v41 = vpop.f32.mrb[78].mxu0 }
 0x2cc   : > { %v2993_v4 = vpop.f32.mrb[79].mxu0 }
 0x2cd   : > { %v4921_v17 = vadd.f32 %v2993_v4, %v2992_v41  ;;  %v669_v41 = vld [vmem:[%s5303_s7 + $0x200] sm:$0xff]  ;;  %v671_v4 = vld [vmem:[%s5303_s7 + $0x210] sm:$0xff] }
 0x2cf   : > { %v2995_v21 = vpop.f32.mrb[80].mxu0 }
 0x2d0   : > { %v2996_v44 = vpop.f32.mrb[81].mxu0 }
 0x2d1   : > { %v4923_v46 = vadd.f32 %v2996_v44, %v2995_v21  ;;  %v676_v44 = vld [vmem:[%s5303_s7 + $0x238] sm:$0xff] }
 0x2d3   : > { %v2998_v22 = vpop.f32.mrb[82].mxu0 }
 0x2d4   : > { %v2999_v19 = vpop.f32.mrb[83].mxu0 }
 0x2d5   : > { %v4925_v24 = vadd.f32 %v2999_v19, %v2998_v22  ;;  %v1804_v22 = vadd.f32 %v2982_v6, %v4942_v18  ;;  %v678_v19 = vld [vmem:[%s5305_s9] sm:$0xff] }
 0x2d7   : > { %v3001_v25 = vpop.f32.mrb[84].mxu0 }
 0x2d8   : > { %v3002_v28 = vpop.f32.mrb[85].mxu0 }
 0x2d9   : > { %v4927_v56 = vadd.f32 %v3002_v28, %v3001_v25  ;;  %v679_v25 = vld [vmem:[%s5305_s9 + $0x8] sm:$0xff]  ;;  %v680_v28 = vld [vmem:[%s5305_s9 + $0x10] sm:$0xff] }
 0x2da   : > { %v3386_v6 = vpack.c.bf16 %v679_v25, %v678_v19 }
 0x2db   : > { %v3004_v27 = vpop.f32.mrb[86].mxu0 }
 0x2dc   : > { %v3005_v33 = vpop.f32.mrb[87].mxu0  ;;  %3387 = vmatpush1.bf16.msra.mxu0 %v3386_v6  ;;  %v685_v6 = vld [vmem:[%s5305_s9 + $0x38] sm:$0xff] }
 0x2dd   : > { %v4929_v39 = vadd.f32 %v3005_v33, %v3004_v27  ;;  %3388 = vmatprep.subr.bf16.mxu0 %v3559_v3 }
 0x2df   : > { %v3007_v54 = vpop.f32.mrb[88].mxu0 }
 0x2e0   : > { %v3008_v20 = vpop.f32.mrb[89].mxu0 }
 0x2e1   : > { %v4931_v1 = vadd.f32 %v3008_v20, %v3007_v54  ;;  %v1799_v20 = vadd.f32 %v4913_v35, %v4942_v18  ;;  %v675_v35 = vld [vmem:[%s5303_s7 + $0x230] sm:$0xff] }
 0x2e3   : > { %v3010_v58 = vpop.f32.mrb[90].mxu0 }
 0x2e4   : > { %v3011_v13 = vpop.f32.mrb[91].mxu0 }
 0x2e5   : > { %v4933_v59 = vadd.f32 %v3011_v13, %v3010_v58  ;;  %v3379_v58 = vpack.c.bf16 %v671_v4, %v669_v41  ;;  %v681_v13 = vld [vmem:[%s5305_s9 + $0x18] sm:$0xff]  ;;  %v683_v41 = vld [vmem:[%s5305_s9 + $0x28] sm:$0xff] }
 0x2e7   : > { %v3013_v60 = vpop.f32.mrb[92].mxu0 }
 0x2e8   : > { %v3014_v34 = vpop.f32.mrb[93].mxu0 }
 0x2e9   : > { %v4938_v52 = vadd.f32 %v3014_v34, %v3013_v60 }
 0x2eb   : > { %v3016_v15 = vpop.f32.mrb[94].mxu0 }
 0x2ec   : > { %v3017_v57 = vpop.f32.mrb[95].mxu0 }
 0x2ed   : > { %v4947_v11 = vadd.f32 %v3017_v57, %v3016_v15 }
 0x2ef   : > { %v1627_v51 = vpop.f32.mrb[32].mxu1  ;;  %v3061_v9 = vpop.f32.mrb[96].mxu0 }
 0x2f0   : > { %v3409_v42 = vadd.f32 %v1627_v51, %v4945_v26  ;;  %v4955_v31 = vadd.f32 %v3061_v9, %v1794_v30  ;;  %v1629_v12 = vpop.f32.mrb[33].mxu1  ;;  %v1933_v14 = vpop.f32.mrb[97].mxu0  ;;  %v3381_v30 = vpack.c.bf16 %v676_v44, %v674_v0  ;;  %v673_v51 = vld [vmem:[%s5303_s7 + $0x220] sm:$0xff]  ;;  %v1809_v44 = vadd.f32 %v4915_v8, %v4942_v18 }
 0x2f1   : > { %v3410_v32 = vadd.f32 %v1629_v12, %v4950_v5  ;;  %v4964_v21 = vadd.f32 %v1933_v14, %v1789_v10  ;;  %v1814_v12 = vadd.f32 %v4917_v53, %v4942_v18  ;;  %v682_v14 = vld [vmem:[%s5305_s9 + $0x20] sm:$0xff]  ;;  %v1824_v8 = vadd.f32 %v4921_v17, %v4942_v18 }
 0x2f2   : > { %v2012_v60 = vmax.f32 %v3409_v42, 0.0  ;;  %v3389_v42 = vpack.c.bf16 %v681_v13, %v680_v28 }
 0x2f3   : > { %v2013_v27 = vmax.f32 %v3410_v32, 0.0  ;;  %v1633_v33 = vpop.f32.mrb[34].mxu1  ;;  %v3064_v54 = vpop.f32.mrb[98].mxu0 }
 0x2f4   : > { %v3411_v34 = vadd.f32 %v1633_v33, %v4945_v26  ;;  %v4988_v45 = vadd.f32 %v3064_v54, %v1804_v22  ;;  %v1635_v15 = vpop.f32.mrb[35].mxu1  ;;  %v1943_v57 = vpop.f32.mrb[99].mxu0  ;;  %v3383_v22 = vpack.c.bf16 %v675_v35, %v673_v51  ;;  %3390 = vmatpush1.bf16.msra.mxu0 %v3389_v42 }
 0x2f5   : > { %v3412_v9 = vadd.f32 %v1635_v15, %v4950_v5  ;;  %v4997_v10 = vadd.f32 %v1943_v57, %v1799_v20  ;;  %2183 = vmatprep.mubr.f32.mxu1 %v2013_v27  ;;  %v3392_v20 = vpack.c.bf16 %v683_v41, %v682_v14  ;;  %3391 = vmatprep.subr.bf16.mxu0 %v3559_v3  ;;  %v687_v41 = vld [vmem:[%s5305_s9 + $0x48] sm:$0xff] }
 0x2f6   : > { %2184 = vmatmul.mubr.f32.vlgmr.msra.gmra.mrb[64].mxu1 %v2012_v60  ;;  %v2015_v19 = vmax.f32 %v3411_v34, 0.0  ;;  %v1819_v15 = vadd.f32 %v4919_v23, %v4942_v18  ;;  %v1834_v14 = vadd.f32 %v4925_v24, %v4942_v18  ;;  %v686_v23 = vld [vmem:[%s5305_s9 + $0x40] sm:$0xff] }
 0x2f7   : > { %v2016_v4 = vmax.f32 %v3412_v9, 0.0  ;;  %3380 = vmatpush1.bf16.msra.mxu1 %v3379_v58  ;;  %v1639_v32 = vpop.f32.mrb[36].mxu1  ;;  %v3067_v0 = vpop.f32.mrb[100].mxu0  ;;  %v684_v58 = vld [vmem:[%s5305_s9 + $0x30] sm:$0xff] }
 0x2f8   : > { %v3413_v53 = vadd.f32 %v1639_v32, %v4945_v26  ;;  %v5011_v25 = vadd.f32 %v3067_v0, %v1814_v12  ;;  %v1641_v28 = vpop.f32.mrb[37].mxu1  ;;  %v1953_v27 = vpop.f32.mrb[101].mxu0  ;;  %3382 = vmatprep.subr.bf16.mxu1 %v3381_v30  ;;  %3393 = vmatpush1.bf16.msra.mxu0 %v3392_v20  ;;  %v3395_v12 = vpack.c.bf16 %v685_v6, %v684_v58  ;;  %v689_v58 = vld [vmem:[%s5305_s9 + $0x58] sm:$0xff] }
 0x2f9   : > { %v3414_v33 = vadd.f32 %v1641_v28, %v4950_v5  ;;  %v5014_v54 = vadd.f32 %v1953_v27, %v1809_v44  ;;  %2189 = vmatprep.mubr.f32.mxu1 %v2016_v4  ;;  %3394 = vmatprep.subr.bf16.mxu0 %v3559_v3  ;;  %v1829_v44 = vadd.f32 %v4923_v46, %v4942_v18  ;;  %v688_v46 = vld [vmem:[%s5305_s9 + $0x50] sm:$0xff] }
 0x2fa   : > { %2190 = vmatmul.mubr.f32.gmra.mrb[66].mxu1 %v2015_v19  ;;  %v2018_v57 = vmax.f32 %v3413_v53, 0.0  ;;  %v3398_v20 = vpack.c.bf16 %v687_v41, %v686_v23  ;;  %v691_v23 = vld [vmem:[%s5305_s9 + $0x68] sm:$0xff] }
 0x2fb   : > { %v2019_v13 = vmax.f32 %v3414_v33, 0.0  ;;  %v1645_v60 = vpop.f32.mrb[38].mxu1  ;;  %v3070_v34 = vpop.f32.mrb[102].mxu0  ;;  %3384 = vmatpush1.bf16.msra.mxu1 %v3383_v22 }
 0x2fc   : > { %v3415_v17 = vadd.f32 %v1645_v60, %v4945_v26  ;;  %v5028_v30 = vadd.f32 %v3070_v34, %v1824_v8  ;;  %v1647_v51 = vpop.f32.mrb[39].mxu1  ;;  %v1963_v35 = vpop.f32.mrb[103].mxu0  ;;  %3396 = vmatpush1.bf16.msra.mxu0 %v3395_v12  ;;  %v1844_v8 = vadd.f32 %v4929_v39, %v4942_v18  ;;  %v1839_v34 = vadd.f32 %v4927_v56, %v4942_v18  ;;  %v690_v56 = vld [vmem:[%s5305_s9 + $0x60] sm:$0xff] }
 0x2fd   : > { %v3416_v9 = vadd.f32 %v1647_v51, %v4950_v5  ;;  %v5031_v42 = vadd.f32 %v1963_v35, %v1819_v15  ;;  %2195 = vmatprep.mubr.f32.mxu1 %v2019_v13  ;;  %3397 = vmatprep.subr.bf16.mxu0 %v3559_v3  ;;  %v3401_v12 = vpack.c.bf16 %v689_v58, %v688_v46  ;;  %v693_v46 = vld [vmem:[%s5305_s9 + $0x78] sm:$0xff] }
 0x2fe   : > { %2196 = vmatmul.mubr.f32.gmra.mrb[68].mxu1 %v2018_v57  ;;  %v2021_v22 = vmax.f32 %v3415_v17, 0.0 }
 0x2ff   : > { %v2022_v4 = vmax.f32 %v3416_v9, 0.0  ;;  %v1651_v32 = vpop.f32.mrb[40].mxu1  ;;  %v3073_v0 = vpop.f32.mrb[104].mxu0 }
 0x300   : > { %v3417_v19 = vadd.f32 %v1651_v32, %v4945_v26  ;;  %v5045_v24 = vadd.f32 %v3073_v0, %v1834_v14  ;;  %v1653_v53 = vpop.f32.mrb[41].mxu1  ;;  %v1973_v28 = vpop.f32.mrb[105].mxu0  ;;  %3399 = vmatpush1.bf16.msra.mxu0 %v3398_v20  ;;  %v1854_v14 = vadd.f32 %v4933_v59, %v4942_v18  ;;  %v1849_v0 = vadd.f32 %v4931_v1, %v4942_v18  ;;  %v692_v1 = vld [vmem:[%s5305_s9 + $0x70] sm:$0xff] }
 0x301   : > { %v3418_v27 = vadd.f32 %v1653_v53, %v4950_v5  ;;  %v5048_v33 = vadd.f32 %v1973_v28, %v1829_v44  ;;  %2201 = vmatprep.mubr.f32.mxu1 %v2022_v4  ;;  %3400 = vmatprep.subr.bf16.mxu0 %v3559_v3  ;;  %v3404_v20 = vpack.c.bf16 %v691_v23, %v690_v56 }
 0x302   : > { %2202 = vmatmul.mubr.f32.gmra.mrb[70].mxu1 %v2021_v22  ;;  %v2024_v15 = vmax.f32 %v3417_v19, 0.0 }
 0x303   : > { %v2025_v6 = vmax.f32 %v3418_v27, 0.0  ;;  %v1657_v13 = vpop.f32.mrb[42].mxu1  ;;  %v3076_v60 = vpop.f32.mrb[106].mxu0 }
 0x304   : > { %v3419_v57 = vadd.f32 %v1657_v13, %v4945_v26  ;;  %v5062_v39 = vadd.f32 %v3076_v60, %v1844_v8  ;;  %v1659_v17 = vpop.f32.mrb[43].mxu1  ;;  %v1983_v51 = vpop.f32.mrb[107].mxu0  ;;  %3402 = vmatpush1.bf16.msra.mxu0 %v3401_v12  ;;  %v1864_v8 = vadd.f32 %v4947_v11, %v4942_v18  ;;  %v1859_v60 = vadd.f32 %v4938_v52, %v4942_v18 }
 0x305   : > { %v3420_v35 = vadd.f32 %v1659_v17, %v4950_v5  ;;  %v5065_v9 = vadd.f32 %v1983_v51, %v1839_v34  ;;  %2207 = vmatprep.mubr.f32.mxu1 %v2025_v6  ;;  %3403 = vmatprep.subr.bf16.mxu0 %v3559_v3  ;;  %v3407_v12 = vpack.c.bf16 %v693_v46, %v692_v1 }
 0x306   : > { %2208 = vmatmul.mubr.f32.gmra.mrb[72].mxu1 %v2024_v15  ;;  %v2027_v44 = vmax.f32 %v3419_v57, 0.0 }
 0x307   : > { %v2028_v41 = vmax.f32 %v3420_v35, 0.0  ;;  %v1663_v4 = vpop.f32.mrb[44].mxu1  ;;  %v3079_v32 = vpop.f32.mrb[108].mxu0 }
 0x308   : > { %v3421_v22 = vadd.f32 %v1663_v4, %v4945_v26  ;;  %v5079_v59 = vadd.f32 %v3079_v32, %v1854_v14  ;;  %v1665_v19 = vpop.f32.mrb[45].mxu1  ;;  %v1993_v53 = vpop.f32.mrb[109].mxu0  ;;  %3405 = vmatpush1.bf16.msra.mxu0 %v3404_v20 }
 0x309   : > { %v3422_v28 = vadd.f32 %v1665_v19, %v4950_v5  ;;  %v5082_v27 = vadd.f32 %v1993_v53, %v1849_v0  ;;  %2213 = vmatprep.mubr.f32.mxu1 %v2028_v41  ;;  %3406 = vmatprep.subr.bf16.mxu0 %v3559_v3 }
 0x30a   : > { %2214 = vmatmul.mubr.f32.gmra.mrb[74].mxu1 %v2027_v44  ;;  %v2030_v34 = vmax.f32 %v3421_v22, 0.0 }
 0x30b   : > { %v2031_v58 = vmax.f32 %v3422_v28, 0.0  ;;  %v1669_v6 = vpop.f32.mrb[46].mxu1  ;;  %v3082_v13 = vpop.f32.mrb[110].mxu0 }
 0x30c   : > { %v3423_v15 = vadd.f32 %v1669_v6, %v4945_v26  ;;  %v5096_v11 = vadd.f32 %v3082_v13, %v1864_v8  ;;  %v1671_v57 = vpop.f32.mrb[47].mxu1  ;;  %v2003_v17 = vpop.f32.mrb[111].mxu0  ;;  %3408 = vmatpush1.bf16.msra.mxu0 %v3407_v12 }
 0x30d   : > { %v3424_v51 = vadd.f32 %v1671_v57, %v4950_v5  ;;  %v5099_v35 = vadd.f32 %v2003_v17, %v1859_v60  ;;  %2219 = vmatprep.mubr.f32.mxu1 %v2031_v58  ;;  %2597 = vmatprep.subr.mxu0 %v3558_v7 }
 0x30e   : > { %2220 = vmatmul.mubr.f32.gmra.mrb[76].mxu1 %v2030_v34  ;;  %v2033_v52 = vmax.f32 %v3423_v15, 0.0 }
 0x30f   : > { %v2034_v14 = vmax.f32 %v3424_v51, 0.0  ;;  %v1675_v56 = vpop.f32.mrb[48].mxu1 }
 0x310   : > { %v3425_v18 = vadd.f32 %v1675_v56, %v4945_v26  ;;  %v1677_v23 = vpop.f32.mrb[49].mxu1 }
 0x311   : > { %v3426_v41 = vadd.f32 %v1677_v23, %v4950_v5  ;;  %2225 = vmatprep.mubr.f32.mxu1 %v2034_v14 }
 0x312   : > { %2226 = vmatmul.mubr.f32.gmra.mrb[78].mxu1 %v2033_v52  ;;  %v2036_v0 = vmax.f32 %v3425_v18, 0.0 }
 0x313   : > { %v2037_v4 = vmax.f32 %v3426_v41, 0.0  ;;  %v1681_v32 = vpop.f32.mrb[50].mxu1 }
 0x314   : > { %v3427_v44 = vadd.f32 %v1681_v32, %v4945_v26  ;;  %v1683_v22 = vpop.f32.mrb[51].mxu1 }
 0x315   : > { %v3428_v3 = vadd.f32 %v1683_v22, %v4950_v5  ;;  %2231 = vmatprep.mubr.f32.mxu1 %v2037_v4 }
 0x316   : > { %2232 = vmatmul.mubr.f32.gmra.mrb[80].mxu1 %v2036_v0  ;;  %v2039_v28 = vmax.f32 %v3427_v44, 0.0 }
 0x317   : > { %v2040_v19 = vmax.f32 %v3428_v3, 0.0  ;;  %v1687_v53 = vpop.f32.mrb[52].mxu1 }
 0x318   : > { %v3429_v20 = vadd.f32 %v1687_v53, %v4945_v26  ;;  %v1689_v8 = vpop.f32.mrb[53].mxu1 }
 0x319   : > { %v3430_v1 = vadd.f32 %v1689_v8, %v4950_v5  ;;  %2237 = vmatprep.mubr.f32.mxu1 %v2040_v19 }
 0x31a   : > { %2238 = vmatmul.mubr.f32.gmra.mrb[82].mxu1 %v2039_v28  ;;  %v2042_v6 = vmax.f32 %v3429_v20, 0.0 }
 0x31b   : > { %v2043_v46 = vmax.f32 %v3430_v1, 0.0  ;;  %v1693_v58 = vpop.f32.mrb[54].mxu1 }
 0x31c   : > { %v3431_v13 = vadd.f32 %v1693_v58, %v4945_v26  ;;  %v1695_v60 = vpop.f32.mrb[55].mxu1 }
 0x31d   : > { %v3432_v34 = vadd.f32 %v1695_v60, %v4950_v5  ;;  %2243 = vmatprep.mubr.f32.mxu1 %v2043_v46  ;;  %v2017_v60 = vmax.f32 %v4955_v31, 0.0  ;;  %v2029_v31 = vmax.f32 %v5011_v25, 0.0  ;;  %v2041_v25 = vmax.f32 %v5045_v24, 0.0 }
 0x31e   : > { %2244 = vmatmul.mubr.f32.gmra.mrb[84].mxu1 %v2042_v6  ;;  %v2045_v17 = vmax.f32 %v3431_v13, 0.0  ;;  %v2014_v13 = vmax.f32 %v4964_v21, 0.0  ;;  %v2026_v21 = vmax.f32 %v5014_v54, 0.0  ;;  %v2038_v54 = vmax.f32 %v5048_v33, 0.0 }
 0x31f   : > { %v2046_v15 = vmax.f32 %v3432_v34, 0.0  ;;  %v1699_v57 = vpop.f32.mrb[56].mxu1  ;;  %v2050_v33 = vmax.f32 %v5082_v27, 0.0  ;;  %v2053_v24 = vmax.f32 %v5079_v59, 0.0  ;;  %v694_v27 = vld [vmem:[%s5305_s9 + $0x80] sm:$0xff] }
 0x320   : > { %v3433_v51 = vadd.f32 %v1699_v57, %v4945_v26  ;;  %v1701_v12 = vpop.f32.mrb[57].mxu1  ;;  %2598 = vmatpush1.msra.mxu0 %v694_v27  ;;  %v677_v59 = vld [vmem:[%s5304_s8] sm:$0x3] }
 0x321   : > { %v3434_v14 = vadd.f32 %v1701_v12, %v4950_v5  ;;  %2249 = vmatprep.mubr.f32.mxu1 %v2046_v15  ;;  %v5174_v34 = vrot.slane %v677_v59, %v4080_v40 }
 0x322   : > { %2250 = vmatmul.mubr.f32.gmra.mrb[86].mxu1 %v2045_v17  ;;  %v2048_v18 = vmax.f32 %v3433_v51, 0.0 }
 0x323   : > { %v2049_v56 = vmax.f32 %v3434_v14, 0.0  ;;  %v1705_v52 = vpop.f32.mrb[58].mxu1 }
 0x324   : > { %v3435_v23 = vadd.f32 %v1705_v52, %v4945_v26  ;;  %v1707_v41 = vpop.f32.mrb[59].mxu1 }
 0x325   : > { %v3436_v4 = vadd.f32 %v1707_v41, %v4950_v5  ;;  %2255 = vmatprep.mubr.f32.mxu1 %v2049_v56 }
 0x326   : > { %2256 = vmatmul.mubr.f32.gmra.mrb[88].mxu1 %v2048_v18  ;;  %v2051_v44 = vmax.f32 %v3435_v23, 0.0 }
 0x327   : > { %v2052_v32 = vmax.f32 %v3436_v4, 0.0  ;;  %v1711_v0 = vpop.f32.mrb[60].mxu1 }
 0x328   : > { %v3437_v22 = vadd.f32 %v1711_v0, %v4945_v26  ;;  %v1713_v3 = vpop.f32.mrb[61].mxu1 }
 0x329   : > { %v3438_v19 = vadd.f32 %v1713_v3, %v4950_v5  ;;  %2261 = vmatprep.mubr.f32.mxu1 %v2052_v32 }
 0x32a   : > { %2262 = vmatmul.mubr.f32.gmra.mrb[90].mxu1 %v2051_v44  ;;  %v2054_v20 = vmax.f32 %v3437_v22, 0.0 }
 0x32b   : > { %v2055_v53 = vmax.f32 %v3438_v19, 0.0  ;;  %v1717_v28 = vpop.f32.mrb[62].mxu1 }
 0x32c   : > { %v3439_v8 = vadd.f32 %v1717_v28, %v4945_v26  ;;  %v1719_v1 = vpop.f32.mrb[63].mxu1  ;;  %v2020_v26 = vmax.f32 %v4997_v10, 0.0  ;;  %v2032_v10 = vmax.f32 %v5031_v42, 0.0  ;;  %v2044_v42 = vmax.f32 %v5065_v9, 0.0 }
 0x32d   : > { %v3440_v46 = vadd.f32 %v1719_v1, %v4950_v5  ;;  %2267 = vmatprep.mubr.f32.mxu1 %v2055_v53  ;;  %v2023_v5 = vmax.f32 %v4988_v45, 0.0  ;;  %v2035_v45 = vmax.f32 %v5028_v30, 0.0  ;;  %v2047_v30 = vmax.f32 %v5062_v39, 0.0 }
 0x32e   : > { %2268 = vmatmul.mubr.f32.gmra.mrb[92].mxu1 %v2054_v20  ;;  %v2057_v6 = vmax.f32 %v3439_v8, 0.0  ;;  %v2056_v9 = vmax.f32 %v5099_v35, 0.0  ;;  %v2059_v39 = vmax.f32 %v5096_v11, 0.0  ;;  %v5177_v35 = vrot.slane %v677_v59, %v4086_v50 }
 0x32f   : > { %v2058_v58 = vmax.f32 %v3440_v46, 0.0 }
 0x331   : > { %2273 = vmatprep.mubr.f32.mxu1 %v2058_v58 }
 0x332   : > { %2274 = vmatmul.mubr.f32.gmra.mrb[94].mxu1 %v2057_v6 }
 0x333   : > { %2344 = vmatprep.mubr.f32.mxu1 %v3558_v7 }
 0x336   : > { %2904 = vmatmul.mubr.msk.f32.vlgmr.msra.gmra.mrb[64].mxu1 %vm932_vm1, %v2014_v13 }
 0x337   : > { %2350 = vmatprep.mubr.f32.mxu1 %v3558_v7 }
 0x33a   : > { %2905 = vmatmul.mubr.msk.f32.gmra.mrb[66].mxu1 %vm932_vm1, %v2017_v60 }
 0x33b   : > { %2356 = vmatprep.mubr.f32.mxu1 %v3558_v7 }
 0x33e   : > { %2906 = vmatmul.mubr.msk.f32.gmra.mrb[68].mxu1 %vm932_vm1, %v2020_v26 }
 0x33f   : > { %2362 = vmatprep.mubr.f32.mxu1 %v3558_v7 }
 0x342   : > { %2907 = vmatmul.mubr.msk.f32.gmra.mrb[70].mxu1 %vm932_vm1, %v2023_v5 }
 0x343   : > { %2368 = vmatprep.mubr.f32.mxu1 %v3558_v7 }
 0x346   : > { %2908 = vmatmul.mubr.msk.f32.gmra.mrb[72].mxu1 %vm932_vm1, %v2026_v21 }
 0x347   : > { %2374 = vmatprep.mubr.f32.mxu1 %v3558_v7 }
 0x34a   : > { %2909 = vmatmul.mubr.msk.f32.gmra.mrb[74].mxu1 %vm932_vm1, %v2029_v31 }
 0x34b   : > { %2380 = vmatprep.mubr.f32.mxu1 %v3558_v7 }
 0x34e   : > { %2910 = vmatmul.mubr.msk.f32.gmra.mrb[76].mxu1 %vm932_vm1, %v2032_v10 }
 0x34f   : > { %2386 = vmatprep.mubr.f32.mxu1 %v3558_v7 }
 0x352   : > { %2911 = vmatmul.mubr.msk.f32.gmra.mrb[78].mxu1 %vm932_vm1, %v2035_v45 }
 0x353   : > { %2392 = vmatprep.mubr.f32.mxu1 %v3558_v7 }
 0x356   : > { %2912 = vmatmul.mubr.msk.f32.gmra.mrb[80].mxu1 %vm932_vm1, %v2038_v54 }
 0x357   : > { %2398 = vmatprep.mubr.f32.mxu1 %v3558_v7 }
 0x35a   : > { %2913 = vmatmul.mubr.msk.f32.gmra.mrb[82].mxu1 %vm932_vm1, %v2041_v25 }
 0x35b   : > { %2404 = vmatprep.mubr.f32.mxu1 %v3558_v7 }
 0x35e   : > { %2914 = vmatmul.mubr.msk.f32.gmra.mrb[84].mxu1 %vm932_vm1, %v2044_v42 }
 0x35f   : > { %2410 = vmatprep.mubr.f32.mxu1 %v3558_v7 }
 0x362   : > { %2915 = vmatmul.mubr.msk.f32.gmra.mrb[86].mxu1 %vm932_vm1, %v2047_v30 }
 0x363   : > { %2416 = vmatprep.mubr.f32.mxu1 %v3558_v7 }
 0x366   : > { %2916 = vmatmul.mubr.msk.f32.gmra.mrb[88].mxu1 %vm932_vm1, %v2050_v33 }
 0x367   : > { %2422 = vmatprep.mubr.f32.mxu1 %v3558_v7 }
 0x36a   : > { %2917 = vmatmul.mubr.msk.f32.gmra.mrb[90].mxu1 %vm932_vm1, %v2053_v24 }
 0x36b   : > { %2428 = vmatprep.mubr.f32.mxu1 %v3558_v7 }
 0x36e   : > { %2918 = vmatmul.mubr.msk.f32.gmra.mrb[92].mxu1 %vm932_vm1, %v2056_v9 }
 0x36f   : > { %2434 = vmatprep.mubr.f32.mxu1 %v3558_v7 }
 0x372   : > { %2919 = vmatmul.mubr.msk.f32.gmra.mrb[94].mxu1 %vm932_vm1, %v2059_v39 }
 0x409   : > { %v2346_v7 = vpop.f32.mrb[64].mxu1 }
 0x40a   : > { %v3441_v11 = vadd.f32 %v2346_v7, %v5174_v34  ;;  %v2348_v15 = vpop.f32.mrb[65].mxu1 }
 0x40b   : > { %v3442_v57 = vadd.f32 %v2348_v15, %v5177_v35 }
 0x40c   : > { %v2446_v17 = vmax.f32 %v3441_v11, 0.0 }
 0x40d   : > { %v2352_v51 = vpop.f32.mrb[66].mxu1  ;;  %2921 = vmatprep.mubr.msk.f32.mxu0 %vm2516_vm3, %v3442_v57 }
 0x40e   : > { %v3443_v12 = vadd.f32 %v2352_v51, %v5174_v34  ;;  %v2354_v14 = vpop.f32.mrb[67].mxu1  ;;  %2630 = vmatmul.mubr.f32.vlgmr.msra.gmra.mrb[112].mxu0 %v2446_v17 }
 0x40f   : > { %v3444_v40 = vadd.f32 %v2354_v14, %v5177_v35 }
 0x410   : > { %v2448_v56 = vmax.f32 %v3443_v12, 0.0 }
 0x411   : > { %v2358_v50 = vpop.f32.mrb[68].mxu1  ;;  %2922 = vmatprep.mubr.msk.f32.mxu0 %vm2516_vm3, %v3444_v40 }
 0x412   : > { %v3445_v52 = vadd.f32 %v2358_v50, %v5174_v34  ;;  %v2360_v18 = vpop.f32.mrb[69].mxu1  ;;  %2635 = vmatmul.mubr.f32.gmra.mrb[114].mxu0 %v2448_v56 }
 0x413   : > { %v3446_v23 = vadd.f32 %v2360_v18, %v5177_v35 }
 0x414   : > { %v2450_v41 = vmax.f32 %v3445_v52, 0.0 }
 0x415   : > { %v2364_v4 = vpop.f32.mrb[70].mxu1  ;;  %2923 = vmatprep.mubr.msk.f32.mxu0 %vm2516_vm3, %v3446_v23 }
 0x416   : > { %v3447_v32 = vadd.f32 %v2364_v4, %v5174_v34  ;;  %v2366_v0 = vpop.f32.mrb[71].mxu1  ;;  %2640 = vmatmul.mubr.f32.gmra.mrb[116].mxu0 %v2450_v41 }
 0x417   : > { %v3448_v44 = vadd.f32 %v2366_v0, %v5177_v35 }
 0x418   : > { %v2452_v22 = vmax.f32 %v3447_v32, 0.0 }
 0x419   : > { %v2370_v3 = vpop.f32.mrb[72].mxu1  ;;  %2924 = vmatprep.mubr.msk.f32.mxu0 %vm2516_vm3, %v3448_v44 }
 0x41a   : > { %v3449_v19 = vadd.f32 %v2370_v3, %v5174_v34  ;;  %v2372_v53 = vpop.f32.mrb[73].mxu1  ;;  %2645 = vmatmul.mubr.f32.gmra.mrb[118].mxu0 %v2452_v22 }
 0x41b   : > { %v3450_v28 = vadd.f32 %v2372_v53, %v5177_v35 }
 0x41c   : > { %v2454_v20 = vmax.f32 %v3449_v19, 0.0 }
 0x41d   : > { %v2376_v8 = vpop.f32.mrb[74].mxu1  ;;  %2925 = vmatprep.mubr.msk.f32.mxu0 %vm2516_vm3, %v3450_v28 }
 0x41e   : > { %v3451_v1 = vadd.f32 %v2376_v8, %v5174_v34  ;;  %v2378_v46 = vpop.f32.mrb[75].mxu1  ;;  %2650 = vmatmul.mubr.f32.gmra.mrb[120].mxu0 %v2454_v20 }
 0x41f   : > { %v3452_v58 = vadd.f32 %v2378_v46, %v5177_v35 }
 0x420   : > { %v2456_v6 = vmax.f32 %v3451_v1, 0.0 }
 0x421   : > { %v2382_v13 = vpop.f32.mrb[76].mxu1  ;;  %2926 = vmatprep.mubr.msk.f32.mxu0 %vm2516_vm3, %v3452_v58 }
 0x422   : > { %v3453_v60 = vadd.f32 %v2382_v13, %v5174_v34  ;;  %v2384_v26 = vpop.f32.mrb[77].mxu1  ;;  %2655 = vmatmul.mubr.f32.gmra.mrb[122].mxu0 %v2456_v6 }
 0x423   : > { %v3454_v5 = vadd.f32 %v2384_v26, %v5177_v35  ;;  %v5230_v26 = vld [vmem:[%s5306_s10] ss:$0 sm:$0xff] }
 0x424   : > { %v2458_v21 = vmax.f32 %v3453_v60, 0.0 }
 0x425   : > { %v2388_v31 = vpop.f32.mrb[78].mxu1  ;;  %2927 = vmatprep.mubr.msk.f32.mxu0 %vm2516_vm3, %v3454_v5  ;;  %v2727_v5 = vmul.f32 0.1, %v3703_v29 }
 0x426   : > { %v3455_v10 = vadd.f32 %v2388_v31, %v5174_v34  ;;  %v2390_v45 = vpop.f32.mrb[79].mxu1  ;;  %2660 = vmatmul.mubr.f32.gmra.mrb[124].mxu0 %v2458_v21 }
 0x427   : > { %v3456_v54 = vadd.f32 %v2390_v45, %v5177_v35 }
 0x428   : > { %v2460_v25 = vmax.f32 %v3455_v10, 0.0 }
 0x429   : > { %v2394_v42 = vpop.f32.mrb[80].mxu1  ;;  %2928 = vmatprep.mubr.msk.f32.mxu0 %vm2516_vm3, %v3456_v54 }
 0x42a   : > { %v3457_v30 = vadd.f32 %v2394_v42, %v5174_v34  ;;  %v2396_v33 = vpop.f32.mrb[81].mxu1  ;;  %2665 = vmatmul.mubr.f32.gmra.mrb[126].mxu0 %v2460_v25  ;;  %v2729_v25 = vmul.f32 0.1, %v3728_v37 }
 0x42b   : > { %v3458_v24 = vadd.f32 %v2396_v33, %v5177_v35 }
 0x42c   : > { %v2462_v9 = vmax.f32 %v3457_v30, 0.0 }
 0x42d   : > { %v2400_v39 = vpop.f32.mrb[82].mxu1  ;;  %2929 = vmatprep.mubr.msk.f32.mxu0 %vm2516_vm3, %v3458_v24 }
 0x42e   : > { %v3459_v27 = vadd.f32 %v2400_v39, %v5174_v34  ;;  %v2402_v59 = vpop.f32.mrb[83].mxu1  ;;  %2670 = vmatmul.mubr.f32.gmra.mrb[128].mxu0 %v2462_v9  ;;  %v2730_v9 = vmul.f32 0.1, %v3733_v38 }
 0x42f   : > { %v3460_v7 = vadd.f32 %v2402_v59, %v5177_v35 }
 0x430   : > { %v2464_v11 = vmax.f32 %v3459_v27, 0.0 }
 0x431   : > { %v2406_v15 = vpop.f32.mrb[84].mxu1  ;;  %2930 = vmatprep.mubr.msk.f32.mxu0 %vm2516_vm3, %v3460_v7  ;;  %v2731_v7 = vmul.f32 0.1, %v3747_v43 }
 0x432   : > { %v3461_v57 = vadd.f32 %v2406_v15, %v5174_v34  ;;  %v2408_v17 = vpop.f32.mrb[85].mxu1  ;;  %2675 = vmatmul.mubr.f32.gmra.mrb[130].mxu0 %v2464_v11 }
 0x433   : > { %v3462_v51 = vadd.f32 %v2408_v17, %v5177_v35  ;;  %v2732_v17 = vmul.f32 0.1, %v3761_v47 }
 0x434   : > { %v2466_v12 = vmax.f32 %v3461_v57, 0.0 }
 0x435   : > { %v2412_v14 = vpop.f32.mrb[86].mxu1  ;;  %2931 = vmatprep.mubr.msk.f32.mxu0 %vm2516_vm3, %v3462_v51 }
 0x436   : > { %v3463_v40 = vadd.f32 %v2412_v14, %v5174_v34  ;;  %v2414_v56 = vpop.f32.mrb[87].mxu1  ;;  %2680 = vmatmul.mubr.f32.gmra.mrb[132].mxu0 %v2466_v12 }
 0x437   : > { %v3464_v50 = vadd.f32 %v2414_v56, %v5177_v35 }
 0x438   : > { %v2468_v52 = vmax.f32 %v3463_v40, 0.0  ;;  %v2733_v40 = vmul.f32 0.1, %v3766_v48 }
 0x439   : > { %v2418_v18 = vpop.f32.mrb[88].mxu1  ;;  %2932 = vmatprep.mubr.msk.f32.mxu0 %vm2516_vm3, %v3464_v50 }
 0x43a   : > { %v3465_v23 = vadd.f32 %v2418_v18, %v5174_v34  ;;  %v2420_v41 = vpop.f32.mrb[89].mxu1  ;;  %2685 = vmatmul.mubr.f32.gmra.mrb[134].mxu0 %v2468_v52  ;;  %v2734_v18 = vmul.f32 0.1, %v3771_v49 }
 0x43b   : > { %v3466_v4 = vadd.f32 %v2420_v41, %v5177_v35 }
 0x43c   : > { %v2470_v32 = vmax.f32 %v3465_v23, 0.0 }
 0x43d   : > { %v2424_v0 = vpop.f32.mrb[90].mxu1  ;;  %2933 = vmatprep.mubr.msk.f32.mxu0 %vm2516_vm3, %v3466_v4 }
 0x43e   : > { %v3467_v44 = vadd.f32 %v2424_v0, %v5174_v34  ;;  %v2426_v22 = vpop.f32.mrb[91].mxu1  ;;  %2690 = vmatmul.mubr.f32.gmra.mrb[136].mxu0 %v2470_v32  ;;  %v2735_v32 = vmul.f32 0.1, %v3785_v55 }
 0x43f   : > { %v3468_v3 = vadd.f32 %v2426_v22, %v5177_v35 }
 0x440   : > { %v2472_v19 = vmax.f32 %v3467_v44, 0.0 }
 0x441   : > { %v2430_v53 = vpop.f32.mrb[92].mxu1  ;;  %2934 = vmatprep.mubr.msk.f32.mxu0 %vm2516_vm3, %v3468_v3  ;;  %v2736_v3 = vmul.f32 0.1, %v3805_v61 }
 0x442   : > { %v3469_v28 = vadd.f32 %v2430_v53, %v5174_v34  ;;  %v2432_v20 = vpop.f32.mrb[93].mxu1  ;;  %2695 = vmatmul.mubr.f32.gmra.mrb[138].mxu0 %v2472_v19 }
 0x443   : > { %v3470_v8 = vadd.f32 %v2432_v20, %v5177_v35  ;;  %v2737_v20 = vmul.f32 0.1, %v3810_v62 }
 0x444   : > { %v2474_v1 = vmax.f32 %v3469_v28, 0.0 }
 0x445   : > { %v2436_v46 = vpop.f32.mrb[94].mxu1  ;;  %2935 = vmatprep.mubr.msk.f32.mxu0 %vm2516_vm3, %v3470_v8 }
 0x446   : > { %v3471_v58 = vadd.f32 %v2436_v46, %v5174_v34  ;;  %v2438_v6 = vpop.f32.mrb[95].mxu1  ;;  %2700 = vmatmul.mubr.f32.gmra.mrb[140].mxu0 %v2474_v1  ;;  %v2728_v34 = vmul.f32 0.1, %v3723_v36 }
 0x447   : > { %v3472_v13 = vadd.f32 %v2438_v6, %v5177_v35 }
 0x448   : > { %v2476_v60 = vmax.f32 %v3471_v58, 0.0  ;;  %v2738_v58 = vmul.f32 0.1, %v3815_v63 }
 0x449   : > { %2936 = vmatprep.mubr.msk.f32.mxu0 %vm2516_vm3, %v3472_v13 }
 0x44a   : > { %2705 = vmatmul.mubr.f32.gmra.mrb[142].mxu0 %v2476_v60 }
 0x4e1   : > { %v2631_v21 = vpop.f32.mrb[112].mxu0 }
 0x4e2   : > { %v2632_v31 = vadd.f32 %v5230_v26, %v2631_v21  ;;  %v2633_v10 = vpop.f32.mrb[113].mxu0  ;;  %v3547_v21 = vld [vmem:[%s3682_s15 + $0x68] sm:$0xff] }
 0x4e4   : > { %v2743_v35 = vsub.f32 %v2632_v31, %v2727_v5  ;;  %v2739_v5 = vmul.f32 0.1, %v3823_v2  ;;  %v2724_v31 = vsel %vm2710_vm0, %v3547_v21, 0.0 }
 0x4e5   : > { %v2636_v45 = vpop.f32.mrb[114].mxu0 }
 0x4e6   : > { %2759 = vst [vmem:[%s5239_s18] sm:$0xff] %v2743_v35  ;;  %v2637_v29 = vadd.f32 %v5230_v26, %v2636_v45  ;;  %v2638_v54 = vpop.f32.mrb[115].mxu0  ;;  %v2740_v35 = vmul.f32 0.1, %v2724_v31 }
 0x4e8   : > { %v2744_v42 = vsub.f32 %v2637_v29, %v2728_v34  ;;  %v3548_v29 = vld [vmem:[%s3682_s15 + $0x70] sm:$0xff] }
 0x4e9   : > { %v2641_v30 = vpop.f32.mrb[116].mxu0  ;;  %v2725_v54 = vsel %vm2710_vm0, %v3548_v29, 0.0 }
 0x4ea   : > { %2760 = vst [vmem:[%s5239_s18 + $0x8] sm:$0xff] %v2744_v42  ;;  %v2642_v33 = vadd.f32 %v5230_v26, %v2641_v30  ;;  %v2643_v24 = vpop.f32.mrb[117].mxu0  ;;  %v2741_v30 = vmul.f32 0.1, %v2725_v54 }
 0x4eb   : > { %v3549_v24 = vld [vmem:[%s3682_s15 + $0x78] sm:$0xff] }
 0x4ec   : > { %v2745_v39 = vsub.f32 %v2642_v33, %v2729_v25 }
 0x4ed   : > { %v2646_v36 = vpop.f32.mrb[118].mxu0 }
 0x4ee   : > { %2761 = vst [vmem:[%s5239_s18 + $0x10] sm:$0xff] %v2745_v39  ;;  %v2647_v27 = vadd.f32 %v5230_v26, %v2646_v36  ;;  %v2648_v59 = vpop.f32.mrb[119].mxu0 }
 0x4f0   : > { %v2746_v11 = vsub.f32 %v2647_v27, %v2730_v9  ;;  %v2726_v9 = vsel %vm2710_vm0, %v3549_v24, 0.0 }
 0x4f1   : > { %v2651_v37 = vpop.f32.mrb[120].mxu0  ;;  %v2742_v59 = vmul.f32 0.1, %v2726_v9 }
 0x4f2   : > { %2762 = vst [vmem:[%s5239_s18 + $0x18] sm:$0xff] %v2746_v11  ;;  %v2652_v15 = vadd.f32 %v5230_v26, %v2651_v37  ;;  %v2653_v57 = vpop.f32.mrb[121].mxu0 }
 0x4f4   : > { %v2747_v51 = vsub.f32 %v2652_v15, %v2731_v7 }
 0x4f5   : > { %v2656_v38 = vpop.f32.mrb[122].mxu0 }
 0x4f6   : > { %2763 = vst [vmem:[%s5239_s18 + $0x20] sm:$0xff] %v2747_v51  ;;  %v2657_v12 = vadd.f32 %v5230_v26, %v2656_v38  ;;  %v2658_v14 = vpop.f32.mrb[123].mxu0 }
 0x4f8   : > { %v2748_v56 = vsub.f32 %v2657_v12, %v2732_v17 }
 0x4f9   : > { %v2661_v43 = vpop.f32.mrb[124].mxu0 }
 0x4fa   : > { %2764 = vst [vmem:[%s5239_s18 + $0x28] sm:$0xff] %v2748_v56  ;;  %v2662_v50 = vadd.f32 %v5230_v26, %v2661_v43  ;;  %v2663_v52 = vpop.f32.mrb[125].mxu0 }
 0x4fc   : > { %v2749_v23 = vsub.f32 %v2662_v50, %v2733_v40 }
 0x4fd   : > { %v2666_v47 = vpop.f32.mrb[126].mxu0 }
 0x4fe   : > { %2765 = vst [vmem:[%s5239_s18 + $0x30] sm:$0xff] %v2749_v23  ;;  %v2667_v41 = vadd.f32 %v5230_v26, %v2666_v47  ;;  %v2668_v4 = vpop.f32.mrb[127].mxu0 }
 0x500   : > { %v2750_v0 = vsub.f32 %v2667_v41, %v2734_v18 }
 0x501   : > { %v2671_v48 = vpop.f32.mrb[128].mxu0 }
 0x502   : > { %2766 = vst [vmem:[%s5239_s18 + $0x38] sm:$0xff] %v2750_v0  ;;  %v2672_v44 = vadd.f32 %v5230_v26, %v2671_v48  ;;  %v2673_v22 = vpop.f32.mrb[129].mxu0 }
 0x504   : > { %v2751_v19 = vsub.f32 %v2672_v44, %v2735_v32 }
 0x505   : > { %v2676_v49 = vpop.f32.mrb[130].mxu0 }
 0x506   : > { %2767 = vst [vmem:[%s5239_s18 + $0x40] sm:$0xff] %v2751_v19  ;;  %v2677_v53 = vadd.f32 %v5230_v26, %v2676_v49  ;;  %v2678_v28 = vpop.f32.mrb[131].mxu0 }
 0x508   : > { %v2752_v8 = vsub.f32 %v2677_v53, %v2736_v3 }
 0x509   : > { %v2681_v55 = vpop.f32.mrb[132].mxu0 }
 0x50a   : > { %2768 = vst [vmem:[%s5239_s18 + $0x48] sm:$0xff] %v2752_v8  ;;  %v2682_v1 = vadd.f32 %v5230_v26, %v2681_v55  ;;  %v2683_v46 = vpop.f32.mrb[133].mxu0 }
 0x50c   : > { %v2753_v61 = vsub.f32 %v2682_v1, %v2737_v20 }
 0x50d   : > { %v2686_v6 = vpop.f32.mrb[134].mxu0 }
 0x50e   : > { %2769 = vst [vmem:[%s5239_s18 + $0x50] sm:$0xff] %v2753_v61  ;;  %v2687_v13 = vadd.f32 %v5230_v26, %v2686_v6  ;;  %v2688_v60 = vpop.f32.mrb[135].mxu0 }
 0x510   : > { %v2754_v62 = vsub.f32 %v2687_v13, %v2738_v58 }
 0x511   : > { %v2691_v10 = vpop.f32.mrb[136].mxu0 }
 0x512   : > { %2770 = vst [vmem:[%s5239_s18 + $0x58] sm:$0xff] %v2754_v62  ;;  %v2692_v63 = vadd.f32 %v5230_v26, %v2691_v10  ;;  %v2693_v34 = vpop.f32.mrb[137].mxu0 }
 0x514   : > { %v2755_v45 = vsub.f32 %v2692_v63, %v2739_v5 }
 0x515   : > { %v2696_v2 = vpop.f32.mrb[138].mxu0 }
 0x516   : > { %2771 = vst [vmem:[%s5239_s18 + $0x60] sm:$0xff] %v2755_v45  ;;  %v2697_v25 = vadd.f32 %v5230_v26, %v2696_v2  ;;  %v2698_v42 = vpop.f32.mrb[139].mxu0 }
 0x518   : > { %v2756_v33 = vsub.f32 %v2697_v25, %v2740_v35 }
 0x519   : > { %v2701_v39 = vpop.f32.mrb[140].mxu0 }
 0x51a   : > { %2772 = vst [vmem:[%s5239_s18 + $0x68] sm:$0xff] %v2756_v33  ;;  %v2702_v36 = vadd.f32 %v5230_v26, %v2701_v39  ;;  %v2703_v27 = vpop.f32.mrb[141].mxu0 }
 0x51c   : > { %v2757_v7 = vsub.f32 %v2702_v36, %v2741_v30 }
 0x51d   : > { %v2706_v11 = vpop.f32.mrb[142].mxu0 }
 0x51e   : > { %2773 = vst [vmem:[%s5239_s18 + $0x70] sm:$0xff] %v2757_v7  ;;  %v2707_v37 = vadd.f32 %v5230_v26, %v2706_v11  ;;  %v2708_v15 = vpop.f32.mrb[143].mxu0 }
 0x520   : > { %v2758_v57 = vsub.f32 %v2707_v37, %v2742_v59 }
 0x522   : > { %2774 = vst [vmem:[%s5239_s18 + $0x78] sm:$0xff] %v2758_v57 }
 0x523 PF: > { %s21_s17 = sadd.s32 1, %s3556_s17  }
 0x524   : > { %p18_p4 = scmp.ge.s32.totalorder %s21_s17, 4  }
 0x526   :  { %20 = sbr.rel (!%p18_p4) target bundleno = 1 (0x1), region = 94 }

</bundles_post_ra>
